<compile_context>
chip_gen: v7x
topology: tpu7x:2x2x1
jax: 0.10.0
libtpu: 0.0.40
codegen_flags: <defaults>
</compile_context>

<pallas_src>
import jax
import jax.numpy as jnp
from jax import lax
from jax.experimental import pallas as pl
from jax.experimental.pallas import tpu as pltpu

KH = KW = 3  # both convs are 3x3, stride 1, VALID padding


def conv_diff_kernel(x_ref, wb_ref, o_ref):
    # x_ref : (1, Cin, H, W)          one image, VMEM
    # wb_ref: (Cout, Cin*KH*KW + 1)   folded [w1-w2 | b1-b2], SMEM scalars
    # o_ref : (1, Cout, Ho, Wo)       v1 - v2, written in final layout
    _, Cin, H, W = x_ref.shape
    _, Cout, Ho, Wo = o_ref.shape
    n_taps = Cin * KH * KW

    # In-kernel im2col: hoist the Cin*3*3 shifted (Ho, Wo) windows once
    # (~2 vregs each) and reuse them for every output channel.
    img = x_ref[0].astype(jnp.float32)              # (Cin, H, W)
    wins = [img[c, dy:dy + Ho, dx:dx + Wo]
            for c in range(Cin) for dy in range(KH) for dx in range(KW)]

    for co in range(Cout):
        # Bias-seeded accumulator (bias = last column of the weight table).
        acc = jnp.broadcast_to(wb_ref[co, n_taps], (Ho, Wo)).astype(jnp.float32)
        for t in range(n_taps):
            # SMEM scalar -> VPU splat-FMA; no XLU broadcasts inside the loop.
            acc = acc + wb_ref[co, t] * wins[t]
        # 14-live-lane masked store: cheaper at this size than any
        # post-kernel relayout/transpose pass over HBM.
        o_ref[0, co] = acc.astype(o_ref.dtype)


@jax.jit
def model_forward(x_nchw, w1, b1, w2, b2):
    N, Cin, H, W = x_nchw.shape
    Cout = w1.shape[0]
    Ho, Wo = H - (KH - 1), W - (KW - 1)
    n_taps = Cin * KH * KW

    # Algebraic fold (linearity of convolution):
    #   (conv(x, w1) + b1) - (conv(x, w2) + b2) == conv(x, w1-w2) + (b1-b2)
    # Single tiny fusion over 160 floats; everything else happens in-kernel.
    wb = jnp.concatenate(
        [(w1 - w2).reshape(Cout, n_taps),
         (b1 - b2).reshape(Cout, 1)], axis=1).astype(jnp.float32)

    return pl.pallas_call(
        conv_diff_kernel,
        out_shape=jax.ShapeDtypeStruct((N, Cout, Ho, Wo), x_nchw.dtype),
        grid=(N,),
        in_specs=[
            pl.BlockSpec((1, Cin, H, W), lambda n: (n, 0, 0, 0)),
            pl.BlockSpec(memory_space=pltpu.MemorySpace.SMEM),
        ],
        out_specs=pl.BlockSpec((1, Cout, Ho, Wo), lambda n: (n, 0, 0, 0)),
        compiler_params=pltpu.CompilerParams(
            dimension_semantics=("parallel",)),  # N>=2 shards across v7x TCs
    )(x_nchw, wb)


def _reference(x, w1, b1, w2, b2):
    dn = lax.conv_dimension_numbers(x.shape, w1.shape, ("NCHW", "OIHW", "NCHW"))
    y1 = lax.conv_general_dilated(x, w1, (1, 1), "VALID", dimension_numbers=dn)
    y1 = y1 + b1[None, :, None, None]
    y2 = lax.conv_general_dilated(x, w2, (1, 1), "VALID", dimension_numbers=dn)
    y2 = y2 + b2[None, :, None, None]
    return y1 - y2


if __name__ == "__main__":
    key = jax.random.PRNGKey(0)
    kx, kw1, kb1, kw2, kb2 = jax.random.split(key, 5)

    N, Cin, H, W = 2, 1, 16, 16
    Cout = 16

    x = jax.random.normal(kx, (N, Cin, H, W), jnp.float32)

    # Deterministic PyTorch-style Conv2d init: U(-k, k), k = 1/sqrt(Cin*KH*KW)
    k = 1.0 / float(Cin * KH * KW) ** 0.5
    w1 = jax.random.uniform(kw1, (Cout, Cin, KH, KW), jnp.float32, -k, k)
    b1 = jax.random.uniform(kb1, (Cout,), jnp.float32, -k, k)
    w2 = jax.random.uniform(kw2, (Cout, Cin, KH, KW), jnp.float32, -k, k)
    b2 = jax.random.uniform(kb2, (Cout,), jnp.float32, -k, k)

    out = jax.block_until_ready(model_forward(x, w1, b1, w2, b2))

    ref = _reference(x, w1, b1, w2, b2)
    assert out.shape == (N, Cout, H - 2, W - 2)
    assert jnp.allclose(out, ref, atol=1e-4, rtol=1e-4), "mismatch vs lax.conv reference"

    print("KERNEL_OK")
</pallas_src>

<mosaic_0001>
module attributes {stable_mosaic.version = 11 : i64} {
  func.func @conv_diff_kernel(%arg0: i32, %arg1: memref<1x1x16x16xf32, #tpu.memory_space<vmem>>, %arg2: memref<16x10xf32, #tpu.memory_space<smem>>, %arg3: memref<1x16x14x14xf32, #tpu.memory_space<vmem>>) attributes {dimension_semantics = [#tpu.dimension_semantics<parallel>], iteration_bounds = array<i64: 2>, scalar_prefetch = 0 : i64, scratch_operands = 0 : i64, tpu.core_type = #tpu.core_type<tc>, window_params = [{transform_indices = @transform_0, window_bounds = array<i64: 1, 1, 16, 16>}, {transform_indices = @transform_1, window_bounds = array<i64: 16, 10>}, {transform_indices = @transform_2, window_bounds = array<i64: 1, 16, 14, 14>}]} {
    %c0 = arith.constant 0 : index
    %c0_0 = arith.constant 0 : index
    %c0_1 = arith.constant 0 : index
    %c0_2 = arith.constant 0 : index
    %0 = vector.load %arg1[%c0, %c0_0, %c0_1, %c0_2] : memref<1x1x16x16xf32, #tpu.memory_space<vmem>>, vector<1x1x16x16xf32>
    %1 = vector.shape_cast %0 : vector<1x1x16x16xf32> to vector<1x16x16xf32>
    %2 = vector.extract_strided_slice %1 {offsets = [0, 0, 0], sizes = [1, 14, 14], strides = [1, 1, 1]} : vector<1x16x16xf32> to vector<1x14x14xf32>
    %3 = vector.shape_cast %2 : vector<1x14x14xf32> to vector<14x14xf32>
    %4 = vector.extract_strided_slice %1 {offsets = [0, 0, 1], sizes = [1, 14, 14], strides = [1, 1, 1]} : vector<1x16x16xf32> to vector<1x14x14xf32>
    %5 = vector.shape_cast %4 : vector<1x14x14xf32> to vector<14x14xf32>
    %6 = vector.extract_strided_slice %1 {offsets = [0, 0, 2], sizes = [1, 14, 14], strides = [1, 1, 1]} : vector<1x16x16xf32> to vector<1x14x14xf32>
    %7 = vector.shape_cast %6 : vector<1x14x14xf32> to vector<14x14xf32>
    %8 = vector.extract_strided_slice %1 {offsets = [0, 1, 0], sizes = [1, 14, 14], strides = [1, 1, 1]} : vector<1x16x16xf32> to vector<1x14x14xf32>
    %9 = vector.shape_cast %8 : vector<1x14x14xf32> to vector<14x14xf32>
    %10 = vector.extract_strided_slice %1 {offsets = [0, 1, 1], sizes = [1, 14, 14], strides = [1, 1, 1]} : vector<1x16x16xf32> to vector<1x14x14xf32>
    %11 = vector.shape_cast %10 : vector<1x14x14xf32> to vector<14x14xf32>
    %12 = vector.extract_strided_slice %1 {offsets = [0, 1, 2], sizes = [1, 14, 14], strides = [1, 1, 1]} : vector<1x16x16xf32> to vector<1x14x14xf32>
    %13 = vector.shape_cast %12 : vector<1x14x14xf32> to vector<14x14xf32>
    %14 = vector.extract_strided_slice %1 {offsets = [0, 2, 0], sizes = [1, 14, 14], strides = [1, 1, 1]} : vector<1x16x16xf32> to vector<1x14x14xf32>
    %15 = vector.shape_cast %14 : vector<1x14x14xf32> to vector<14x14xf32>
    %16 = vector.extract_strided_slice %1 {offsets = [0, 2, 1], sizes = [1, 14, 14], strides = [1, 1, 1]} : vector<1x16x16xf32> to vector<1x14x14xf32>
    %17 = vector.shape_cast %16 : vector<1x14x14xf32> to vector<14x14xf32>
    %18 = vector.extract_strided_slice %1 {offsets = [0, 2, 2], sizes = [1, 14, 14], strides = [1, 1, 1]} : vector<1x16x16xf32> to vector<1x14x14xf32>
    %19 = vector.shape_cast %18 : vector<1x14x14xf32> to vector<14x14xf32>
    %c0_3 = arith.constant 0 : index
    %c9 = arith.constant 9 : index
    %20 = memref.load %arg2[%c0_3, %c9] : memref<16x10xf32, #tpu.memory_space<smem>>
    %21 = vector.broadcast %20 : f32 to vector<14x14xf32>
    %c0_4 = arith.constant 0 : index
    %c0_5 = arith.constant 0 : index
    %22 = memref.load %arg2[%c0_4, %c0_5] : memref<16x10xf32, #tpu.memory_space<smem>>
    %23 = vector.broadcast %22 : f32 to vector<14x14xf32>
    %24 = arith.mulf %23, %3 : vector<14x14xf32>
    %25 = arith.addf %21, %24 : vector<14x14xf32>
    %c0_6 = arith.constant 0 : index
    %c1 = arith.constant 1 : index
    %26 = memref.load %arg2[%c0_6, %c1] : memref<16x10xf32, #tpu.memory_space<smem>>
    %27 = vector.broadcast %26 : f32 to vector<14x14xf32>
    %28 = arith.mulf %27, %5 : vector<14x14xf32>
    %29 = arith.addf %25, %28 : vector<14x14xf32>
    %c0_7 = arith.constant 0 : index
    %c2 = arith.constant 2 : index
    %30 = memref.load %arg2[%c0_7, %c2] : memref<16x10xf32, #tpu.memory_space<smem>>
    %31 = vector.broadcast %30 : f32 to vector<14x14xf32>
    %32 = arith.mulf %31, %7 : vector<14x14xf32>
    %33 = arith.addf %29, %32 : vector<14x14xf32>
    %c0_8 = arith.constant 0 : index
    %c3 = arith.constant 3 : index
    %34 = memref.load %arg2[%c0_8, %c3] : memref<16x10xf32, #tpu.memory_space<smem>>
    %35 = vector.broadcast %34 : f32 to vector<14x14xf32>
    %36 = arith.mulf %35, %9 : vector<14x14xf32>
    %37 = arith.addf %33, %36 : vector<14x14xf32>
    %c0_9 = arith.constant 0 : index
    %c4 = arith.constant 4 : index
    %38 = memref.load %arg2[%c0_9, %c4] : memref<16x10xf32, #tpu.memory_space<smem>>
    %39 = vector.broadcast %38 : f32 to vector<14x14xf32>
    %40 = arith.mulf %39, %11 : vector<14x14xf32>
    %41 = arith.addf %37, %40 : vector<14x14xf32>
    %c0_10 = arith.constant 0 : index
    %c5 = arith.constant 5 : index
    %42 = memref.load %arg2[%c0_10, %c5] : memref<16x10xf32, #tpu.memory_space<smem>>
    %43 = vector.broadcast %42 : f32 to vector<14x14xf32>
    %44 = arith.mulf %43, %13 : vector<14x14xf32>
    %45 = arith.addf %41, %44 : vector<14x14xf32>
    %c0_11 = arith.constant 0 : index
    %c6 = arith.constant 6 : index
    %46 = memref.load %arg2[%c0_11, %c6] : memref<16x10xf32, #tpu.memory_space<smem>>
    %47 = vector.broadcast %46 : f32 to vector<14x14xf32>
    %48 = arith.mulf %47, %15 : vector<14x14xf32>
    %49 = arith.addf %45, %48 : vector<14x14xf32>
    %c0_12 = arith.constant 0 : index
    %c7 = arith.constant 7 : index
    %50 = memref.load %arg2[%c0_12, %c7] : memref<16x10xf32, #tpu.memory_space<smem>>
    %51 = vector.broadcast %50 : f32 to vector<14x14xf32>
    %52 = arith.mulf %51, %17 : vector<14x14xf32>
    %53 = arith.addf %49, %52 : vector<14x14xf32>
    %c0_13 = arith.constant 0 : index
    %c8 = arith.constant 8 : index
    %54 = memref.load %arg2[%c0_13, %c8] : memref<16x10xf32, #tpu.memory_space<smem>>
    %55 = vector.broadcast %54 : f32 to vector<14x14xf32>
    %56 = arith.mulf %55, %19 : vector<14x14xf32>
    %57 = arith.addf %53, %56 : vector<14x14xf32>
    %c0_14 = arith.constant 0 : index
    %c0_15 = arith.constant 0 : index
    %c0_16 = arith.constant 0 : index
    %c0_17 = arith.constant 0 : index
    %58 = vector.load %arg3[%c0_14, %c0_15, %c0_16, %c0_17] : memref<1x16x14x14xf32, #tpu.memory_space<vmem>>, vector<1x1x14x14xf32>
    %59 = vector.shape_cast %58 : vector<1x1x14x14xf32> to vector<14x14xf32>
    %60 = vector.shape_cast %57 : vector<14x14xf32> to vector<1x1x14x14xf32>
    tpu.vector_store %arg3[%c0_14, %c0_15, %c0_16, %c0_17], %60 {strides = array<i32>} : memref<1x16x14x14xf32, #tpu.memory_space<vmem>>, vector<1x1x14x14xf32>,
    %c1_18 = arith.constant 1 : index
    %c9_19 = arith.constant 9 : index
    %61 = memref.load %arg2[%c1_18, %c9_19] : memref<16x10xf32, #tpu.memory_space<smem>>
    %62 = vector.broadcast %61 : f32 to vector<14x14xf32>
    %c1_20 = arith.constant 1 : index
    %c0_21 = arith.constant 0 : index
    %63 = memref.load %arg2[%c1_20, %c0_21] : memref<16x10xf32, #tpu.memory_space<smem>>
    %64 = vector.broadcast %63 : f32 to vector<14x14xf32>
    %65 = arith.mulf %64, %3 : vector<14x14xf32>
    %66 = arith.addf %62, %65 : vector<14x14xf32>
    %c1_22 = arith.constant 1 : index
    %c1_23 = arith.constant 1 : index
    %67 = memref.load %arg2[%c1_22, %c1_23] : memref<16x10xf32, #tpu.memory_space<smem>>
    %68 = vector.broadcast %67 : f32 to vector<14x14xf32>
    %69 = arith.mulf %68, %5 : vector<14x14xf32>
    %70 = arith.addf %66, %69 : vector<14x14xf32>
    %c1_24 = arith.constant 1 : index
    %c2_25 = arith.constant 2 : index
    %71 = memref.load %arg2[%c1_24, %c2_25] : memref<16x10xf32, #tpu.memory_space<smem>>
    %72 = vector.broadcast %71 : f32 to vector<14x14xf32>
    %73 = arith.mulf %72, %7 : vector<14x14xf32>
    %74 = arith.addf %70, %73 : vector<14x14xf32>
    %c1_26 = arith.constant 1 : index
    %c3_27 = arith.constant 3 : index
    %75 = memref.load %arg2[%c1_26, %c3_27] : memref<16x10xf32, #tpu.memory_space<smem>>
    %76 = vector.broadcast %75 : f32 to vector<14x14xf32>
    %77 = arith.mulf %76, %9 : vector<14x14xf32>
    %78 = arith.addf %74, %77 : vector<14x14xf32>
    %c1_28 = arith.constant 1 : index
    %c4_29 = arith.constant 4 : index
    %79 = memref.load %arg2[%c1_28, %c4_29] : memref<16x10xf32, #tpu.memory_space<smem>>
    %80 = vector.broadcast %79 : f32 to vector<14x14xf32>
    %81 = arith.mulf %80, %11 : vector<14x14xf32>
    %82 = arith.addf %78, %81 : vector<14x14xf32>
    %c1_30 = arith.constant 1 : index
    %c5_31 = arith.constant 5 : index
    %83 = memref.load %arg2[%c1_30, %c5_31] : memref<16x10xf32, #tpu.memory_space<smem>>
    %84 = vector.broadcast %83 : f32 to vector<14x14xf32>
    %85 = arith.mulf %84, %13 : vector<14x14xf32>
    %86 = arith.addf %82, %85 : vector<14x14xf32>
    %c1_32 = arith.constant 1 : index
    %c6_33 = arith.constant 6 : index
    %87 = memref.load %arg2[%c1_32, %c6_33] : memref<16x10xf32, #tpu.memory_space<smem>>
    %88 = vector.broadcast %87 : f32 to vector<14x14xf32>
    %89 = arith.mulf %88, %15 : vector<14x14xf32>
    %90 = arith.addf %86, %89 : vector<14x14xf32>
    %c1_34 = arith.constant 1 : index
    %c7_35 = arith.constant 7 : index
    %91 = memref.load %arg2[%c1_34, %c7_35] : memref<16x10xf32, #tpu.memory_space<smem>>
    %92 = vector.broadcast %91 : f32 to vector<14x14xf32>
    %93 = arith.mulf %92, %17 : vector<14x14xf32>
    %94 = arith.addf %90, %93 : vector<14x14xf32>
    %c1_36 = arith.constant 1 : index
    %c8_37 = arith.constant 8 : index
    %95 = memref.load %arg2[%c1_36, %c8_37] : memref<16x10xf32, #tpu.memory_space<smem>>
    %96 = vector.broadcast %95 : f32 to vector<14x14xf32>
    %97 = arith.mulf %96, %19 : vector<14x14xf32>
    %98 = arith.addf %94, %97 : vector<14x14xf32>
    %c0_38 = arith.constant 0 : index
    %c1_39 = arith.constant 1 : index
    %c0_40 = arith.constant 0 : index
    %c0_41 = arith.constant 0 : index
    %99 = vector.load %arg3[%c0_38, %c1_39, %c0_40, %c0_41] : memref<1x16x14x14xf32, #tpu.memory_space<vmem>>, vector<1x1x14x14xf32>
    %100 = vector.shape_cast %99 : vector<1x1x14x14xf32> to vector<14x14xf32>
    %101 = vector.shape_cast %98 : vector<14x14xf32> to vector<1x1x14x14xf32>
    tpu.vector_store %arg3[%c0_38, %c1_39, %c0_40, %c0_41], %101 {strides = array<i32>} : memref<1x16x14x14xf32, #tpu.memory_space<vmem>>, vector<1x1x14x14xf32>,
    %c2_42 = arith.constant 2 : index
    %c9_43 = arith.constant 9 : index
    %102 = memref.load %arg2[%c2_42, %c9_43] : memref<16x10xf32, #tpu.memory_space<smem>>
    %103 = vector.broadcast %102 : f32 to vector<14x14xf32>
    %c2_44 = arith.constant 2 : index
    %c0_45 = arith.constant 0 : index
    %104 = memref.load %arg2[%c2_44, %c0_45] : memref<16x10xf32, #tpu.memory_space<smem>>
    %105 = vector.broadcast %104 : f32 to vector<14x14xf32>
    %106 = arith.mulf %105, %3 : vector<14x14xf32>
    %107 = arith.addf %103, %106 : vector<14x14xf32>
    %c2_46 = arith.constant 2 : index
    %c1_47 = arith.constant 1 : index
    %108 = memref.load %arg2[%c2_46, %c1_47] : memref<16x10xf32, #tpu.memory_space<smem>>
    %109 = vector.broadcast %108 : f32 to vector<14x14xf32>
    %110 = arith.mulf %109, %5 : vector<14x14xf32>
    %111 = arith.addf %107, %110 : vector<14x14xf32>
    %c2_48 = arith.constant 2 : index
    %c2_49 = arith.constant 2 : index
    %112 = memref.load %arg2[%c2_48, %c2_49] : memref<16x10xf32, #tpu.memory_space<smem>>
    %113 = vector.broadcast %112 : f32 to vector<14x14xf32>
    %114 = arith.mulf %113, %7 : vector<14x14xf32>
    %115 = arith.addf %111, %114 : vector<14x14xf32>
    %c2_50 = arith.constant 2 : index
    %c3_51 = arith.constant 3 : index
    %116 = memref.load %arg2[%c2_50, %c3_51] : memref<16x10xf32, #tpu.memory_space<smem>>
    %117 = vector.broadcast %116 : f32 to vector<14x14xf32>
    %118 = arith.mulf %117, %9 : vector<14x14xf32>
    %119 = arith.addf %115, %118 : vector<14x14xf32>
    %c2_52 = arith.constant 2 : index
    %c4_53 = arith.constant 4 : index
    %120 = memref.load %arg2[%c2_52, %c4_53] : memref<16x10xf32, #tpu.memory_space<smem>>
    %121 = vector.broadcast %120 : f32 to vector<14x14xf32>
    %122 = arith.mulf %121, %11 : vector<14x14xf32>
    %123 = arith.addf %119, %122 : vector<14x14xf32>
    %c2_54 = arith.constant 2 : index
    %c5_55 = arith.constant 5 : index
    %124 = memref.load %arg2[%c2_54, %c5_55] : memref<16x10xf32, #tpu.memory_space<smem>>
    %125 = vector.broadcast %124 : f32 to vector<14x14xf32>
    %126 = arith.mulf %125, %13 : vector<14x14xf32>
    %127 = arith.addf %123, %126 : vector<14x14xf32>
    %c2_56 = arith.constant 2 : index
    %c6_57 = arith.constant 6 : index
    %128 = memref.load %arg2[%c2_56, %c6_57] : memref<16x10xf32, #tpu.memory_space<smem>>
    %129 = vector.broadcast %128 : f32 to vector<14x14xf32>
    %130 = arith.mulf %129, %15 : vector<14x14xf32>
    %131 = arith.addf %127, %130 : vector<14x14xf32>
    %c2_58 = arith.constant 2 : index
    %c7_59 = arith.constant 7 : index
    %132 = memref.load %arg2[%c2_58, %c7_59] : memref<16x10xf32, #tpu.memory_space<smem>>
    %133 = vector.broadcast %132 : f32 to vector<14x14xf32>
    %134 = arith.mulf %133, %17 : vector<14x14xf32>
    %135 = arith.addf %131, %134 : vector<14x14xf32>
    %c2_60 = arith.constant 2 : index
    %c8_61 = arith.constant 8 : index
    %136 = memref.load %arg2[%c2_60, %c8_61] : memref<16x10xf32, #tpu.memory_space<smem>>
    %137 = vector.broadcast %136 : f32 to vector<14x14xf32>
    %138 = arith.mulf %137, %19 : vector<14x14xf32>
    %139 = arith.addf %135, %138 : vector<14x14xf32>
    %c0_62 = arith.constant 0 : index
    %c2_63 = arith.constant 2 : index
    %c0_64 = arith.constant 0 : index
    %c0_65 = arith.constant 0 : index
    %140 = vector.load %arg3[%c0_62, %c2_63, %c0_64, %c0_65] : memref<1x16x14x14xf32, #tpu.memory_space<vmem>>, vector<1x1x14x14xf32>
    %141 = vector.shape_cast %140 : vector<1x1x14x14xf32> to vector<14x14xf32>
    %142 = vector.shape_cast %139 : vector<14x14xf32> to vector<1x1x14x14xf32>
    tpu.vector_store %arg3[%c0_62, %c2_63, %c0_64, %c0_65], %142 {strides = array<i32>} : memref<1x16x14x14xf32, #tpu.memory_space<vmem>>, vector<1x1x14x14xf32>,
    %c3_66 = arith.constant 3 : index
    %c9_67 = arith.constant 9 : index
    %143 = memref.load %arg2[%c3_66, %c9_67] : memref<16x10xf32, #tpu.memory_space<smem>>
    %144 = vector.broadcast %143 : f32 to vector<14x14xf32>
    %c3_68 = arith.constant 3 : index
    %c0_69 = arith.constant 0 : index
    %145 = memref.load %arg2[%c3_68, %c0_69] : memref<16x10xf32, #tpu.memory_space<smem>>
    %146 = vector.broadcast %145 : f32 to vector<14x14xf32>
    %147 = arith.mulf %146, %3 : vector<14x14xf32>
    %148 = arith.addf %144, %147 : vector<14x14xf32>
    %c3_70 = arith.constant 3 : index
    %c1_71 = arith.constant 1 : index
    %149 = memref.load %arg2[%c3_70, %c1_71] : memref<16x10xf32, #tpu.memory_space<smem>>
    %150 = vector.broadcast %149 : f32 to vector<14x14xf32>
    %151 = arith.mulf %150, %5 : vector<14x14xf32>
    %152 = arith.addf %148, %151 : vector<14x14xf32>
    %c3_72 = arith.constant 3 : index
    %c2_73 = arith.constant 2 : index
    %153 = memref.load %arg2[%c3_72, %c2_73] : memref<16x10xf32, #tpu.memory_space<smem>>
    %154 = vector.broadcast %153 : f32 to vector<14x14xf32>
    %155 = arith.mulf %154, %7 : vector<14x14xf32>
    %156 = arith.addf %152, %155 : vector<14x14xf32>
    %c3_74 = arith.constant 3 : index
    %c3_75 = arith.constant 3 : index
    %157 = memref.load %arg2[%c3_74, %c3_75] : memref<16x10xf32, #tpu.memory_space<smem>>
    %158 = vector.broadcast %157 : f32 to vector<14x14xf32>
    %159 = arith.mulf %158, %9 : vector<14x14xf32>
    %160 = arith.addf %156, %159 : vector<14x14xf32>
    %c3_76 = arith.constant 3 : index
    %c4_77 = arith.constant 4 : index
    %161 = memref.load %arg2[%c3_76, %c4_77] : memref<16x10xf32, #tpu.memory_space<smem>>
    %162 = vector.broadcast %161 : f32 to vector<14x14xf32>
    %163 = arith.mulf %162, %11 : vector<14x14xf32>
    %164 = arith.addf %160, %163 : vector<14x14xf32>
    %c3_78 = arith.constant 3 : index
    %c5_79 = arith.constant 5 : index
    %165 = memref.load %arg2[%c3_78, %c5_79] : memref<16x10xf32, #tpu.memory_space<smem>>
    %166 = vector.broadcast %165 : f32 to vector<14x14xf32>
    %167 = arith.mulf %166, %13 : vector<14x14xf32>
    %168 = arith.addf %164, %167 : vector<14x14xf32>
    %c3_80 = arith.constant 3 : index
    %c6_81 = arith.constant 6 : index
    %169 = memref.load %arg2[%c3_80, %c6_81] : memref<16x10xf32, #tpu.memory_space<smem>>
    %170 = vector.broadcast %169 : f32 to vector<14x14xf32>
    %171 = arith.mulf %170, %15 : vector<14x14xf32>
    %172 = arith.addf %168, %171 : vector<14x14xf32>
    %c3_82 = arith.constant 3 : index
    %c7_83 = arith.constant 7 : index
    %173 = memref.load %arg2[%c3_82, %c7_83] : memref<16x10xf32, #tpu.memory_space<smem>>
    %174 = vector.broadcast %173 : f32 to vector<14x14xf32>
    %175 = arith.mulf %174, %17 : vector<14x14xf32>
    %176 = arith.addf %172, %175 : vector<14x14xf32>
    %c3_84 = arith.constant 3 : index
    %c8_85 = arith.constant 8 : index
    %177 = memref.load %arg2[%c3_84, %c8_85] : memref<16x10xf32, #tpu.memory_space<smem>>
    %178 = vector.broadcast %177 : f32 to vector<14x14xf32>
    %179 = arith.mulf %178, %19 : vector<14x14xf32>
    %180 = arith.addf %176, %179 : vector<14x14xf32>
    %c0_86 = arith.constant 0 : index
    %c3_87 = arith.constant 3 : index
    %c0_88 = arith.constant 0 : index
    %c0_89 = arith.constant 0 : index
    %181 = vector.load %arg3[%c0_86, %c3_87, %c0_88, %c0_89] : memref<1x16x14x14xf32, #tpu.memory_space<vmem>>, vector<1x1x14x14xf32>
    %182 = vector.shape_cast %181 : vector<1x1x14x14xf32> to vector<14x14xf32>
    %183 = vector.shape_cast %180 : vector<14x14xf32> to vector<1x1x14x14xf32>
    tpu.vector_store %arg3[%c0_86, %c3_87, %c0_88, %c0_89], %183 {strides = array<i32>} : memref<1x16x14x14xf32, #tpu.memory_space<vmem>>, vector<1x1x14x14xf32>,
    %c4_90 = arith.constant 4 : index
    %c9_91 = arith.constant 9 : index
    %184 = memref.load %arg2[%c4_90, %c9_91] : memref<16x10xf32, #tpu.memory_space<smem>>
    %185 = vector.broadcast %184 : f32 to vector<14x14xf32>
    %c4_92 = arith.constant 4 : index
    %c0_93 = arith.constant 0 : index
    %186 = memref.load %arg2[%c4_92, %c0_93] : memref<16x10xf32, #tpu.memory_space<smem>>
    %187 = vector.broadcast %186 : f32 to vector<14x14xf32>
    %188 = arith.mulf %187, %3 : vector<14x14xf32>
    %189 = arith.addf %185, %188 : vector<14x14xf32>
    %c4_94 = arith.constant 4 : index
    %c1_95 = arith.constant 1 : index
    %190 = memref.load %arg2[%c4_94, %c1_95] : memref<16x10xf32, #tpu.memory_space<smem>>
    %191 = vector.broadcast %190 : f32 to vector<14x14xf32>
    %192 = arith.mulf %191, %5 : vector<14x14xf32>
    %193 = arith.addf %189, %192 : vector<14x14xf32>
    %c4_96 = arith.constant 4 : index
    %c2_97 = arith.constant 2 : index
    %194 = memref.load %arg2[%c4_96, %c2_97] : memref<16x10xf32, #tpu.memory_space<smem>>
    %195 = vector.broadcast %194 : f32 to vector<14x14xf32>
    %196 = arith.mulf %195, %7 : vector<14x14xf32>
    %197 = arith.addf %193, %196 : vector<14x14xf32>
    %c4_98 = arith.constant 4 : index
    %c3_99 = arith.constant 3 : index
    %198 = memref.load %arg2[%c4_98, %c3_99] : memref<16x10xf32, #tpu.memory_space<smem>>
    %199 = vector.broadcast %198 : f32 to vector<14x14xf32>
    %200 = arith.mulf %199, %9 : vector<14x14xf32>
    %201 = arith.addf %197, %200 : vector<14x14xf32>
    %c4_100 = arith.constant 4 : index
    %c4_101 = arith.constant 4 : index
    %202 = memref.load %arg2[%c4_100, %c4_101] : memref<16x10xf32, #tpu.memory_space<smem>>
    %203 = vector.broadcast %202 : f32 to vector<14x14xf32>
    %204 = arith.mulf %203, %11 : vector<14x14xf32>
    %205 = arith.addf %201, %204 : vector<14x14xf32>
    %c4_102 = arith.constant 4 : index
    %c5_103 = arith.constant 5 : index
    %206 = memref.load %arg2[%c4_102, %c5_103] : memref<16x10xf32, #tpu.memory_space<smem>>
    %207 = vector.broadcast %206 : f32 to vector<14x14xf32>
    %208 = arith.mulf %207, %13 : vector<14x14xf32>
    %209 = arith.addf %205, %208 : vector<14x14xf32>
    %c4_104 = arith.constant 4 : index
    %c6_105 = arith.constant 6 : index
    %210 = memref.load %arg2[%c4_104, %c6_105] : memref<16x10xf32, #tpu.memory_space<smem>>
    %211 = vector.broadcast %210 : f32 to vector<14x14xf32>
    %212 = arith.mulf %211, %15 : vector<14x14xf32>
    %213 = arith.addf %209, %212 : vector<14x14xf32>
    %c4_106 = arith.constant 4 : index
    %c7_107 = arith.constant 7 : index
    %214 = memref.load %arg2[%c4_106, %c7_107] : memref<16x10xf32, #tpu.memory_space<smem>>
    %215 = vector.broadcast %214 : f32 to vector<14x14xf32>
    %216 = arith.mulf %215, %17 : vector<14x14xf32>
    %217 = arith.addf %213, %216 : vector<14x14xf32>
    %c4_108 = arith.constant 4 : index
    %c8_109 = arith.constant 8 : index
    %218 = memref.load %arg2[%c4_108, %c8_109] : memref<16x10xf32, #tpu.memory_space<smem>>
    %219 = vector.broadcast %218 : f32 to vector<14x14xf32>
    %220 = arith.mulf %219, %19 : vector<14x14xf32>
    %221 = arith.addf %217, %220 : vector<14x14xf32>
    %c0_110 = arith.constant 0 : index
    %c4_111 = arith.constant 4 : index
    %c0_112 = arith.constant 0 : index
    %c0_113 = arith.constant 0 : index
    %222 = vector.load %arg3[%c0_110, %c4_111, %c0_112, %c0_113] : memref<1x16x14x14xf32, #tpu.memory_space<vmem>>, vector<1x1x14x14xf32>
    %223 = vector.shape_cast %222 : vector<1x1x14x14xf32> to vector<14x14xf32>
    %224 = vector.shape_cast %221 : vector<14x14xf32> to vector<1x1x14x14xf32>
    tpu.vector_store %arg3[%c0_110, %c4_111, %c0_112, %c0_113], %224 {strides = array<i32>} : memref<1x16x14x14xf32, #tpu.memory_space<vmem>>, vector<1x1x14x14xf32>,
    %c5_114 = arith.constant 5 : index
    %c9_115 = arith.constant 9 : index
    %225 = memref.load %arg2[%c5_114, %c9_115] : memref<16x10xf32, #tpu.memory_space<smem>>
    %226 = vector.broadcast %225 : f32 to vector<14x14xf32>
    %c5_116 = arith.constant 5 : index
    %c0_117 = arith.constant 0 : index
    %227 = memref.load %arg2[%c5_116, %c0_117] : memref<16x10xf32, #tpu.memory_space<smem>>
    %228 = vector.broadcast %227 : f32 to vector<14x14xf32>
    %229 = arith.mulf %228, %3 : vector<14x14xf32>
    %230 = arith.addf %226, %229 : vector<14x14xf32>
    %c5_118 = arith.constant 5 : index
    %c1_119 = arith.constant 1 : index
    %231 = memref.load %arg2[%c5_118, %c1_119] : memref<16x10xf32, #tpu.memory_space<smem>>
    %232 = vector.broadcast %231 : f32 to vector<14x14xf32>
    %233 = arith.mulf %232, %5 : vector<14x14xf32>
    %234 = arith.addf %230, %233 : vector<14x14xf32>
    %c5_120 = arith.constant 5 : index
    %c2_121 = arith.constant 2 : index
    %235 = memref.load %arg2[%c5_120, %c2_121] : memref<16x10xf32, #tpu.memory_space<smem>>
    %236 = vector.broadcast %235 : f32 to vector<14x14xf32>
    %237 = arith.mulf %236, %7 : vector<14x14xf32>
    %238 = arith.addf %234, %237 : vector<14x14xf32>
    %c5_122 = arith.constant 5 : index
    %c3_123 = arith.constant 3 : index
    %239 = memref.load %arg2[%c5_122, %c3_123] : memref<16x10xf32, #tpu.memory_space<smem>>
    %240 = vector.broadcast %239 : f32 to vector<14x14xf32>
    %241 = arith.mulf %240, %9 : vector<14x14xf32>
    %242 = arith.addf %238, %241 : vector<14x14xf32>
    %c5_124 = arith.constant 5 : index
    %c4_125 = arith.constant 4 : index
    %243 = memref.load %arg2[%c5_124, %c4_125] : memref<16x10xf32, #tpu.memory_space<smem>>
    %244 = vector.broadcast %243 : f32 to vector<14x14xf32>
    %245 = arith.mulf %244, %11 : vector<14x14xf32>
    %246 = arith.addf %242, %245 : vector<14x14xf32>
    %c5_126 = arith.constant 5 : index
    %c5_127 = arith.constant 5 : index
    %247 = memref.load %arg2[%c5_126, %c5_127] : memref<16x10xf32, #tpu.memory_space<smem>>
    %248 = vector.broadcast %247 : f32 to vector<14x14xf32>
    %249 = arith.mulf %248, %13 : vector<14x14xf32>
    %250 = arith.addf %246, %249 : vector<14x14xf32>
    %c5_128 = arith.constant 5 : index
    %c6_129 = arith.constant 6 : index
    %251 = memref.load %arg2[%c5_128, %c6_129] : memref<16x10xf32, #tpu.memory_space<smem>>
    %252 = vector.broadcast %251 : f32 to vector<14x14xf32>
    %253 = arith.mulf %252, %15 : vector<14x14xf32>
    %254 = arith.addf %250, %253 : vector<14x14xf32>
    %c5_130 = arith.constant 5 : index
    %c7_131 = arith.constant 7 : index
    %255 = memref.load %arg2[%c5_130, %c7_131] : memref<16x10xf32, #tpu.memory_space<smem>>
    %256 = vector.broadcast %255 : f32 to vector<14x14xf32>
    %257 = arith.mulf %256, %17 : vector<14x14xf32>
    %258 = arith.addf %254, %257 : vector<14x14xf32>
    %c5_132 = arith.constant 5 : index
    %c8_133 = arith.constant 8 : index
    %259 = memref.load %arg2[%c5_132, %c8_133] : memref<16x10xf32, #tpu.memory_space<smem>>
    %260 = vector.broadcast %259 : f32 to vector<14x14xf32>
    %261 = arith.mulf %260, %19 : vector<14x14xf32>
    %262 = arith.addf %258, %261 : vector<14x14xf32>
    %c0_134 = arith.constant 0 : index
    %c5_135 = arith.constant 5 : index
    %c0_136 = arith.constant 0 : index
    %c0_137 = arith.constant 0 : index
    %263 = vector.load %arg3[%c0_134, %c5_135, %c0_136, %c0_137] : memref<1x16x14x14xf32, #tpu.memory_space<vmem>>, vector<1x1x14x14xf32>
    %264 = vector.shape_cast %263 : vector<1x1x14x14xf32> to vector<14x14xf32>
    %265 = vector.shape_cast %262 : vector<14x14xf32> to vector<1x1x14x14xf32>
    tpu.vector_store %arg3[%c0_134, %c5_135, %c0_136, %c0_137], %265 {strides = array<i32>} : memref<1x16x14x14xf32, #tpu.memory_space<vmem>>, vector<1x1x14x14xf32>,
    %c6_138 = arith.constant 6 : index
    %c9_139 = arith.constant 9 : index
    %266 = memref.load %arg2[%c6_138, %c9_139] : memref<16x10xf32, #tpu.memory_space<smem>>
    %267 = vector.broadcast %266 : f32 to vector<14x14xf32>
    %c6_140 = arith.constant 6 : index
    %c0_141 = arith.constant 0 : index
    %268 = memref.load %arg2[%c6_140, %c0_141] : memref<16x10xf32, #tpu.memory_space<smem>>
    %269 = vector.broadcast %268 : f32 to vector<14x14xf32>
    %270 = arith.mulf %269, %3 : vector<14x14xf32>
    %271 = arith.addf %267, %270 : vector<14x14xf32>
    %c6_142 = arith.constant 6 : index
    %c1_143 = arith.constant 1 : index
    %272 = memref.load %arg2[%c6_142, %c1_143] : memref<16x10xf32, #tpu.memory_space<smem>>
    %273 = vector.broadcast %272 : f32 to vector<14x14xf32>
    %274 = arith.mulf %273, %5 : vector<14x14xf32>
    %275 = arith.addf %271, %274 : vector<14x14xf32>
    %c6_144 = arith.constant 6 : index
    %c2_145 = arith.constant 2 : index
    %276 = memref.load %arg2[%c6_144, %c2_145] : memref<16x10xf32, #tpu.memory_space<smem>>
    %277 = vector.broadcast %276 : f32 to vector<14x14xf32>
    %278 = arith.mulf %277, %7 : vector<14x14xf32>
    %279 = arith.addf %275, %278 : vector<14x14xf32>
    %c6_146 = arith.constant 6 : index
    %c3_147 = arith.constant 3 : index
    %280 = memref.load %arg2[%c6_146, %c3_147] : memref<16x10xf32, #tpu.memory_space<smem>>
    %281 = vector.broadcast %280 : f32 to vector<14x14xf32>
    %282 = arith.mulf %281, %9 : vector<14x14xf32>
    %283 = arith.addf %279, %282 : vector<14x14xf32>
    %c6_148 = arith.constant 6 : index
    %c4_149 = arith.constant 4 : index
    %284 = memref.load %arg2[%c6_148, %c4_149] : memref<16x10xf32, #tpu.memory_space<smem>>
    %285 = vector.broadcast %284 : f32 to vector<14x14xf32>
    %286 = arith.mulf %285, %11 : vector<14x14xf32>
    %287 = arith.addf %283, %286 : vector<14x14xf32>
    %c6_150 = arith.constant 6 : index
    %c5_151 = arith.constant 5 : index
    %288 = memref.load %arg2[%c6_150, %c5_151] : memref<16x10xf32, #tpu.memory_space<smem>>
    %289 = vector.broadcast %288 : f32 to vector<14x14xf32>
    %290 = arith.mulf %289, %13 : vector<14x14xf32>
    %291 = arith.addf %287, %290 : vector<14x14xf32>
    %c6_152 = arith.constant 6 : index
    %c6_153 = arith.constant 6 : index
    %292 = memref.load %arg2[%c6_152, %c6_153] : memref<16x10xf32, #tpu.memory_space<smem>>
    %293 = vector.broadcast %292 : f32 to vector<14x14xf32>
    %294 = arith.mulf %293, %15 : vector<14x14xf32>
    %295 = arith.addf %291, %294 : vector<14x14xf32>
    %c6_154 = arith.constant 6 : index
    %c7_155 = arith.constant 7 : index
    %296 = memref.load %arg2[%c6_154, %c7_155] : memref<16x10xf32, #tpu.memory_space<smem>>
    %297 = vector.broadcast %296 : f32 to vector<14x14xf32>
    %298 = arith.mulf %297, %17 : vector<14x14xf32>
    %299 = arith.addf %295, %298 : vector<14x14xf32>
    %c6_156 = arith.constant 6 : index
    %c8_157 = arith.constant 8 : index
    %300 = memref.load %arg2[%c6_156, %c8_157] : memref<16x10xf32, #tpu.memory_space<smem>>
    %301 = vector.broadcast %300 : f32 to vector<14x14xf32>
    %302 = arith.mulf %301, %19 : vector<14x14xf32>
    %303 = arith.addf %299, %302 : vector<14x14xf32>
    %c0_158 = arith.constant 0 : index
    %c6_159 = arith.constant 6 : index
    %c0_160 = arith.constant 0 : index
    %c0_161 = arith.constant 0 : index
    %304 = vector.load %arg3[%c0_158, %c6_159, %c0_160, %c0_161] : memref<1x16x14x14xf32, #tpu.memory_space<vmem>>, vector<1x1x14x14xf32>
    %305 = vector.shape_cast %304 : vector<1x1x14x14xf32> to vector<14x14xf32>
    %306 = vector.shape_cast %303 : vector<14x14xf32> to vector<1x1x14x14xf32>
    tpu.vector_store %arg3[%c0_158, %c6_159, %c0_160, %c0_161], %306 {strides = array<i32>} : memref<1x16x14x14xf32, #tpu.memory_space<vmem>>, vector<1x1x14x14xf32>,
    %c7_162 = arith.constant 7 : index
    %c9_163 = arith.constant 9 : index
    %307 = memref.load %arg2[%c7_162, %c9_163] : memref<16x10xf32, #tpu.memory_space<smem>>
    %308 = vector.broadcast %307 : f32 to vector<14x14xf32>
    %c7_164 = arith.constant 7 : index
    %c0_165 = arith.constant 0 : index
    %309 = memref.load %arg2[%c7_164, %c0_165] : memref<16x10xf32, #tpu.memory_space<smem>>
    %310 = vector.broadcast %309 : f32 to vector<14x14xf32>
    %311 = arith.mulf %310, %3 : vector<14x14xf32>
    %312 = arith.addf %308, %311 : vector<14x14xf32>
    %c7_166 = arith.constant 7 : index
    %c1_167 = arith.constant 1 : index
    %313 = memref.load %arg2[%c7_166, %c1_167] : memref<16x10xf32, #tpu.memory_space<smem>>
    %314 = vector.broadcast %313 : f32 to vector<14x14xf32>
    %315 = arith.mulf %314, %5 : vector<14x14xf32>
    %316 = arith.addf %312, %315 : vector<14x14xf32>
    %c7_168 = arith.constant 7 : index
    %c2_169 = arith.constant 2 : index
    %317 = memref.load %arg2[%c7_168, %c2_169] : memref<16x10xf32, #tpu.memory_space<smem>>
    %318 = vector.broadcast %317 : f32 to vector<14x14xf32>
    %319 = arith.mulf %318, %7 : vector<14x14xf32>
    %320 = arith.addf %316, %319 : vector<14x14xf32>
    %c7_170 = arith.constant 7 : index
    %c3_171 = arith.constant 3 : index
    %321 = memref.load %arg2[%c7_170, %c3_171] : memref<16x10xf32, #tpu.memory_space<smem>>
    %322 = vector.broadcast %321 : f32 to vector<14x14xf32>
    %323 = arith.mulf %322, %9 : vector<14x14xf32>
    %324 = arith.addf %320, %323 : vector<14x14xf32>
    %c7_172 = arith.constant 7 : index
    %c4_173 = arith.constant 4 : index
    %325 = memref.load %arg2[%c7_172, %c4_173] : memref<16x10xf32, #tpu.memory_space<smem>>
    %326 = vector.broadcast %325 : f32 to vector<14x14xf32>
    %327 = arith.mulf %326, %11 : vector<14x14xf32>
    %328 = arith.addf %324, %327 : vector<14x14xf32>
    %c7_174 = arith.constant 7 : index
    %c5_175 = arith.constant 5 : index
    %329 = memref.load %arg2[%c7_174, %c5_175] : memref<16x10xf32, #tpu.memory_space<smem>>
    %330 = vector.broadcast %329 : f32 to vector<14x14xf32>
    %331 = arith.mulf %330, %13 : vector<14x14xf32>
    %332 = arith.addf %328, %331 : vector<14x14xf32>
    %c7_176 = arith.constant 7 : index
    %c6_177 = arith.constant 6 : index
    %333 = memref.load %arg2[%c7_176, %c6_177] : memref<16x10xf32, #tpu.memory_space<smem>>
    %334 = vector.broadcast %333 : f32 to vector<14x14xf32>
    %335 = arith.mulf %334, %15 : vector<14x14xf32>
    %336 = arith.addf %332, %335 : vector<14x14xf32>
    %c7_178 = arith.constant 7 : index
    %c7_179 = arith.constant 7 : index
    %337 = memref.load %arg2[%c7_178, %c7_179] : memref<16x10xf32, #tpu.memory_space<smem>>
    %338 = vector.broadcast %337 : f32 to vector<14x14xf32>
    %339 = arith.mulf %338, %17 : vector<14x14xf32>
    %340 = arith.addf %336, %339 : vector<14x14xf32>
    %c7_180 = arith.constant 7 : index
    %c8_181 = arith.constant 8 : index
    %341 = memref.load %arg2[%c7_180, %c8_181] : memref<16x10xf32, #tpu.memory_space<smem>>
    %342 = vector.broadcast %341 : f32 to vector<14x14xf32>
    %343 = arith.mulf %342, %19 : vector<14x14xf32>
    %344 = arith.addf %340, %343 : vector<14x14xf32>
    %c0_182 = arith.constant 0 : index
    %c7_183 = arith.constant 7 : index
    %c0_184 = arith.constant 0 : index
    %c0_185 = arith.constant 0 : index
    %345 = vector.load %arg3[%c0_182, %c7_183, %c0_184, %c0_185] : memref<1x16x14x14xf32, #tpu.memory_space<vmem>>, vector<1x1x14x14xf32>
    %346 = vector.shape_cast %345 : vector<1x1x14x14xf32> to vector<14x14xf32>
    %347 = vector.shape_cast %344 : vector<14x14xf32> to vector<1x1x14x14xf32>
    tpu.vector_store %arg3[%c0_182, %c7_183, %c0_184, %c0_185], %347 {strides = array<i32>} : memref<1x16x14x14xf32, #tpu.memory_space<vmem>>, vector<1x1x14x14xf32>,
    %c8_186 = arith.constant 8 : index
    %c9_187 = arith.constant 9 : index
    %348 = memref.load %arg2[%c8_186, %c9_187] : memref<16x10xf32, #tpu.memory_space<smem>>
    %349 = vector.broadcast %348 : f32 to vector<14x14xf32>
    %c8_188 = arith.constant 8 : index
    %c0_189 = arith.constant 0 : index
    %350 = memref.load %arg2[%c8_188, %c0_189] : memref<16x10xf32, #tpu.memory_space<smem>>
    %351 = vector.broadcast %350 : f32 to vector<14x14xf32>
    %352 = arith.mulf %351, %3 : vector<14x14xf32>
    %353 = arith.addf %349, %352 : vector<14x14xf32>
    %c8_190 = arith.constant 8 : index
    %c1_191 = arith.constant 1 : index
    %354 = memref.load %arg2[%c8_190, %c1_191] : memref<16x10xf32, #tpu.memory_space<smem>>
    %355 = vector.broadcast %354 : f32 to vector<14x14xf32>
    %356 = arith.mulf %355, %5 : vector<14x14xf32>
    %357 = arith.addf %353, %356 : vector<14x14xf32>
    %c8_192 = arith.constant 8 : index
    %c2_193 = arith.constant 2 : index
    %358 = memref.load %arg2[%c8_192, %c2_193] : memref<16x10xf32, #tpu.memory_space<smem>>
    %359 = vector.broadcast %358 : f32 to vector<14x14xf32>
    %360 = arith.mulf %359, %7 : vector<14x14xf32>
    %361 = arith.addf %357, %360 : vector<14x14xf32>
    %c8_194 = arith.constant 8 : index
    %c3_195 = arith.constant 3 : index
    %362 = memref.load %arg2[%c8_194, %c3_195] : memref<16x10xf32, #tpu.memory_space<smem>>
    %363 = vector.broadcast %362 : f32 to vector<14x14xf32>
    %364 = arith.mulf %363, %9 : vector<14x14xf32>
    %365 = arith.addf %361, %364 : vector<14x14xf32>
    %c8_196 = arith.constant 8 : index
    %c4_197 = arith.constant 4 : index
    %366 = memref.load %arg2[%c8_196, %c4_197] : memref<16x10xf32, #tpu.memory_space<smem>>
    %367 = vector.broadcast %366 : f32 to vector<14x14xf32>
    %368 = arith.mulf %367, %11 : vector<14x14xf32>
    %369 = arith.addf %365, %368 : vector<14x14xf32>
    %c8_198 = arith.constant 8 : index
    %c5_199 = arith.constant 5 : index
    %370 = memref.load %arg2[%c8_198, %c5_199] : memref<16x10xf32, #tpu.memory_space<smem>>
    %371 = vector.broadcast %370 : f32 to vector<14x14xf32>
    %372 = arith.mulf %371, %13 : vector<14x14xf32>
    %373 = arith.addf %369, %372 : vector<14x14xf32>
    %c8_200 = arith.constant 8 : index
    %c6_201 = arith.constant 6 : index
    %374 = memref.load %arg2[%c8_200, %c6_201] : memref<16x10xf32, #tpu.memory_space<smem>>
    %375 = vector.broadcast %374 : f32 to vector<14x14xf32>
    %376 = arith.mulf %375, %15 : vector<14x14xf32>
    %377 = arith.addf %373, %376 : vector<14x14xf32>
    %c8_202 = arith.constant 8 : index
    %c7_203 = arith.constant 7 : index
    %378 = memref.load %arg2[%c8_202, %c7_203] : memref<16x10xf32, #tpu.memory_space<smem>>
    %379 = vector.broadcast %378 : f32 to vector<14x14xf32>
    %380 = arith.mulf %379, %17 : vector<14x14xf32>
    %381 = arith.addf %377, %380 : vector<14x14xf32>
    %c8_204 = arith.constant 8 : index
    %c8_205 = arith.constant 8 : index
    %382 = memref.load %arg2[%c8_204, %c8_205] : memref<16x10xf32, #tpu.memory_space<smem>>
    %383 = vector.broadcast %382 : f32 to vector<14x14xf32>
    %384 = arith.mulf %383, %19 : vector<14x14xf32>
    %385 = arith.addf %381, %384 : vector<14x14xf32>
    %c0_206 = arith.constant 0 : index
    %c8_207 = arith.constant 8 : index
    %c0_208 = arith.constant 0 : index
    %c0_209 = arith.constant 0 : index
    %386 = vector.load %arg3[%c0_206, %c8_207, %c0_208, %c0_209] : memref<1x16x14x14xf32, #tpu.memory_space<vmem>>, vector<1x1x14x14xf32>
    %387 = vector.shape_cast %386 : vector<1x1x14x14xf32> to vector<14x14xf32>
    %388 = vector.shape_cast %385 : vector<14x14xf32> to vector<1x1x14x14xf32>
    tpu.vector_store %arg3[%c0_206, %c8_207, %c0_208, %c0_209], %388 {strides = array<i32>} : memref<1x16x14x14xf32, #tpu.memory_space<vmem>>, vector<1x1x14x14xf32>,
    %c9_210 = arith.constant 9 : index
    %c9_211 = arith.constant 9 : index
    %389 = memref.load %arg2[%c9_210, %c9_211] : memref<16x10xf32, #tpu.memory_space<smem>>
    %390 = vector.broadcast %389 : f32 to vector<14x14xf32>
    %c9_212 = arith.constant 9 : index
    %c0_213 = arith.constant 0 : index
    %391 = memref.load %arg2[%c9_212, %c0_213] : memref<16x10xf32, #tpu.memory_space<smem>>
    %392 = vector.broadcast %391 : f32 to vector<14x14xf32>
    %393 = arith.mulf %392, %3 : vector<14x14xf32>
    %394 = arith.addf %390, %393 : vector<14x14xf32>
    %c9_214 = arith.constant 9 : index
    %c1_215 = arith.constant 1 : index
    %395 = memref.load %arg2[%c9_214, %c1_215] : memref<16x10xf32, #tpu.memory_space<smem>>
    %396 = vector.broadcast %395 : f32 to vector<14x14xf32>
    %397 = arith.mulf %396, %5 : vector<14x14xf32>
    %398 = arith.addf %394, %397 : vector<14x14xf32>
    %c9_216 = arith.constant 9 : index
    %c2_217 = arith.constant 2 : index
    %399 = memref.load %arg2[%c9_216, %c2_217] : memref<16x10xf32, #tpu.memory_space<smem>>
    %400 = vector.broadcast %399 : f32 to vector<14x14xf32>
    %401 = arith.mulf %400, %7 : vector<14x14xf32>
    %402 = arith.addf %398, %401 : vector<14x14xf32>
    %c9_218 = arith.constant 9 : index
    %c3_219 = arith.constant 3 : index
    %403 = memref.load %arg2[%c9_218, %c3_219] : memref<16x10xf32, #tpu.memory_space<smem>>
    %404 = vector.broadcast %403 : f32 to vector<14x14xf32>
    %405 = arith.mulf %404, %9 : vector<14x14xf32>
    %406 = arith.addf %402, %405 : vector<14x14xf32>
    %c9_220 = arith.constant 9 : index
    %c4_221 = arith.constant 4 : index
    %407 = memref.load %arg2[%c9_220, %c4_221] : memref<16x10xf32, #tpu.memory_space<smem>>
    %408 = vector.broadcast %407 : f32 to vector<14x14xf32>
    %409 = arith.mulf %408, %11 : vector<14x14xf32>
    %410 = arith.addf %406, %409 : vector<14x14xf32>
    %c9_222 = arith.constant 9 : index
    %c5_223 = arith.constant 5 : index
    %411 = memref.load %arg2[%c9_222, %c5_223] : memref<16x10xf32, #tpu.memory_space<smem>>
    %412 = vector.broadcast %411 : f32 to vector<14x14xf32>
    %413 = arith.mulf %412, %13 : vector<14x14xf32>
    %414 = arith.addf %410, %413 : vector<14x14xf32>
    %c9_224 = arith.constant 9 : index
    %c6_225 = arith.constant 6 : index
    %415 = memref.load %arg2[%c9_224, %c6_225] : memref<16x10xf32, #tpu.memory_space<smem>>
    %416 = vector.broadcast %415 : f32 to vector<14x14xf32>
    %417 = arith.mulf %416, %15 : vector<14x14xf32>
    %418 = arith.addf %414, %417 : vector<14x14xf32>
    %c9_226 = arith.constant 9 : index
    %c7_227 = arith.constant 7 : index
    %419 = memref.load %arg2[%c9_226, %c7_227] : memref<16x10xf32, #tpu.memory_space<smem>>
    %420 = vector.broadcast %419 : f32 to vector<14x14xf32>
    %421 = arith.mulf %420, %17 : vector<14x14xf32>
    %422 = arith.addf %418, %421 : vector<14x14xf32>
    %c9_228 = arith.constant 9 : index
    %c8_229 = arith.constant 8 : index
    %423 = memref.load %arg2[%c9_228, %c8_229] : memref<16x10xf32, #tpu.memory_space<smem>>
    %424 = vector.broadcast %423 : f32 to vector<14x14xf32>
    %425 = arith.mulf %424, %19 : vector<14x14xf32>
    %426 = arith.addf %422, %425 : vector<14x14xf32>
    %c0_230 = arith.constant 0 : index
    %c9_231 = arith.constant 9 : index
    %c0_232 = arith.constant 0 : index
    %c0_233 = arith.constant 0 : index
    %427 = vector.load %arg3[%c0_230, %c9_231, %c0_232, %c0_233] : memref<1x16x14x14xf32, #tpu.memory_space<vmem>>, vector<1x1x14x14xf32>
    %428 = vector.shape_cast %427 : vector<1x1x14x14xf32> to vector<14x14xf32>
    %429 = vector.shape_cast %426 : vector<14x14xf32> to vector<1x1x14x14xf32>
    tpu.vector_store %arg3[%c0_230, %c9_231, %c0_232, %c0_233], %429 {strides = array<i32>} : memref<1x16x14x14xf32, #tpu.memory_space<vmem>>, vector<1x1x14x14xf32>,
    %c10 = arith.constant 10 : index
    %c9_234 = arith.constant 9 : index
    %430 = memref.load %arg2[%c10, %c9_234] : memref<16x10xf32, #tpu.memory_space<smem>>
    %431 = vector.broadcast %430 : f32 to vector<14x14xf32>
    %c10_235 = arith.constant 10 : index
    %c0_236 = arith.constant 0 : index
    %432 = memref.load %arg2[%c10_235, %c0_236] : memref<16x10xf32, #tpu.memory_space<smem>>
    %433 = vector.broadcast %432 : f32 to vector<14x14xf32>
    %434 = arith.mulf %433, %3 : vector<14x14xf32>
    %435 = arith.addf %431, %434 : vector<14x14xf32>
    %c10_237 = arith.constant 10 : index
    %c1_238 = arith.constant 1 : index
    %436 = memref.load %arg2[%c10_237, %c1_238] : memref<16x10xf32, #tpu.memory_space<smem>>
    %437 = vector.broadcast %436 : f32 to vector<14x14xf32>
    %438 = arith.mulf %437, %5 : vector<14x14xf32>
    %439 = arith.addf %435, %438 : vector<14x14xf32>
    %c10_239 = arith.constant 10 : index
    %c2_240 = arith.constant 2 : index
    %440 = memref.load %arg2[%c10_239, %c2_240] : memref<16x10xf32, #tpu.memory_space<smem>>
    %441 = vector.broadcast %440 : f32 to vector<14x14xf32>
    %442 = arith.mulf %441, %7 : vector<14x14xf32>
    %443 = arith.addf %439, %442 : vector<14x14xf32>
    %c10_241 = arith.constant 10 : index
    %c3_242 = arith.constant 3 : index
    %444 = memref.load %arg2[%c10_241, %c3_242] : memref<16x10xf32, #tpu.memory_space<smem>>
    %445 = vector.broadcast %444 : f32 to vector<14x14xf32>
    %446 = arith.mulf %445, %9 : vector<14x14xf32>
    %447 = arith.addf %443, %446 : vector<14x14xf32>
    %c10_243 = arith.constant 10 : index
    %c4_244 = arith.constant 4 : index
    %448 = memref.load %arg2[%c10_243, %c4_244] : memref<16x10xf32, #tpu.memory_space<smem>>
    %449 = vector.broadcast %448 : f32 to vector<14x14xf32>
    %450 = arith.mulf %449, %11 : vector<14x14xf32>
    %451 = arith.addf %447, %450 : vector<14x14xf32>
    %c10_245 = arith.constant 10 : index
    %c5_246 = arith.constant 5 : index
    %452 = memref.load %arg2[%c10_245, %c5_246] : memref<16x10xf32, #tpu.memory_space<smem>>
    %453 = vector.broadcast %452 : f32 to vector<14x14xf32>
    %454 = arith.mulf %453, %13 : vector<14x14xf32>
    %455 = arith.addf %451, %454 : vector<14x14xf32>
    %c10_247 = arith.constant 10 : index
    %c6_248 = arith.constant 6 : index
    %456 = memref.load %arg2[%c10_247, %c6_248] : memref<16x10xf32, #tpu.memory_space<smem>>
    %457 = vector.broadcast %456 : f32 to vector<14x14xf32>
    %458 = arith.mulf %457, %15 : vector<14x14xf32>
    %459 = arith.addf %455, %458 : vector<14x14xf32>
    %c10_249 = arith.constant 10 : index
    %c7_250 = arith.constant 7 : index
    %460 = memref.load %arg2[%c10_249, %c7_250] : memref<16x10xf32, #tpu.memory_space<smem>>
    %461 = vector.broadcast %460 : f32 to vector<14x14xf32>
    %462 = arith.mulf %461, %17 : vector<14x14xf32>
    %463 = arith.addf %459, %462 : vector<14x14xf32>
    %c10_251 = arith.constant 10 : index
    %c8_252 = arith.constant 8 : index
    %464 = memref.load %arg2[%c10_251, %c8_252] : memref<16x10xf32, #tpu.memory_space<smem>>
    %465 = vector.broadcast %464 : f32 to vector<14x14xf32>
    %466 = arith.mulf %465, %19 : vector<14x14xf32>
    %467 = arith.addf %463, %466 : vector<14x14xf32>
    %c0_253 = arith.constant 0 : index
    %c10_254 = arith.constant 10 : index
    %c0_255 = arith.constant 0 : index
    %c0_256 = arith.constant 0 : index
    %468 = vector.load %arg3[%c0_253, %c10_254, %c0_255, %c0_256] : memref<1x16x14x14xf32, #tpu.memory_space<vmem>>, vector<1x1x14x14xf32>
    %469 = vector.shape_cast %468 : vector<1x1x14x14xf32> to vector<14x14xf32>
    %470 = vector.shape_cast %467 : vector<14x14xf32> to vector<1x1x14x14xf32>
    tpu.vector_store %arg3[%c0_253, %c10_254, %c0_255, %c0_256], %470 {strides = array<i32>} : memref<1x16x14x14xf32, #tpu.memory_space<vmem>>, vector<1x1x14x14xf32>,
    %c11 = arith.constant 11 : index
    %c9_257 = arith.constant 9 : index
    %471 = memref.load %arg2[%c11, %c9_257] : memref<16x10xf32, #tpu.memory_space<smem>>
    %472 = vector.broadcast %471 : f32 to vector<14x14xf32>
    %c11_258 = arith.constant 11 : index
    %c0_259 = arith.constant 0 : index
    %473 = memref.load %arg2[%c11_258, %c0_259] : memref<16x10xf32, #tpu.memory_space<smem>>
    %474 = vector.broadcast %473 : f32 to vector<14x14xf32>
    %475 = arith.mulf %474, %3 : vector<14x14xf32>
    %476 = arith.addf %472, %475 : vector<14x14xf32>
    %c11_260 = arith.constant 11 : index
    %c1_261 = arith.constant 1 : index
    %477 = memref.load %arg2[%c11_260, %c1_261] : memref<16x10xf32, #tpu.memory_space<smem>>
    %478 = vector.broadcast %477 : f32 to vector<14x14xf32>
    %479 = arith.mulf %478, %5 : vector<14x14xf32>
    %480 = arith.addf %476, %479 : vector<14x14xf32>
    %c11_262 = arith.constant 11 : index
    %c2_263 = arith.constant 2 : index
    %481 = memref.load %arg2[%c11_262, %c2_263] : memref<16x10xf32, #tpu.memory_space<smem>>
    %482 = vector.broadcast %481 : f32 to vector<14x14xf32>
    %483 = arith.mulf %482, %7 : vector<14x14xf32>
    %484 = arith.addf %480, %483 : vector<14x14xf32>
    %c11_264 = arith.constant 11 : index
    %c3_265 = arith.constant 3 : index
    %485 = memref.load %arg2[%c11_264, %c3_265] : memref<16x10xf32, #tpu.memory_space<smem>>
    %486 = vector.broadcast %485 : f32 to vector<14x14xf32>
    %487 = arith.mulf %486, %9 : vector<14x14xf32>
    %488 = arith.addf %484, %487 : vector<14x14xf32>
    %c11_266 = arith.constant 11 : index
    %c4_267 = arith.constant 4 : index
    %489 = memref.load %arg2[%c11_266, %c4_267] : memref<16x10xf32, #tpu.memory_space<smem>>
    %490 = vector.broadcast %489 : f32 to vector<14x14xf32>
    %491 = arith.mulf %490, %11 : vector<14x14xf32>
    %492 = arith.addf %488, %491 : vector<14x14xf32>
    %c11_268 = arith.constant 11 : index
    %c5_269 = arith.constant 5 : index
    %493 = memref.load %arg2[%c11_268, %c5_269] : memref<16x10xf32, #tpu.memory_space<smem>>
    %494 = vector.broadcast %493 : f32 to vector<14x14xf32>
    %495 = arith.mulf %494, %13 : vector<14x14xf32>
    %496 = arith.addf %492, %495 : vector<14x14xf32>
    %c11_270 = arith.constant 11 : index
    %c6_271 = arith.constant 6 : index
    %497 = memref.load %arg2[%c11_270, %c6_271] : memref<16x10xf32, #tpu.memory_space<smem>>
    %498 = vector.broadcast %497 : f32 to vector<14x14xf32>
    %499 = arith.mulf %498, %15 : vector<14x14xf32>
    %500 = arith.addf %496, %499 : vector<14x14xf32>
    %c11_272 = arith.constant 11 : index
    %c7_273 = arith.constant 7 : index
    %501 = memref.load %arg2[%c11_272, %c7_273] : memref<16x10xf32, #tpu.memory_space<smem>>
    %502 = vector.broadcast %501 : f32 to vector<14x14xf32>
    %503 = arith.mulf %502, %17 : vector<14x14xf32>
    %504 = arith.addf %500, %503 : vector<14x14xf32>
    %c11_274 = arith.constant 11 : index
    %c8_275 = arith.constant 8 : index
    %505 = memref.load %arg2[%c11_274, %c8_275] : memref<16x10xf32, #tpu.memory_space<smem>>
    %506 = vector.broadcast %505 : f32 to vector<14x14xf32>
    %507 = arith.mulf %506, %19 : vector<14x14xf32>
    %508 = arith.addf %504, %507 : vector<14x14xf32>
    %c0_276 = arith.constant 0 : index
    %c11_277 = arith.constant 11 : index
    %c0_278 = arith.constant 0 : index
    %c0_279 = arith.constant 0 : index
    %509 = vector.load %arg3[%c0_276, %c11_277, %c0_278, %c0_279] : memref<1x16x14x14xf32, #tpu.memory_space<vmem>>, vector<1x1x14x14xf32>
    %510 = vector.shape_cast %509 : vector<1x1x14x14xf32> to vector<14x14xf32>
    %511 = vector.shape_cast %508 : vector<14x14xf32> to vector<1x1x14x14xf32>
    tpu.vector_store %arg3[%c0_276, %c11_277, %c0_278, %c0_279], %511 {strides = array<i32>} : memref<1x16x14x14xf32, #tpu.memory_space<vmem>>, vector<1x1x14x14xf32>,
    %c12 = arith.constant 12 : index
    %c9_280 = arith.constant 9 : index
    %512 = memref.load %arg2[%c12, %c9_280] : memref<16x10xf32, #tpu.memory_space<smem>>
    %513 = vector.broadcast %512 : f32 to vector<14x14xf32>
    %c12_281 = arith.constant 12 : index
    %c0_282 = arith.constant 0 : index
    %514 = memref.load %arg2[%c12_281, %c0_282] : memref<16x10xf32, #tpu.memory_space<smem>>
    %515 = vector.broadcast %514 : f32 to vector<14x14xf32>
    %516 = arith.mulf %515, %3 : vector<14x14xf32>
    %517 = arith.addf %513, %516 : vector<14x14xf32>
    %c12_283 = arith.constant 12 : index
    %c1_284 = arith.constant 1 : index
    %518 = memref.load %arg2[%c12_283, %c1_284] : memref<16x10xf32, #tpu.memory_space<smem>>
    %519 = vector.broadcast %518 : f32 to vector<14x14xf32>
    %520 = arith.mulf %519, %5 : vector<14x14xf32>
    %521 = arith.addf %517, %520 : vector<14x14xf32>
    %c12_285 = arith.constant 12 : index
    %c2_286 = arith.constant 2 : index
    %522 = memref.load %arg2[%c12_285, %c2_286] : memref<16x10xf32, #tpu.memory_space<smem>>
    %523 = vector.broadcast %522 : f32 to vector<14x14xf32>
    %524 = arith.mulf %523, %7 : vector<14x14xf32>
    %525 = arith.addf %521, %524 : vector<14x14xf32>
    %c12_287 = arith.constant 12 : index
    %c3_288 = arith.constant 3 : index
    %526 = memref.load %arg2[%c12_287, %c3_288] : memref<16x10xf32, #tpu.memory_space<smem>>
    %527 = vector.broadcast %526 : f32 to vector<14x14xf32>
    %528 = arith.mulf %527, %9 : vector<14x14xf32>
    %529 = arith.addf %525, %528 : vector<14x14xf32>
    %c12_289 = arith.constant 12 : index
    %c4_290 = arith.constant 4 : index
    %530 = memref.load %arg2[%c12_289, %c4_290] : memref<16x10xf32, #tpu.memory_space<smem>>
    %531 = vector.broadcast %530 : f32 to vector<14x14xf32>
    %532 = arith.mulf %531, %11 : vector<14x14xf32>
    %533 = arith.addf %529, %532 : vector<14x14xf32>
    %c12_291 = arith.constant 12 : index
    %c5_292 = arith.constant 5 : index
    %534 = memref.load %arg2[%c12_291, %c5_292] : memref<16x10xf32, #tpu.memory_space<smem>>
    %535 = vector.broadcast %534 : f32 to vector<14x14xf32>
    %536 = arith.mulf %535, %13 : vector<14x14xf32>
    %537 = arith.addf %533, %536 : vector<14x14xf32>
    %c12_293 = arith.constant 12 : index
    %c6_294 = arith.constant 6 : index
    %538 = memref.load %arg2[%c12_293, %c6_294] : memref<16x10xf32, #tpu.memory_space<smem>>
    %539 = vector.broadcast %538 : f32 to vector<14x14xf32>
    %540 = arith.mulf %539, %15 : vector<14x14xf32>
    %541 = arith.addf %537, %540 : vector<14x14xf32>
    %c12_295 = arith.constant 12 : index
    %c7_296 = arith.constant 7 : index
    %542 = memref.load %arg2[%c12_295, %c7_296] : memref<16x10xf32, #tpu.memory_space<smem>>
    %543 = vector.broadcast %542 : f32 to vector<14x14xf32>
    %544 = arith.mulf %543, %17 : vector<14x14xf32>
    %545 = arith.addf %541, %544 : vector<14x14xf32>
    %c12_297 = arith.constant 12 : index
    %c8_298 = arith.constant 8 : index
    %546 = memref.load %arg2[%c12_297, %c8_298] : memref<16x10xf32, #tpu.memory_space<smem>>
    %547 = vector.broadcast %546 : f32 to vector<14x14xf32>
    %548 = arith.mulf %547, %19 : vector<14x14xf32>
    %549 = arith.addf %545, %548 : vector<14x14xf32>
    %c0_299 = arith.constant 0 : index
    %c12_300 = arith.constant 12 : index
    %c0_301 = arith.constant 0 : index
    %c0_302 = arith.constant 0 : index
    %550 = vector.load %arg3[%c0_299, %c12_300, %c0_301, %c0_302] : memref<1x16x14x14xf32, #tpu.memory_space<vmem>>, vector<1x1x14x14xf32>
    %551 = vector.shape_cast %550 : vector<1x1x14x14xf32> to vector<14x14xf32>
    %552 = vector.shape_cast %549 : vector<14x14xf32> to vector<1x1x14x14xf32>
    tpu.vector_store %arg3[%c0_299, %c12_300, %c0_301, %c0_302], %552 {strides = array<i32>} : memref<1x16x14x14xf32, #tpu.memory_space<vmem>>, vector<1x1x14x14xf32>,
    %c13 = arith.constant 13 : index
    %c9_303 = arith.constant 9 : index
    %553 = memref.load %arg2[%c13, %c9_303] : memref<16x10xf32, #tpu.memory_space<smem>>
    %554 = vector.broadcast %553 : f32 to vector<14x14xf32>
    %c13_304 = arith.constant 13 : index
    %c0_305 = arith.constant 0 : index
    %555 = memref.load %arg2[%c13_304, %c0_305] : memref<16x10xf32, #tpu.memory_space<smem>>
    %556 = vector.broadcast %555 : f32 to vector<14x14xf32>
    %557 = arith.mulf %556, %3 : vector<14x14xf32>
    %558 = arith.addf %554, %557 : vector<14x14xf32>
    %c13_306 = arith.constant 13 : index
    %c1_307 = arith.constant 1 : index
    %559 = memref.load %arg2[%c13_306, %c1_307] : memref<16x10xf32, #tpu.memory_space<smem>>
    %560 = vector.broadcast %559 : f32 to vector<14x14xf32>
    %561 = arith.mulf %560, %5 : vector<14x14xf32>
    %562 = arith.addf %558, %561 : vector<14x14xf32>
    %c13_308 = arith.constant 13 : index
    %c2_309 = arith.constant 2 : index
    %563 = memref.load %arg2[%c13_308, %c2_309] : memref<16x10xf32, #tpu.memory_space<smem>>
    %564 = vector.broadcast %563 : f32 to vector<14x14xf32>
    %565 = arith.mulf %564, %7 : vector<14x14xf32>
    %566 = arith.addf %562, %565 : vector<14x14xf32>
    %c13_310 = arith.constant 13 : index
    %c3_311 = arith.constant 3 : index
    %567 = memref.load %arg2[%c13_310, %c3_311] : memref<16x10xf32, #tpu.memory_space<smem>>
    %568 = vector.broadcast %567 : f32 to vector<14x14xf32>
    %569 = arith.mulf %568, %9 : vector<14x14xf32>
    %570 = arith.addf %566, %569 : vector<14x14xf32>
    %c13_312 = arith.constant 13 : index
    %c4_313 = arith.constant 4 : index
    %571 = memref.load %arg2[%c13_312, %c4_313] : memref<16x10xf32, #tpu.memory_space<smem>>
    %572 = vector.broadcast %571 : f32 to vector<14x14xf32>
    %573 = arith.mulf %572, %11 : vector<14x14xf32>
    %574 = arith.addf %570, %573 : vector<14x14xf32>
    %c13_314 = arith.constant 13 : index
    %c5_315 = arith.constant 5 : index
    %575 = memref.load %arg2[%c13_314, %c5_315] : memref<16x10xf32, #tpu.memory_space<smem>>
    %576 = vector.broadcast %575 : f32 to vector<14x14xf32>
    %577 = arith.mulf %576, %13 : vector<14x14xf32>
    %578 = arith.addf %574, %577 : vector<14x14xf32>
    %c13_316 = arith.constant 13 : index
    %c6_317 = arith.constant 6 : index
    %579 = memref.load %arg2[%c13_316, %c6_317] : memref<16x10xf32, #tpu.memory_space<smem>>
    %580 = vector.broadcast %579 : f32 to vector<14x14xf32>
    %581 = arith.mulf %580, %15 : vector<14x14xf32>
    %582 = arith.addf %578, %581 : vector<14x14xf32>
    %c13_318 = arith.constant 13 : index
    %c7_319 = arith.constant 7 : index
    %583 = memref.load %arg2[%c13_318, %c7_319] : memref<16x10xf32, #tpu.memory_space<smem>>
    %584 = vector.broadcast %583 : f32 to vector<14x14xf32>
    %585 = arith.mulf %584, %17 : vector<14x14xf32>
    %586 = arith.addf %582, %585 : vector<14x14xf32>
    %c13_320 = arith.constant 13 : index
    %c8_321 = arith.constant 8 : index
    %587 = memref.load %arg2[%c13_320, %c8_321] : memref<16x10xf32, #tpu.memory_space<smem>>
    %588 = vector.broadcast %587 : f32 to vector<14x14xf32>
    %589 = arith.mulf %588, %19 : vector<14x14xf32>
    %590 = arith.addf %586, %589 : vector<14x14xf32>
    %c0_322 = arith.constant 0 : index
    %c13_323 = arith.constant 13 : index
    %c0_324 = arith.constant 0 : index
    %c0_325 = arith.constant 0 : index
    %591 = vector.load %arg3[%c0_322, %c13_323, %c0_324, %c0_325] : memref<1x16x14x14xf32, #tpu.memory_space<vmem>>, vector<1x1x14x14xf32>
    %592 = vector.shape_cast %591 : vector<1x1x14x14xf32> to vector<14x14xf32>
    %593 = vector.shape_cast %590 : vector<14x14xf32> to vector<1x1x14x14xf32>
    tpu.vector_store %arg3[%c0_322, %c13_323, %c0_324, %c0_325], %593 {strides = array<i32>} : memref<1x16x14x14xf32, #tpu.memory_space<vmem>>, vector<1x1x14x14xf32>,
    %c14 = arith.constant 14 : index
    %c9_326 = arith.constant 9 : index
    %594 = memref.load %arg2[%c14, %c9_326] : memref<16x10xf32, #tpu.memory_space<smem>>
    %595 = vector.broadcast %594 : f32 to vector<14x14xf32>
    %c14_327 = arith.constant 14 : index
    %c0_328 = arith.constant 0 : index
    %596 = memref.load %arg2[%c14_327, %c0_328] : memref<16x10xf32, #tpu.memory_space<smem>>
    %597 = vector.broadcast %596 : f32 to vector<14x14xf32>
    %598 = arith.mulf %597, %3 : vector<14x14xf32>
    %599 = arith.addf %595, %598 : vector<14x14xf32>
    %c14_329 = arith.constant 14 : index
    %c1_330 = arith.constant 1 : index
    %600 = memref.load %arg2[%c14_329, %c1_330] : memref<16x10xf32, #tpu.memory_space<smem>>
    %601 = vector.broadcast %600 : f32 to vector<14x14xf32>
    %602 = arith.mulf %601, %5 : vector<14x14xf32>
    %603 = arith.addf %599, %602 : vector<14x14xf32>
    %c14_331 = arith.constant 14 : index
    %c2_332 = arith.constant 2 : index
    %604 = memref.load %arg2[%c14_331, %c2_332] : memref<16x10xf32, #tpu.memory_space<smem>>
    %605 = vector.broadcast %604 : f32 to vector<14x14xf32>
    %606 = arith.mulf %605, %7 : vector<14x14xf32>
    %607 = arith.addf %603, %606 : vector<14x14xf32>
    %c14_333 = arith.constant 14 : index
    %c3_334 = arith.constant 3 : index
    %608 = memref.load %arg2[%c14_333, %c3_334] : memref<16x10xf32, #tpu.memory_space<smem>>
    %609 = vector.broadcast %608 : f32 to vector<14x14xf32>
    %610 = arith.mulf %609, %9 : vector<14x14xf32>
    %611 = arith.addf %607, %610 : vector<14x14xf32>
    %c14_335 = arith.constant 14 : index
    %c4_336 = arith.constant 4 : index
    %612 = memref.load %arg2[%c14_335, %c4_336] : memref<16x10xf32, #tpu.memory_space<smem>>
    %613 = vector.broadcast %612 : f32 to vector<14x14xf32>
    %614 = arith.mulf %613, %11 : vector<14x14xf32>
    %615 = arith.addf %611, %614 : vector<14x14xf32>
    %c14_337 = arith.constant 14 : index
    %c5_338 = arith.constant 5 : index
    %616 = memref.load %arg2[%c14_337, %c5_338] : memref<16x10xf32, #tpu.memory_space<smem>>
    %617 = vector.broadcast %616 : f32 to vector<14x14xf32>
    %618 = arith.mulf %617, %13 : vector<14x14xf32>
    %619 = arith.addf %615, %618 : vector<14x14xf32>
    %c14_339 = arith.constant 14 : index
    %c6_340 = arith.constant 6 : index
    %620 = memref.load %arg2[%c14_339, %c6_340] : memref<16x10xf32, #tpu.memory_space<smem>>
    %621 = vector.broadcast %620 : f32 to vector<14x14xf32>
    %622 = arith.mulf %621, %15 : vector<14x14xf32>
    %623 = arith.addf %619, %622 : vector<14x14xf32>
    %c14_341 = arith.constant 14 : index
    %c7_342 = arith.constant 7 : index
    %624 = memref.load %arg2[%c14_341, %c7_342] : memref<16x10xf32, #tpu.memory_space<smem>>
    %625 = vector.broadcast %624 : f32 to vector<14x14xf32>
    %626 = arith.mulf %625, %17 : vector<14x14xf32>
    %627 = arith.addf %623, %626 : vector<14x14xf32>
    %c14_343 = arith.constant 14 : index
    %c8_344 = arith.constant 8 : index
    %628 = memref.load %arg2[%c14_343, %c8_344] : memref<16x10xf32, #tpu.memory_space<smem>>
    %629 = vector.broadcast %628 : f32 to vector<14x14xf32>
    %630 = arith.mulf %629, %19 : vector<14x14xf32>
    %631 = arith.addf %627, %630 : vector<14x14xf32>
    %c0_345 = arith.constant 0 : index
    %c14_346 = arith.constant 14 : index
    %c0_347 = arith.constant 0 : index
    %c0_348 = arith.constant 0 : index
    %632 = vector.load %arg3[%c0_345, %c14_346, %c0_347, %c0_348] : memref<1x16x14x14xf32, #tpu.memory_space<vmem>>, vector<1x1x14x14xf32>
    %633 = vector.shape_cast %632 : vector<1x1x14x14xf32> to vector<14x14xf32>
    %634 = vector.shape_cast %631 : vector<14x14xf32> to vector<1x1x14x14xf32>
    tpu.vector_store %arg3[%c0_345, %c14_346, %c0_347, %c0_348], %634 {strides = array<i32>} : memref<1x16x14x14xf32, #tpu.memory_space<vmem>>, vector<1x1x14x14xf32>,
    %c15 = arith.constant 15 : index
    %c9_349 = arith.constant 9 : index
    %635 = memref.load %arg2[%c15, %c9_349] : memref<16x10xf32, #tpu.memory_space<smem>>
    %636 = vector.broadcast %635 : f32 to vector<14x14xf32>
    %c15_350 = arith.constant 15 : index
    %c0_351 = arith.constant 0 : index
    %637 = memref.load %arg2[%c15_350, %c0_351] : memref<16x10xf32, #tpu.memory_space<smem>>
    %638 = vector.broadcast %637 : f32 to vector<14x14xf32>
    %639 = arith.mulf %638, %3 : vector<14x14xf32>
    %640 = arith.addf %636, %639 : vector<14x14xf32>
    %c15_352 = arith.constant 15 : index
    %c1_353 = arith.constant 1 : index
    %641 = memref.load %arg2[%c15_352, %c1_353] : memref<16x10xf32, #tpu.memory_space<smem>>
    %642 = vector.broadcast %641 : f32 to vector<14x14xf32>
    %643 = arith.mulf %642, %5 : vector<14x14xf32>
    %644 = arith.addf %640, %643 : vector<14x14xf32>
    %c15_354 = arith.constant 15 : index
    %c2_355 = arith.constant 2 : index
    %645 = memref.load %arg2[%c15_354, %c2_355] : memref<16x10xf32, #tpu.memory_space<smem>>
    %646 = vector.broadcast %645 : f32 to vector<14x14xf32>
    %647 = arith.mulf %646, %7 : vector<14x14xf32>
    %648 = arith.addf %644, %647 : vector<14x14xf32>
    %c15_356 = arith.constant 15 : index
    %c3_357 = arith.constant 3 : index
    %649 = memref.load %arg2[%c15_356, %c3_357] : memref<16x10xf32, #tpu.memory_space<smem>>
    %650 = vector.broadcast %649 : f32 to vector<14x14xf32>
    %651 = arith.mulf %650, %9 : vector<14x14xf32>
    %652 = arith.addf %648, %651 : vector<14x14xf32>
    %c15_358 = arith.constant 15 : index
    %c4_359 = arith.constant 4 : index
    %653 = memref.load %arg2[%c15_358, %c4_359] : memref<16x10xf32, #tpu.memory_space<smem>>
    %654 = vector.broadcast %653 : f32 to vector<14x14xf32>
    %655 = arith.mulf %654, %11 : vector<14x14xf32>
    %656 = arith.addf %652, %655 : vector<14x14xf32>
    %c15_360 = arith.constant 15 : index
    %c5_361 = arith.constant 5 : index
    %657 = memref.load %arg2[%c15_360, %c5_361] : memref<16x10xf32, #tpu.memory_space<smem>>
    %658 = vector.broadcast %657 : f32 to vector<14x14xf32>
    %659 = arith.mulf %658, %13 : vector<14x14xf32>
    %660 = arith.addf %656, %659 : vector<14x14xf32>
    %c15_362 = arith.constant 15 : index
    %c6_363 = arith.constant 6 : index
    %661 = memref.load %arg2[%c15_362, %c6_363] : memref<16x10xf32, #tpu.memory_space<smem>>
    %662 = vector.broadcast %661 : f32 to vector<14x14xf32>
    %663 = arith.mulf %662, %15 : vector<14x14xf32>
    %664 = arith.addf %660, %663 : vector<14x14xf32>
    %c15_364 = arith.constant 15 : index
    %c7_365 = arith.constant 7 : index
    %665 = memref.load %arg2[%c15_364, %c7_365] : memref<16x10xf32, #tpu.memory_space<smem>>
    %666 = vector.broadcast %665 : f32 to vector<14x14xf32>
    %667 = arith.mulf %666, %17 : vector<14x14xf32>
    %668 = arith.addf %664, %667 : vector<14x14xf32>
    %c15_366 = arith.constant 15 : index
    %c8_367 = arith.constant 8 : index
    %669 = memref.load %arg2[%c15_366, %c8_367] : memref<16x10xf32, #tpu.memory_space<smem>>
    %670 = vector.broadcast %669 : f32 to vector<14x14xf32>
    %671 = arith.mulf %670, %19 : vector<14x14xf32>
    %672 = arith.addf %668, %671 : vector<14x14xf32>
    %c0_368 = arith.constant 0 : index
    %c15_369 = arith.constant 15 : index
    %c0_370 = arith.constant 0 : index
    %c0_371 = arith.constant 0 : index
    %673 = vector.load %arg3[%c0_368, %c15_369, %c0_370, %c0_371] : memref<1x16x14x14xf32, #tpu.memory_space<vmem>>, vector<1x1x14x14xf32>
    %674 = vector.shape_cast %673 : vector<1x1x14x14xf32> to vector<14x14xf32>
    %675 = vector.shape_cast %672 : vector<14x14xf32> to vector<1x1x14x14xf32>
    tpu.vector_store %arg3[%c0_368, %c15_369, %c0_370, %c0_371], %675 {strides = array<i32>} : memref<1x16x14x14xf32, #tpu.memory_space<vmem>>, vector<1x1x14x14xf32>,
    return
  }
  func.func @transform_0(%arg0: i32) -> (i32, i32, i32, i32) {
    %c0_i32 = arith.constant 0 : i32
    %c0_i32_0 = arith.constant 0 : i32
    %c0_i32_1 = arith.constant 0 : i32
    %c0_i32_2 = arith.constant 0 : i32
    return %arg0, %c0_i32, %c0_i32_0, %c0_i32_1 : i32, i32, i32, i32
  }
  func.func @transform_1(%arg0: i32) -> (i32, i32) {
    %c0_i32 = arith.constant 0 : i32
    %c0_i32_0 = arith.constant 0 : i32
    %c0_i32_1 = arith.constant 0 : i32
    return %c0_i32, %c0_i32_0 : i32, i32
  }
  func.func @transform_2(%arg0: i32) -> (i32, i32, i32, i32) {
    %c0_i32 = arith.constant 0 : i32
    %c0_i32_0 = arith.constant 0 : i32
    %c0_i32_1 = arith.constant 0 : i32
    %c0_i32_2 = arith.constant 0 : i32
    return %arg0, %c0_i32, %c0_i32_0, %c0_i32_1 : i32, i32, i32, i32
  }
}

</mosaic_0001>

<bundles_post_ra>
// kernel: model_forward.1
= control target key start
LH: loop header
LB: loop body
LE: loop exit
PB: predicated region body
PF: predicated region fallthrough
CT: control target
= control target key end

     0   :  { %7 = vsyncpa [#allocation3], 0  ;;  %s2639_s9 = smov 0   ;;  %s3834_s0 = inlined_call_operand.vmem [shape: f32[2,1,16,16], index: 0, kind: input, shape index: {}]   ;;  %s3835_s1 = inlined_call_operand.vmem [shape: f32[16,10], index: 1, kind: input, shape index: {}]   ;;  %s3836_s2 = inlined_call_operand.vmem [shape: f32[2,16,14,14], index: 2, kind: output, shape index: {}]  }
   0x1 LB: > { %s2645_s10 = sadd.s32 4294967295, %s2617_s9   ;;  %p2362_p0 = scmp.ge.s32.totalorder %s2617_s9, 1  ;;  %s2617_s9 = sphi %s2639_s9, %s13_s9  }
   0x2   : > { %p91_p1 = scmp.lt.s32.totalorder %s2617_s9, 3  ;;  %s103_s13 = sshll.u32 %s3835_s1, 4  ;;  %s104_s13 = int_to_ptr.vmem [resolvable:$true] %s103_s13 }
   0x3   : > { %p2572_p3 = scmp.eq.s32.totalorder %s2645_s10, 0  ;;  %s2592_s16 = scalar_lea.vmem %s104_s13, 256 }
   0x4   : > { %p2652_p2 = pnand %p2362_p0, %p91_p1  ;;  %p2593_p6 = scmp.ne.s32.totalorder %s104_s13, %s2592_s16 }
   0x5   : > { %p2600_p10 = scmp.lt.s32.totalorder %s104_s13, %s104_s13  ;;  %p2601_p11 = scmp.lt.s32.totalorder %s2592_s16, %s2592_s16 }
   0x6   : > { %p2568_p4 = pneg %p2652_p2 }
   0x7   : > { %p2602_p12 = por %p2601_p11, %p2600_p10 }
   0x8   : > { %p2661_p5 = pnand %p2572_p3, %p2568_p4 }
   0xa   : > { %p2594_p7 = pneg %p2661_p5 }
   0xc   : > { %p2595_p8 = pnand %p2594_p7, %p2593_p6 }
   0xe   : > { %p2596_p9 = pneg %p2595_p8 }
  0x10   : > { %p2603_p13 = pnand %p2602_p12, %p2596_p9 }
  0x12   : > { %2606 = shalt.err (!%p2603_p13)
}
  0x13   : > { %s2619_s17 = smov [#allocation2]   ;;  %s2620_s18 = smov 128  }
  0x14   : > { %s2621_s19 = smov 8   ;;  %127 = sbr.rel (%p2652_p2) target bundleno = 538 (0x21a), region = 28 }
  0x15   : > { %2571 = dma.vmem_to_smem (!%p2661_p5), %s104_s13, 256, %s2619_s17, [#allocation3], %s2620_s18, %s2620_s18, %s2621_s19  }
  0x1b   : > { %2612 = dma.done.wait (%p2572_p3), [#allocation3], 256  }
  0x1c   : > { %2614 = vsyncadd (%p2572_p3), [#allocation3], 4294967040 }
  0x1d   : > { %133 = sfence }
  0x1e   : > { %p150_p0 = scmp.lt.s32.totalorder %s2645_s10, 1  ;;  %s2373_s20 = sld [smem:[#allocation2 + $0x2]]  ;;  %vm204_vm0 = vcmask 1046528   ;;  %vm252_vm1 = vcmask 1045504   ;;  %vm296_vm2 = vcmask 111616   ;;  %vm294_vm3 = vcmask 113664  }
  0x1f   : > { %s2372_s21 = sld [smem:[#allocation2 + $0x1]]  ;;  %s2375_s22 = sld [smem:[#allocation2 + $0x4]] }
  0x20   : > { %s3840_s10 = smov (!%p150_p0, %s2645_s10), 1  ;;  %s2376_s24 = sld [smem:[#allocation2 + $0x5]] }
  0x21   : > { %s2562_s23 = sshll.u32 %s3840_s10, 4  ;;  %s2378_s28 = sld [smem:[#allocation2 + $0x7]] }
  0x22   : > { %s2683_s27 = scalar_lea.vmem %s3834_s0, %s2562_s23  ;;  %s2693_s29 = sld [smem:[#allocation2 + $0x8]] }
  0x23   : > { %v2686_v0 = vld [vmem:[%s2683_s27] sm:$0xff]  ;;  %v2689_v1 = vld [vmem:[%s2683_s27 + $0x8] sm:$0xff]  ;;  %s2622_s30 = smov 126   ;;  %s2623_s3 = smov 127  }
  0x24   : > { %v185_v2 = vstv %s2373_s20  ;;  %s2382_s4 = sld [smem:[#allocation2 + $0x81]]  ;;  %s2385_s5 = sld [smem:[#allocation2 + $0x84]] }
  0x25   : > { %v186_v3 = vmul.f32 %v185_v2, %v2686_v0  ;;  %v171_v4 = vstv %s2372_s21  ;;  %v187_v6 = vmul.f32 %v185_v2, %v2689_v1  ;;  %v213_v7 = vstv %s2375_s22  ;;  %s2383_s6 = sld [smem:[#allocation2 + $0x82]]  ;;  %s2386_s7 = sld [smem:[#allocation2 + $0x85]] }
  0x26   : > { %v172_v5 = vmul.f32 %v171_v4, %v2686_v0  ;;  %v173_v8 = vmul.f32 %v171_v4, %v2689_v1  ;;  %v214_v9 = vmul.f32 %v213_v7, %v2686_v0  ;;  %v215_v10 = vmul.f32 %v213_v7, %v2689_v1  ;;  %s2388_s8 = sld [smem:[#allocation2 + $0x87]]  ;;  %s2389_s11 = sld [smem:[#allocation2 + $0x88]] }
  0x27   : > { %190 = vrot.lane.b32.xlu1 %v186_v3, %s2622_s30  ;;  %v230_v11 = vstv %s2376_s24  ;;  %v261_v14 = vstv %s2378_s28  ;;  %s2394_s12 = sld [smem:[#allocation2 + $0x101]]  ;;  %s2397_s13 = sld [smem:[#allocation2 + $0x104]] }
  0x28   : > { %176 = vrot.lane.b32.xlu0 %v172_v5, %s2623_s3  ;;  %v231_v12 = vmul.f32 %v230_v11, %v2686_v0  ;;  %v232_v13 = vmul.f32 %v230_v11, %v2689_v1  ;;  %v219_v15 = vrot.slane %v215_v10, 1  ;;  %v218_v16 = vrot.slane %v214_v9, 1  ;;  %s2395_s14 = sld [smem:[#allocation2 + $0x102]]  ;;  %s2398_s15 = sld [smem:[#allocation2 + $0x105]] }
  0x29   : > { %v263_v17 = vmul.f32 %v261_v14, %v2689_v1  ;;  %v262_v21 = vmul.f32 %v261_v14, %v2686_v0  ;;  %v278_v22 = vstv %s2693_s29  ;;  %s2400_s16 = sld [smem:[#allocation2 + $0x107]]  ;;  %s2401_s17 = sld [smem:[#allocation2 + $0x108]] }
  0x2a   : > { %v220_v18 = vsel %vm204_vm0, %v218_v16, %v219_v15  ;;  %v236_v19 = vrot.slane %v232_v13, 1  ;;  %v235_v20 = vrot.slane %v231_v12, 1  ;;  %v279_v26 = vmul.f32 %v278_v22, %v2686_v0  ;;  %s2406_s18 = sld [smem:[#allocation2 + $0x181]]  ;;  %s2409_s19 = sld [smem:[#allocation2 + $0x184]] }
  0x2b   : > { %192 = vrot.lane.b32.xlu1 %v187_v6, %s2622_s30  ;;  %v267_v23 = vrot.slane %v263_v17, 2  ;;  %v266_v25 = vrot.slane %v262_v21, 2  ;;  %v280_v27 = vmul.f32 %v278_v22, %v2689_v1  ;;  %v307_v31 = vstv %s2382_s4  ;;  %s2407_s20 = sld [smem:[#allocation2 + $0x182]]  ;;  %s2410_s21 = sld [smem:[#allocation2 + $0x185]] }
  0x2c   : > { %178 = vrot.lane.b32.xlu0 %v173_v8, %s2623_s3  ;;  %v237_v24 = vsel %vm204_vm0, %v235_v20, %v236_v19  ;;  %v283_v30 = vrot.slane %v279_v26, 2  ;;  %v348_v33 = vstv %s2385_s5  ;;  %v309_v34 = vmul.f32 %v307_v31, %v2689_v1  ;;  %s2412_s22 = sld [smem:[#allocation2 + $0x187]]  ;;  %s2413_s23 = sld [smem:[#allocation2 + $0x188]] }
  0x2d   : > { %v268_v28 = vsel %vm252_vm1, %v266_v25, %v267_v23  ;;  %v284_v29 = vrot.slane %v280_v27, 2  ;;  %v308_v35 = vmul.f32 %v307_v31, %v2686_v0  ;;  %v321_v36 = vstv %s2383_s6  ;;  %s2418_s24 = sld [smem:[#allocation2 + $0x201]]  ;;  %s2421_s25 = sld [smem:[#allocation2 + $0x204]] }
  0x2e   : > { %v349_v37 = vmul.f32 %v348_v33, %v2686_v0  ;;  %v350_v38 = vmul.f32 %v348_v33, %v2689_v1  ;;  %v365_v39 = vstv %s2386_s7  ;;  %v323_v40 = vmul.f32 %v321_v36, %v2689_v1  ;;  %s2419_s26 = sld [smem:[#allocation2 + $0x202]]  ;;  %s2422_s28 = sld [smem:[#allocation2 + $0x205]] }
  0x2f   : > { %223 = vrot.lane.b32.xlu1 %v219_v15, %s2623_s3  ;;  %v285_v32 = vsel %vm252_vm1, %v283_v30, %v284_v29  ;;  %v322_v41 = vmul.f32 %v321_v36, %v2686_v0  ;;  %v395_v42 = vstv %s2388_s8  ;;  %v366_v45 = vmul.f32 %v365_v39, %v2686_v0  ;;  %s2424_s29 = sld [smem:[#allocation2 + $0x207]]  ;;  %s2425_s4 = sld [smem:[#allocation2 + $0x208]] }
  0x30   : > { %221 = vrot.lane.b32.xlu0 %v220_v18, %s2623_s3  ;;  %v354_v43 = vrot.slane %v350_v38, 1  ;;  %v353_v44 = vrot.slane %v349_v37, 1  ;;  %v367_v46 = vmul.f32 %v365_v39, %v2689_v1  ;;  %v396_v47 = vmul.f32 %v395_v42, %v2686_v0  ;;  %s2814_s5 = sld [smem:[#allocation2]]  ;;  %s2821_s6 = sld [smem:[#allocation2 + $0x9]] }
  0x31   : > { %v412_v48 = vstv %s2389_s11  ;;  %v370_v51 = vrot.slane %v366_v45, 1  ;;  %v397_v52 = vmul.f32 %v395_v42, %v2689_v1  ;;  %v440_v61 = vstv %s2394_s12  ;;  %s2374_s7 = sld [smem:[#allocation2 + $0x3]]  ;;  %s2828_s8 = sld [smem:[#allocation2 + $0x281]] }
  0x32   : > { %v355_v49 = vsel %vm204_vm0, %v353_v44, %v354_v43  ;;  %v371_v50 = vrot.slane %v367_v46, 1  ;;  %v413_v53 = vmul.f32 %v412_v48, %v2686_v0  ;;  %v400_v56 = vrot.slane %v396_v47, 2  ;;  %s2833_s11 = sld [smem:[#allocation2 + $0x284]]  ;;  %s2837_s12 = sld [smem:[#allocation2 + $0x6]] }
  0x33   : > { %240 = vrot.lane.b32.xlu1 %v236_v19, %s2622_s30  ;;  %v401_v55 = vrot.slane %v397_v52, 2  ;;  %v414_v57 = vmul.f32 %v412_v48, %v2689_v1  ;;  %v481_v63 = vstv %s2397_s13  ;;  %v442_v2 = vmul.f32 %v440_v61, %v2689_v1  ;;  %s2841_s13 = sld [smem:[#allocation2 + $0x282]] }
  0x34   : > { %238 = vrot.lane.b32.xlu0 %v237_v24, %s2622_s30  ;;  %v372_v54 = vsel %vm204_vm0, %v370_v51, %v371_v50  ;;  %v417_v60 = vrot.slane %v413_v53, 2  ;;  %v441_v3 = vmul.f32 %v440_v61, %v2686_v0  ;;  %v454_v4 = vstv %s2395_s14  ;;  %s2844_s14 = sld [smem:[#allocation2 + $0x285]] }
  0x35   : > { %v402_v58 = vsel %vm252_vm1, %v400_v56, %v401_v55  ;;  %v418_v59 = vrot.slane %v414_v57, 2  ;;  %v482_v5 = vmul.f32 %v481_v63, %v2686_v0  ;;  %v483_v6 = vmul.f32 %v481_v63, %v2689_v1 }
  0x36   : > { %v498_v7 = vstv %s2398_s15  ;;  %v456_v8 = vmul.f32 %v454_v4, %v2689_v1  ;;  %v455_v9 = vmul.f32 %v454_v4, %v2686_v0  ;;  %v528_v14 = vstv %s2400_s16  ;;  %s2853_s15 = sld [smem:[#allocation2 + $0x287]]  ;;  %s2867_s16 = sld [smem:[#allocation2 + $0x288]] }
  0x37   : > { %271 = vrot.lane.b32.xlu1 %v267_v23, %s2623_s3  ;;  %v419_v62 = vsel %vm252_vm1, %v417_v60, %v418_v59  ;;  %v499_v10 = vmul.f32 %v498_v7, %v2686_v0  ;;  %v487_v11 = vrot.slane %v483_v6, 1  ;;  %v486_v12 = vrot.slane %v482_v5, 1 }
  0x38   : > { %269 = vrot.lane.b32.xlu0 %v268_v28, %s2623_s3  ;;  %v500_v13 = vmul.f32 %v498_v7, %v2689_v1  ;;  %v529_v15 = vmul.f32 %v528_v14, %v2686_v0  ;;  %v530_v16 = vmul.f32 %v528_v14, %v2689_v1  ;;  %v545_v20 = vstv %s2401_s17  ;;  %s2876_s17 = sld [smem:[#allocation2 + $0x80]] }
  0x39   : > { %v488_v17 = vsel %vm204_vm0, %v486_v12, %v487_v11  ;;  %v503_v19 = vrot.slane %v499_v10, 1  ;;  %v546_v21 = vmul.f32 %v545_v20, %v2686_v0  ;;  %v547_v25 = vmul.f32 %v545_v20, %v2689_v1 }
  0x3a   : > { %v504_v18 = vrot.slane %v500_v13, 1  ;;  %v534_v23 = vrot.slane %v530_v16, 2  ;;  %v533_v24 = vrot.slane %v529_v15, 2  ;;  %v614_v31 = vstv %s2409_s19  ;;  %s2885_s19 = sld [smem:[#allocation2 + $0x89]] }
  0x3b   : > { %288 = vrot.lane.b32.xlu1 %v284_v29, %s2622_s30  ;;  %v551_v27 = vrot.slane %v547_v25, 2  ;;  %v550_v28 = vrot.slane %v546_v21, 2  ;;  %v573_v29 = vstv %s2406_s18  ;;  %v616_v36 = vmul.f32 %v614_v31, %v2689_v1  ;;  %s2880_s18 = sld [smem:[#allocation2 + $0x83]] }
  0x3c   : > { %286 = vrot.lane.b32.xlu0 %v285_v32, %s2622_s30  ;;  %v505_v22 = vsel %vm204_vm0, %v503_v19, %v504_v18  ;;  %v535_v26 = vsel %vm252_vm1, %v533_v24, %v534_v23  ;;  %v575_v32 = vmul.f32 %v573_v29, %v2689_v1  ;;  %v574_v33 = vmul.f32 %v573_v29, %v2686_v0 }
  0x3d   : > { %v552_v30 = vsel %vm252_vm1, %v550_v28, %v551_v27  ;;  %v631_v37 = vstv %s2410_s21  ;;  %v661_v44 = vstv %s2412_s22  ;;  %v678_v46 = vstv %s2413_s23  ;;  %s2563_s21 = sshll.u32 %s3840_s10, 8  ;;  %s2899_s22 = sld [smem:[#allocation2 + $0x304]] }
  0x3e   : > { %v679_v51 = vmul.f32 %v678_v46, %v2686_v0  ;;  %v747_v61 = vstv %s2421_s25  ;;  %v764_v5 = vstv %s2422_s28  ;;  %v165_v20 = vstv %s2814_s5  ;;  %s2903_s23 = sld [smem:[#allocation2 + $0x86]]  ;;  %s2917_s28 = sld [smem:[#allocation2 + $0x305]] }
  0x3f   : > { %314 = vrot.lane.b32.xlu1 %v309_v34, %s2623_s3  ;;  %v587_v34 = vstv %s2407_s20  ;;  %v749_v4 = vmul.f32 %v747_v61, %v2689_v1  ;;  %v766_v12 = vmul.f32 %v764_v5, %v2689_v1  ;;  %v166_v25 = vmul.f32 %v165_v20, %v2686_v0  ;;  %s2894_s20 = sld [smem:[#allocation2 + $0x301]]  ;;  %s2952_s5 = sld [smem:[#allocation2 + $0x100]] }
  0x40   : > { %312 = vrot.lane.b32.xlu0 %v308_v35, %s2623_s3  ;;  %v615_v35 = vmul.f32 %v614_v31, %v2686_v0  ;;  %v589_v38 = vmul.f32 %v587_v34, %v2689_v1  ;;  %v588_v39 = vmul.f32 %v587_v34, %v2686_v0  ;;  %s3075_s10 = sld [smem:[#allocation2 + $0x407]]  ;;  %s3090_s25 = sld [smem:[#allocation2 + $0x408]] }
  0x41   : > { %v770_v15 = vrot.slane %v766_v12, 1 }
  0x42   : > { %v619_v42 = vrot.slane %v615_v35, 1 }
  0x43   : > { %328 = vrot.lane.b32.xlu1 %v323_v40, %s2622_s30  ;;  %v632_v40 = vmul.f32 %v631_v37, %v2686_v0 }
  0x44   : > { %326 = vrot.lane.b32.xlu0 %v322_v41, %s2622_s30  ;;  %v620_v41 = vrot.slane %v616_v36, 1 }
  0x45   : > { %v636_v45 = vrot.slane %v632_v40, 1 }
  0x46   : > { %v621_v47 = vsel %vm204_vm0, %v619_v42, %v620_v41 }
  0x47   : > { %358 = vrot.lane.b32.xlu1 %v354_v43, %s2623_s3  ;;  %v633_v43 = vmul.f32 %v631_v37, %v2689_v1 }
  0x48   : > { %356 = vrot.lane.b32.xlu0 %v355_v49, %s2623_s3  ;;  %v662_v49 = vmul.f32 %v661_v44, %v2686_v0 }
  0x49   : > { %v637_v48 = vrot.slane %v633_v43, 1  ;;  %v247_v43 = vstv %s2837_s12  ;;  %s2978_s12 = sld [smem:[#allocation2 + $0x106]] }
  0x4b   : > { %375 = vrot.lane.b32.xlu1 %v371_v50, %s2622_s30  ;;  %v663_v50 = vmul.f32 %v661_v44, %v2689_v1  ;;  %v638_v52 = vsel %vm204_vm0, %v636_v45, %v637_v48 }
  0x4c   : > { %373 = vrot.lane.b32.xlu0 %v372_v54, %s2622_s30  ;;  %v666_v54 = vrot.slane %v662_v49, 2 }
  0x4d   : > { %v667_v53 = vrot.slane %v663_v50, 2 }
  0x4f   : > { %405 = vrot.lane.b32.xlu1 %v401_v55, %s2623_s3  ;;  %v680_v55 = vmul.f32 %v678_v46, %v2689_v1  ;;  %v668_v56 = vsel %vm252_vm1, %v666_v54, %v667_v53  ;;  %v249_v54 = vmul.f32 %v247_v43, %v2689_v1 }
  0x50   : > { %403 = vrot.lane.b32.xlu0 %v402_v58, %s2623_s3  ;;  %v683_v58 = vrot.slane %v679_v51, 2  ;;  %v897_v51 = vstv %s2844_s14  ;;  %s2987_s14 = sld [smem:[#allocation2 + $0x385]] }
  0x51   : > { %v684_v57 = vrot.slane %v680_v55, 2 }
  0x53   : > { %422 = vrot.lane.b32.xlu1 %v418_v59, %s2622_s30  ;;  %v706_v59 = vstv %s2418_s24  ;;  %v685_v60 = vsel %vm252_vm1, %v683_v58, %v684_v57  ;;  %s2909_s24 = sld [smem:[#allocation2 + $0x302]] }
  0x54   : > { %420 = vrot.lane.b32.xlu0 %v419_v62, %s2622_s30  ;;  %v708_v62 = vmul.f32 %v706_v59, %v2689_v1  ;;  %v707_v63 = vmul.f32 %v706_v59, %v2686_v0 }
  0x57   : > { %447 = vrot.lane.b32.xlu1 %v442_v2, %s2623_s3  ;;  %v720_v2 = vstv %s2419_s26  ;;  %s2914_s26 = scalar_lea.vmem %s3836_s2, %s2563_s21  ;;  %s3050_s21 = sld [smem:[#allocation2 + $0x404]] }
  0x58   : > { %445 = vrot.lane.b32.xlu0 %v441_v3, %s2623_s3  ;;  %v748_v3 = vmul.f32 %v747_v61, %v2686_v0  ;;  %v722_v6 = vmul.f32 %v720_v2, %v2689_v1  ;;  %v721_v7 = vmul.f32 %v720_v2, %v2686_v0  ;;  %v899_v61 = vmul.f32 %v897_v51, %v2689_v1 }
  0x5a   : > { %v752_v10 = vrot.slane %v748_v3, 1 }
  0x5b   : > { %461 = vrot.lane.b32.xlu1 %v456_v8, %s2622_s30  ;;  %v794_v8 = vstv %s2424_s29  ;;  %s2929_s29 = sld [smem:[#allocation2 + $0x307]] }
  0x5c   : > { %459 = vrot.lane.b32.xlu0 %v455_v9, %s2622_s30  ;;  %v753_v9 = vrot.slane %v749_v4, 1  ;;  %v796_v13 = vmul.f32 %v794_v8, %v2689_v1  ;;  %v927_v4 = vstv %s2853_s15  ;;  %s2999_s15 = sld [smem:[#allocation2 + $0x387]] }
  0x5d   : > { %v928_v12 = vmul.f32 %v927_v4, %v2686_v0 }
  0x5e   : > { %v754_v14 = vsel %vm204_vm0, %v752_v10, %v753_v9  ;;  %v800_v19 = vrot.slane %v796_v13, 2  ;;  %v903_v10 = vrot.slane %v899_v61, 1  ;;  %v929_v13 = vmul.f32 %v927_v4, %v2689_v1 }
  0x5f   : > { %491 = vrot.lane.b32.xlu1 %v487_v11, %s2623_s3  ;;  %v765_v11 = vmul.f32 %v764_v5, %v2686_v0  ;;  %v986_v61 = vstv %s2909_s24  ;;  %v1030_v4 = vstv %s2917_s28  ;;  %s3063_s24 = sld [smem:[#allocation2 + $0x405]]  ;;  %s3098_s28 = sld [smem:[#allocation2 + $0x200]] }
  0x60   : > { %489 = vrot.lane.b32.xlu0 %v488_v17, %s2623_s3  ;;  %v795_v17 = vmul.f32 %v794_v8, %v2686_v0 }
  0x61   : > { %v769_v16 = vrot.slane %v765_v11, 1 }
  0x63   : > { %508 = vrot.lane.b32.xlu1 %v504_v18, %s2622_s30  ;;  %v811_v18 = vstv %s2425_s4  ;;  %v771_v21 = vsel %vm204_vm0, %v769_v16, %v770_v15  ;;  %s2944_s4 = sld [smem:[#allocation2 + $0x308]] }
  0x64   : > { %506 = vrot.lane.b32.xlu0 %v505_v22, %s2622_s30  ;;  %v799_v22 = vrot.slane %v795_v17, 2  ;;  %v813_v24 = vmul.f32 %v811_v18, %v2689_v1 }
  0x66   : > { %v817_v28 = vrot.slane %v813_v24, 2  ;;  %v933_v24 = vrot.slane %v929_v13, 2  ;;  %v987_v13 = vmul.f32 %v986_v61, %v2686_v0 }
  0x67   : > { %538 = vrot.lane.b32.xlu1 %v534_v23, %s2623_s3  ;;  %v812_v23 = vmul.f32 %v811_v18, %v2686_v0 }
  0x68   : > { %536 = vrot.lane.b32.xlu0 %v535_v26, %s2623_s3  ;;  %v163_v26 = vstv %s2821_s6  ;;  %s2956_s6 = sld [smem:[#allocation2 + $0x103]] }
  0x69   : > { %v816_v29 = vrot.slane %v812_v23, 2  ;;  %v168_v31 = vadd.f32 %v166_v25, %v163_v26  ;;  %v932_v25 = vrot.slane %v928_v12, 2 }
  0x6b   : > { %555 = vrot.lane.b32.xlu1 %v551_v27, %s2622_s30  ;;  %v801_v27 = vsel %vm252_vm1, %v799_v22, %v800_v19  ;;  %v818_v37 = vsel %vm252_vm1, %v816_v29, %v817_v28 }
  0x6c   : > { %553 = vrot.lane.b32.xlu0 %v552_v30, %s2622_s30  ;;  %v199_v30 = vstv %s2374_s7  ;;  %s2960_s7 = sld [smem:[#allocation2 + $0x109]] }
  0x6d   : > { %v200_v34 = vmul.f32 %v199_v30, %v2686_v0  ;;  %v201_v35 = vmul.f32 %v199_v30, %v2689_v1 }
  0x6f   : > { %580 = vrot.lane.b32.xlu1 %v575_v32, %s2623_s3  ;;  %v167_v32 = vmul.f32 %v165_v20, %v2689_v1  ;;  %v205_v45 = vrot.slane %v200_v34, 1  ;;  %v206_v46 = vrot.slane %v201_v35, 1  ;;  %v944_v20 = vstv %s2867_s16  ;;  %s3014_s16 = sld [smem:[#allocation2 + $0x388]] }
  0x70   : > { %578 = vrot.lane.b32.xlu0 %v574_v33, %s2623_s3  ;;  %v839_v33 = vstv %s2828_s8  ;;  %v945_v30 = vmul.f32 %v944_v20, %v2686_v0  ;;  %v299_v35 = vstv %s2885_s19  ;;  %s2970_s8 = sld [smem:[#allocation2 + $0x381]] }
  0x71   : > { %v841_v42 = vmul.f32 %v839_v33, %v2689_v1  ;;  %v840_v44 = vmul.f32 %v839_v33, %v2686_v0  ;;  %v207_v58 = vsel %vm204_vm0, %v205_v45, %v206_v46  ;;  %v335_v33 = vstv %s2880_s18  ;;  %s3026_s18 = sld [smem:[#allocation2 + $0x183]]  ;;  %s3030_s19 = sld [smem:[#allocation2 + $0x189]] }
  0x72   : > { %v336_v45 = vmul.f32 %v335_v33, %v2686_v0 }
  0x73   : > { %594 = vrot.lane.b32.xlu1 %v589_v38, %s2622_s30 }
  0x74   : > { %592 = vrot.lane.b32.xlu0 %v588_v39, %s2622_s30  ;;  %v880_v39 = vstv %s2833_s11  ;;  %s2974_s11 = sld [smem:[#allocation2 + $0x384]] }
  0x75   : > { %v881_v49 = vmul.f32 %v880_v39, %v2686_v0  ;;  %v882_v50 = vmul.f32 %v880_v39, %v2689_v1 }
  0x77   : > { %624 = vrot.lane.b32.xlu1 %v620_v41, %s2623_s3  ;;  %v169_v41 = vadd.f32 %v167_v32, %v163_v26  ;;  %v886_v2 = vrot.slane %v882_v50, 1  ;;  %v885_v3 = vrot.slane %v881_v49, 1  ;;  %v301_v26 = vstv %s2876_s17  ;;  %s3022_s17 = sld [smem:[#allocation2 + $0x180]] }
  0x78   : > { %622 = vrot.lane.b32.xlu0 %v621_v47, %s2623_s3  ;;  %v853_v47 = vstv %s2841_s13  ;;  %v972_v49 = vstv %s2894_s20  ;;  %s2984_s13 = sld [smem:[#allocation2 + $0x382]]  ;;  %s3043_s20 = sld [smem:[#allocation2 + $0x401]] }
  0x79   : > { %v854_v59 = vmul.f32 %v853_v47, %v2686_v0  ;;  %v887_v17 = vsel %vm204_vm0, %v885_v3, %v886_v2 }
  0x7b   : > { %641 = vrot.lane.b32.xlu1 %v637_v48, %s2622_s30 }
  0x7c   : > { %639 = vrot.lane.b32.xlu0 %v638_v52, %s2622_s30 }
  0x7f   : > { %671 = vrot.lane.b32.xlu1 %v667_v53, %s2623_s3  ;;  %v248_v53 = vmul.f32 %v247_v43, %v2686_v0 }
  0x80   : > { %669 = vrot.lane.b32.xlu0 %v668_v56, %s2623_s3 }
  0x83   : > { %688 = vrot.lane.b32.xlu1 %v684_v57, %s2622_s30  ;;  %v855_v57 = vmul.f32 %v853_v47, %v2689_v1 }
  0x84   : > { %686 = vrot.lane.b32.xlu0 %v685_v60, %s2622_s30  ;;  %v898_v60 = vmul.f32 %v897_v51, %v2686_v0 }
  0x86   : > { %v902_v11 = vrot.slane %v898_v60, 1  ;;  %v973_v60 = vmul.f32 %v972_v49, %v2686_v0 }
  0x87   : > { %713 = vrot.lane.b32.xlu1 %v708_v62, %s2623_s3 }
  0x88   : > { %711 = vrot.lane.b32.xlu0 %v707_v63, %s2623_s3  ;;  %v904_v23 = vsel %vm204_vm0, %v902_v11, %v903_v10  ;;  %v988_v11 = vmul.f32 %v986_v61, %v2689_v1 }
  0x8b   : > { %727 = vrot.lane.b32.xlu1 %v722_v6, %s2622_s30  ;;  %v253_v6 = vrot.slane %v248_v53, 2 }
  0x8c   : > { %725 = vrot.lane.b32.xlu0 %v721_v7, %s2622_s30  ;;  %v254_v7 = vrot.slane %v249_v54, 2  ;;  %v340_v54 = vrot.slane %v336_v45, 1 }
  0x8f   : > { %757 = vrot.lane.b32.xlu1 %v753_v9, %s2623_s3 }
  0x90   : > { %755 = vrot.lane.b32.xlu0 %v754_v14, %s2623_s3 }
  0x93   : > { %774 = vrot.lane.b32.xlu1 %v770_v15, %s2622_s30 }
  0x94   : > { %772 = vrot.lane.b32.xlu0 %v771_v21, %s2622_s30 }
  0x97   : > { %804 = vrot.lane.b32.xlu1 %v800_v19, %s2623_s3  ;;  %v255_v19 = vsel %vm252_vm1, %v253_v6, %v254_v7 }
  0x98   : > { %802 = vrot.lane.b32.xlu0 %v801_v27, %s2623_s3 }
  0x99   : > { %v191_v36 = vpop.permute.xlu1 %190 }
  0x9a   : > { %v177_v38 = vpop.permute.xlu0 %176 }
  0x9b   : > { %v182_v40 = vadd.f32 %v177_v38, %v168_v31  ;;  %821 = vrot.lane.b32.xlu1 %v817_v28, %s2622_s30  ;;  %v946_v31 = vmul.f32 %v944_v20, %v2689_v1  ;;  %v1060_v20 = vstv %s2929_s29  ;;  %s3102_s29 = sld [smem:[#allocation2 + $0x203]] }
  0x9c   : > { %819 = vrot.lane.b32.xlu0 %v818_v37, %s2622_s30  ;;  %v302_v37 = vmul.f32 %v301_v26, %v2686_v0 }
  0x9d   : > { %v193_v48 = vpop.permute.xlu1 %192  ;;  %v196_v55 = vadd.f32 %v191_v36, %v182_v40  ;;  %v303_v36 = vmul.f32 %v301_v26, %v2689_v1  ;;  %v934_v40 = vsel %vm252_vm1, %v932_v25, %v933_v24 }
  0x9e   : > { %v179_v52 = vpop.permute.xlu0 %178  ;;  %v304_v51 = vadd.f32 %v302_v37, %v299_v35 }
  0x9f   : > { %v183_v56 = vadd.f32 %v179_v52, %v169_v41  ;;  %846 = vrot.lane.b32.xlu1 %v841_v42, %s2623_s3  ;;  %v210_v9 = vadd.f32 %v207_v58, %v196_v55  ;;  %v950_v41 = vrot.slane %v946_v31, 2  ;;  %v949_v42 = vrot.slane %v945_v30, 2 }
  0xa0   : > { %844 = vrot.lane.b32.xlu0 %v840_v44, %s2623_s3  ;;  %v382_v58 = vstv %s2903_s23  ;;  %v1062_v31 = vmul.f32 %v1060_v20, %v2689_v1  ;;  %s3060_s23 = sld [smem:[#allocation2 + $0x402]] }
  0xa1   : > { %v197_v62 = vadd.f32 %v193_v48, %v183_v56  ;;  %v224_v63 = vpop.permute.xlu1 %223  ;;  %v305_v48 = vadd.f32 %v303_v36, %v299_v35  ;;  %v951_v52 = vsel %vm252_vm1, %v949_v42, %v950_v41  ;;  %v1013_v56 = vstv %s2899_s22  ;;  %s3054_s22 = sld [smem:[#allocation2 + $0x186]] }
  0xa2   : > { %v222_v5 = vpop.permute.xlu0 %221  ;;  %v1015_v3 = vmul.f32 %v1013_v56, %v2689_v1  ;;  %v1077_v35 = vstv %s2944_s4  ;;  %s3106_s4 = sld [smem:[#allocation2 + $0x209]] }
  0xa3   : > { %v211_v8 = vadd.f32 %v206_v46, %v197_v62  ;;  %860 = vrot.lane.b32.xlu1 %v855_v57, %s2622_s30  ;;  %v227_v15 = vadd.f32 %v222_v5, %v210_v9  ;;  %v337_v46 = vmul.f32 %v335_v33, %v2689_v1  ;;  %v974_v57 = vmul.f32 %v972_v49, %v2689_v1 }
  0xa4   : > { %858 = vrot.lane.b32.xlu0 %v854_v59, %s2622_s30  ;;  %v384_v9 = vmul.f32 %v382_v58, %v2689_v1  ;;  %v1079_v45 = vmul.f32 %v1077_v35, %v2689_v1  ;;  %v432_v49 = vstv %s2960_s7  ;;  %s3124_s7 = sld [smem:[#allocation2 + $0x206]] }
  0xa5   : > { %v228_v14 = vadd.f32 %v224_v63, %v211_v8  ;;  %v241_v16 = vpop.permute.xlu1 %240  ;;  %v341_v55 = vrot.slane %v337_v46, 1  ;;  %v383_v8 = vmul.f32 %v382_v58, %v2686_v0 }
  0xa6   : > { %v239_v18 = vpop.permute.xlu0 %238 }
  0xa7   : > { %v245_v21 = vadd.f32 %v241_v16, %v228_v14  ;;  %v244_v22 = vadd.f32 %v239_v18, %v227_v15  ;;  %890 = vrot.lane.b32.xlu1 %v886_v2, %s2623_s3  ;;  %v1014_v2 = vmul.f32 %v1013_v56, %v2686_v0  ;;  %v1031_v14 = vmul.f32 %v1030_v4, %v2686_v0 }
  0xa8   : > { %888 = vrot.lane.b32.xlu0 %v887_v17, %s2623_s3  ;;  %v1032_v15 = vmul.f32 %v1030_v4, %v2689_v1  ;;  %v1019_v18 = vrot.slane %v1015_v3, 1 }
  0xa9   : > { %v272_v27 = vpop.permute.xlu1 %271  ;;  %v259_v28 = vadd.f32 %v254_v7, %v245_v21  ;;  %v258_v29 = vadd.f32 %v255_v19, %v244_v22  ;;  %v342_v7 = vsel %vm204_vm0, %v340_v54, %v341_v55  ;;  %v1018_v19 = vrot.slane %v1014_v2, 1 }
  0xaa   : > { %v270_v32 = vpop.permute.xlu0 %269  ;;  %v387_v22 = vrot.slane %v383_v8, 2  ;;  %v1036_v25 = vrot.slane %v1032_v15, 1  ;;  %v1035_v26 = vrot.slane %v1031_v14, 1  ;;  %v1146_v8 = vstv %s2974_s11  ;;  %s3132_s11 = sld [smem:[#allocation2 + $0x485]] }
  0xab   : > { %907 = vrot.lane.b32.xlu1 %v903_v10, %s2622_s30  ;;  %v276_v34 = vadd.f32 %v272_v27, %v259_v28  ;;  %v275_v38 = vadd.f32 %v270_v32, %v258_v29  ;;  %v1061_v27 = vmul.f32 %v1060_v20, %v2686_v0  ;;  %v1020_v30 = vsel %vm204_vm0, %v1018_v19, %v1019_v18 }
  0xac   : > { %905 = vrot.lane.b32.xlu0 %v904_v23, %s2622_s30  ;;  %v388_v23 = vrot.slane %v384_v9, 2 }
  0xad   : > { %v289_v39 = vpop.permute.xlu1 %288 }
  0xae   : > { %v293_v43 = vadd.f32 %v289_v39, %v276_v34  ;;  %v287_v44 = vpop.permute.xlu0 %286  ;;  %v389_v34 = vsel %vm252_vm1, %v387_v22, %v388_v23  ;;  %v1065_v39 = vrot.slane %v1061_v27, 2 }
  0xaf   : > { %v292_v47 = vadd.f32 %v287_v44, %v275_v38  ;;  %937 = vrot.lane.b32.xlu1 %v933_v24, %s2623_s3  ;;  %v1037_v38 = vsel %vm204_vm0, %v1035_v26, %v1036_v25  ;;  %v1078_v44 = vmul.f32 %v1077_v35, %v2686_v0 }
  0xb0   : > { %297 = vst.msk [vmem:[%s2914_s26 + $0x8] sm:$0x3f] %vm296_vm2, %v293_v43  ;;  %935 = vrot.lane.b32.xlu0 %v934_v40, %s2623_s3  ;;  %v434_v40 = vstv %s2952_s5  ;;  %v1066_v43 = vrot.slane %v1062_v31, 2  ;;  %s3116_s5 = sld [smem:[#allocation2 + $0x481]] }
  0xb1   : > { %295 = vst.msk [vmem:[%s2914_s26] sm:$0xff] %vm294_vm3, %v292_v47  ;;  %v315_v50 = vpop.permute.xlu1 %314  ;;  %v468_v47 = vstv %s2956_s6  ;;  %v1082_v56 = vrot.slane %v1078_v44, 2  ;;  %v3034_v44 = vld [vmem:[%s2683_s27 + $0x8] sm:$0xff]  ;;  %s3120_s6 = sld [smem:[#allocation2 + $0x484]] }
  0xb2   : > { %v313_v53 = vpop.permute.xlu0 %312  ;;  %v319_v59 = vadd.f32 %v315_v50, %v305_v48  ;;  %v436_v50 = vmul.f32 %v434_v40, %v2689_v1  ;;  %v1067_v54 = vsel %vm252_vm1, %v1065_v39, %v1066_v43 }
  0xb3   : > { %954 = vrot.lane.b32.xlu1 %v950_v41, %s2622_s30  ;;  %v318_v62 = vadd.f32 %v313_v53, %v304_v51  ;;  %v435_v51 = vmul.f32 %v434_v40, %v2686_v0 }
  0xb4   : > { %952 = vrot.lane.b32.xlu0 %v951_v52, %s2622_s30 }
  0xb5   : > { %v329_v63 = vpop.permute.xlu1 %328  ;;  %v437_v3 = vadd.f32 %v435_v51, %v432_v49 }
  0xb6   : > { %v333_v5 = vadd.f32 %v329_v63, %v319_v59  ;;  %v327_v6 = vpop.permute.xlu0 %326  ;;  %v469_v59 = vmul.f32 %v468_v47, %v2686_v0  ;;  %v1105_v63 = vstv %s2970_s8  ;;  %s3130_s8 = sld [smem:[#allocation2 + $0x482]] }
  0xb7   : > { %v332_v10 = vadd.f32 %v327_v6, %v318_v62  ;;  %979 = vrot.lane.b32.xlu1 %v974_v57, %s2623_s3  ;;  %v438_v62 = vadd.f32 %v436_v50, %v432_v49  ;;  %v1107_v9 = vmul.f32 %v1105_v63, %v2689_v1  ;;  %v1210_v49 = vstv %s3014_s16  ;;  %s3178_s16 = sld [smem:[#allocation2 + $0x289]] }
  0xb8   : > { %977 = vrot.lane.b32.xlu0 %v973_v60, %s2623_s3  ;;  %v346_v12 = vadd.f32 %v341_v55, %v333_v5  ;;  %v1083_v55 = vrot.slane %v1079_v45, 2  ;;  %v470_v60 = vmul.f32 %v468_v47, %v2689_v1  ;;  %v473_v6 = vrot.slane %v469_v59, 1 }
  0xb9   : > { %v359_v16 = vpop.permute.xlu1 %358  ;;  %v345_v17 = vadd.f32 %v342_v7, %v332_v10  ;;  %v515_v10 = vstv %s2978_s12  ;;  %v1212_v59 = vmul.f32 %v3034_v44, %v1210_v49  ;;  %s3145_s12 = sld [smem:[#allocation2 + $0x487]] }
  0xba   : > { %v357_v21 = vpop.permute.xlu0 %356  ;;  %v363_v24 = vadd.f32 %v359_v16, %v346_v12  ;;  %v1084_v4 = vsel %vm252_vm1, %v1082_v56, %v1083_v55  ;;  %v474_v7 = vrot.slane %v470_v60, 1  ;;  %v1106_v12 = vmul.f32 %v1105_v63, %v2686_v0 }
  0xbb   : > { %993 = vrot.lane.b32.xlu1 %v988_v11, %s2622_s30  ;;  %v362_v28 = vadd.f32 %v357_v21, %v345_v17  ;;  %v1147_v16 = vmul.f32 %v1146_v8, %v2686_v0  ;;  %v1148_v17 = vmul.f32 %v1146_v8, %v2689_v1  ;;  %v516_v22 = vmul.f32 %v515_v10, %v2686_v0 }
  0xbc   : > { %991 = vrot.lane.b32.xlu0 %v987_v13, %s2622_s30  ;;  %v1119_v13 = vstv %s2984_s13  ;;  %v475_v21 = vsel %vm204_vm0, %v473_v6, %v474_v7  ;;  %v565_v63 = vstv %s3030_s19  ;;  %s3160_s13 = sld [smem:[#allocation2 + $0x488]]  ;;  %s3194_s19 = sld [smem:[#allocation2 + $0x286]] }
  0xbd   : > { %v376_v29 = vpop.permute.xlu1 %375  ;;  %v1120_v27 = vmul.f32 %v1119_v13, %v2686_v0 }
  0xbe   : > { %v380_v32 = vadd.f32 %v376_v29, %v363_v24  ;;  %v374_v33 = vpop.permute.xlu0 %373 }
  0xbf   : > { %v379_v36 = vadd.f32 %v374_v33, %v362_v28  ;;  %1023 = vrot.lane.b32.xlu1 %v1019_v18, %s2623_s3  ;;  %v1163_v18 = vstv %s2987_s14  ;;  %v1151_v33 = vrot.slane %v1147_v16, 1  ;;  %s3169_s14 = sld [smem:[#allocation2 + $0x280]] }
  0xc0   : > { %1021 = vrot.lane.b32.xlu0 %v1020_v30, %s2623_s3  ;;  %v393_v37 = vadd.f32 %v388_v23, %v380_v32  ;;  %v517_v23 = vmul.f32 %v515_v10, %v2689_v1  ;;  %v1164_v28 = vmul.f32 %v1163_v18, %v2686_v0  ;;  %v1165_v29 = vmul.f32 %v1163_v18, %v2689_v1 }
  0xc1   : > { %v406_v41 = vpop.permute.xlu1 %405  ;;  %v392_v42 = vadd.f32 %v389_v34, %v379_v36  ;;  %v1152_v32 = vrot.slane %v1148_v17, 1  ;;  %v1193_v34 = vstv %s2999_s15  ;;  %v520_v36 = vrot.slane %v516_v22, 2  ;;  %s3172_s15 = sld [smem:[#allocation2 + $0x283]] }
  0xc2   : > { %v404_v46 = vpop.permute.xlu0 %403  ;;  %v410_v48 = vadd.f32 %v406_v41, %v393_v37  ;;  %v521_v37 = vrot.slane %v517_v23, 2  ;;  %v1168_v39 = vrot.slane %v1164_v28, 1  ;;  %v1194_v40 = vmul.f32 %v1193_v34, %v2686_v0 }
  0xc3   : > { %1040 = vrot.lane.b32.xlu1 %v1036_v25, %s2622_s30  ;;  %v409_v52 = vadd.f32 %v404_v46, %v392_v42  ;;  %v1121_v25 = vmul.f32 %v1119_v13, %v2689_v1  ;;  %v1169_v1 = vrot.slane %v1165_v29, 1  ;;  %v1195_v45 = vmul.f32 %v3034_v44, %v1193_v34 }
  0xc4   : > { %1038 = vrot.lane.b32.xlu0 %v1037_v38, %s2622_s30  ;;  %v1279_v22 = vstv %s3050_s21  ;;  %s3202_s21 = sld [smem:[#allocation2 + $0x505]] }
  0xc5   : > { %v423_v53 = vpop.permute.xlu1 %422  ;;  %v1170_v51 = vsel %vm204_vm0, %v1168_v39, %v1169_v1  ;;  %v1199_v56 = vrot.slane %v1195_v45, 2 }
  0xc6   : > { %v427_v57 = vadd.f32 %v423_v53, %v410_v48  ;;  %v421_v58 = vpop.permute.xlu0 %420  ;;  %v522_v48 = vsel %vm252_vm1, %v520_v36, %v521_v37  ;;  %v567_v53 = vstv %s3022_s17  ;;  %s3185_s17 = sld [smem:[#allocation2 + $0x501]] }
  0xc7   : > { %v426_v61 = vadd.f32 %v421_v58, %v409_v52  ;;  %1070 = vrot.lane.b32.xlu1 %v1066_v43, %s2623_s3  ;;  %v1153_v43 = vsel %vm204_vm0, %v1151_v33, %v1152_v32  ;;  %v1198_v52 = vrot.slane %v1194_v40, 2 }
  0xc8   : > { %2391 = vst.msk [vmem:[%s2914_s26 + $0x18] sm:$0x3f] %vm296_vm2, %v427_v57  ;;  %1068 = vrot.lane.b32.xlu0 %v1067_v54, %s2623_s3  ;;  %v3046_v57 = vld [vmem:[%s2683_s27] sm:$0xff] }
  0xc9   : > { %2390 = vst.msk [vmem:[%s2914_s26 + $0x10] sm:$0xff] %vm294_vm3, %v426_v61  ;;  %v448_v2 = vpop.permute.xlu1 %447  ;;  %v1211_v58 = vmul.f32 %v3046_v57, %v1210_v49  ;;  %v601_v61 = vstv %s3026_s18  ;;  %v1200_v6 = vsel %vm252_vm1, %v1198_v52, %v1199_v56  ;;  %s3190_s18 = sld [smem:[#allocation2 + $0x504]] }
  0xca   : > { %v446_v5 = vpop.permute.xlu0 %445  ;;  %v452_v11 = vadd.f32 %v448_v2, %v438_v62  ;;  %v569_v2 = vmul.f32 %v3034_v44, %v567_v53 }
  0xcb   : > { %1087 = vrot.lane.b32.xlu1 %v1083_v55, %s2622_s30  ;;  %v451_v14 = vadd.f32 %v446_v5, %v437_v3  ;;  %v568_v3 = vmul.f32 %v3046_v57, %v567_v53  ;;  %v1215_v8 = vrot.slane %v1211_v58, 2 }
  0xcc   : > { %1085 = vrot.lane.b32.xlu0 %v1084_v4, %s2622_s30 }
  0xcd   : > { %v462_v15 = vpop.permute.xlu1 %461  ;;  %v570_v17 = vadd.f32 %v568_v3, %v565_v63 }
  0xce   : > { %v466_v19 = vadd.f32 %v462_v15, %v452_v11  ;;  %v460_v20 = vpop.permute.xlu0 %459  ;;  %v602_v11 = vmul.f32 %v3046_v57, %v601_v61  ;;  %v1238_v15 = vstv %s3043_s20  ;;  %s3200_s20 = sld [smem:[#allocation2 + $0x502]] }
  0xcf   : > { %v465_v24 = vadd.f32 %v460_v20, %v451_v14  ;;  %1112 = vrot.lane.b32.xlu1 %v1107_v9, %s2623_s3  ;;  %v571_v14 = vadd.f32 %v569_v2, %v565_v63  ;;  %v1240_v23 = vmul.f32 %v3034_v44, %v1238_v15  ;;  %v1343_v63 = vstv %s3090_s25  ;;  %s3247_s25 = sld [smem:[#allocation2 + $0x309]] }
  0xd0   : > { %1110 = vrot.lane.b32.xlu0 %v1106_v12, %s2623_s3  ;;  %v479_v26 = vadd.f32 %v474_v7, %v466_v19  ;;  %v1216_v7 = vrot.slane %v1212_v59, 2  ;;  %v603_v12 = vmul.f32 %v3034_v44, %v601_v61  ;;  %v606_v20 = vrot.slane %v602_v11, 1 }
  0xd1   : > { %v492_v30 = vpop.permute.xlu1 %491  ;;  %v478_v31 = vadd.f32 %v475_v21, %v465_v24  ;;  %v648_v24 = vstv %s3054_s22  ;;  %v1344_v11 = vmul.f32 %v3046_v57, %v1343_v63  ;;  %s3215_s22 = sld [smem:[#allocation2 + $0x507]] }
  0xd2   : > { %v490_v35 = vpop.permute.xlu0 %489  ;;  %v496_v38 = vadd.f32 %v492_v30, %v479_v26  ;;  %v1217_v18 = vsel %vm252_vm1, %v1215_v8, %v1216_v7  ;;  %v607_v21 = vrot.slane %v603_v12, 1  ;;  %v1239_v26 = vmul.f32 %v3046_v57, %v1238_v15 }
  0xd3   : > { %1126 = vrot.lane.b32.xlu1 %v1121_v25, %s2622_s30  ;;  %v495_v41 = vadd.f32 %v490_v35, %v478_v31  ;;  %v1281_v30 = vmul.f32 %v3034_v44, %v1279_v22  ;;  %v1280_v31 = vmul.f32 %v3046_v57, %v1279_v22  ;;  %v649_v36 = vmul.f32 %v3046_v57, %v648_v24 }
  0xd4   : > { %1124 = vrot.lane.b32.xlu0 %v1120_v27, %s2622_s30  ;;  %v1252_v27 = vstv %s3060_s23  ;;  %v608_v35 = vsel %vm204_vm0, %v606_v20, %v607_v21  ;;  %v698_v15 = vstv %s3106_s4  ;;  %v1348_v22 = vrot.slane %v1344_v11, 2  ;;  %s3230_s23 = sld [smem:[#allocation2 + $0x508]]  ;;  %s3264_s4 = sld [smem:[#allocation2 + $0x306]] }
  0xd5   : > { %v509_v42 = vpop.permute.xlu1 %508  ;;  %v1253_v40 = vmul.f32 %v3046_v57, %v1252_v27 }
  0xd6   : > { %v513_v46 = vadd.f32 %v509_v42, %v496_v38  ;;  %v507_v47 = vpop.permute.xlu0 %506 }
  0xd7   : > { %v512_v50 = vadd.f32 %v507_v47, %v495_v41  ;;  %1156 = vrot.lane.b32.xlu1 %v1152_v32, %s2623_s3  ;;  %v1296_v32 = vstv %s3063_s24  ;;  %v1284_v47 = vrot.slane %v1280_v31, 1  ;;  %s3239_s24 = sld [smem:[#allocation2 + $0x300]] }
  0xd8   : > { %1154 = vrot.lane.b32.xlu0 %v1153_v43, %s2623_s3  ;;  %v526_v0 = vadd.f32 %v521_v37, %v513_v46  ;;  %v650_v37 = vmul.f32 %v3034_v44, %v648_v24  ;;  %v1298_v41 = vmul.f32 %v3034_v44, %v1296_v32  ;;  %v1297_v42 = vmul.f32 %v3046_v57, %v1296_v32 }
  0xd9   : > { %v539_v54 = vpop.permute.xlu1 %538  ;;  %v525_v55 = vadd.f32 %v522_v48, %v512_v50  ;;  %v1285_v46 = vrot.slane %v1281_v30, 1  ;;  %v1326_v48 = vstv %s3075_s10  ;;  %v653_v50 = vrot.slane %v649_v36, 2  ;;  %s3242_s10 = sld [smem:[#allocation2 + $0x303]] }
  0xda   : > { %v537_v60 = vpop.permute.xlu0 %536  ;;  %v543_v62 = vadd.f32 %v539_v54, %v526_v0  ;;  %v654_v0 = vrot.slane %v650_v37, 2  ;;  %v1302_v52 = vrot.slane %v1298_v41, 1  ;;  %v1301_v53 = vrot.slane %v1297_v42, 1 }
  0xdb   : > { %1173 = vrot.lane.b32.xlu1 %v1169_v1, %s2622_s30  ;;  %v542_v4 = vadd.f32 %v537_v60, %v525_v55  ;;  %v1254_v1 = vmul.f32 %v3034_v44, %v1252_v27  ;;  %v1328_v54 = vmul.f32 %v3034_v44, %v1326_v48  ;;  %v1286_v58 = vsel %vm204_vm0, %v1284_v47, %v1285_v46 }
  0xdc   : > { %1171 = vrot.lane.b32.xlu0 %v1170_v51, %s2622_s30  ;;  %v1327_v59 = vmul.f32 %v3046_v57, %v1326_v48  ;;  %v1412_v36 = vstv %s3120_s6  ;;  %v1429_v41 = vstv %s3132_s11  ;;  %s3272_s6 = sld [smem:[#allocation2 + $0x585]]  ;;  %s3309_s11 = sld [smem:[#allocation2 + $0x380]] }
  0xdd   : > { %v556_v5 = vpop.permute.xlu1 %555 }
  0xde   : > { %v560_v9 = vadd.f32 %v556_v5, %v543_v62  ;;  %v554_v10 = vpop.permute.xlu0 %553  ;;  %v655_v62 = vsel %vm252_vm1, %v653_v50, %v654_v0  ;;  %v1332_v5 = vrot.slane %v1328_v54, 2 }
  0xdf   : > { %v559_v13 = vadd.f32 %v554_v10, %v542_v4  ;;  %1203 = vrot.lane.b32.xlu1 %v1199_v56, %s2623_s3  ;;  %v1303_v4 = vsel %vm204_vm0, %v1301_v53, %v1302_v52  ;;  %v1345_v10 = vmul.f32 %v3034_v44, %v1343_v63  ;;  %v1431_v53 = vmul.f32 %v3034_v44, %v1429_v41 }
  0xe0   : > { %2403 = vst.msk [vmem:[%s2914_s26 + $0x28] sm:$0x3f] %vm296_vm2, %v560_v9  ;;  %1201 = vrot.lane.b32.xlu0 %v1200_v6, %s2623_s3  ;;  %v700_v6 = vstv %s3098_s28  ;;  %v1331_v9 = vrot.slane %v1327_v59, 2  ;;  %s3255_s28 = sld [smem:[#allocation2 + $0x581]] }
  0xe1   : > { %2402 = vst.msk [vmem:[%s2914_s26 + $0x20] sm:$0xff] %vm294_vm3, %v559_v13  ;;  %v581_v16 = vpop.permute.xlu1 %580  ;;  %v734_v13 = vstv %s3102_s29  ;;  %s3260_s29 = sld [smem:[#allocation2 + $0x584]] }
  0xe2   : > { %v579_v19 = vpop.permute.xlu0 %578  ;;  %v585_v25 = vadd.f32 %v581_v16, %v571_v14  ;;  %v702_v16 = vmul.f32 %v3034_v44, %v700_v6  ;;  %v1333_v20 = vsel %vm252_vm1, %v1331_v9, %v1332_v5 }
  0xe3   : > { %1220 = vrot.lane.b32.xlu1 %v1216_v7, %s2622_s30  ;;  %v584_v28 = vadd.f32 %v579_v19, %v570_v17  ;;  %v701_v17 = vmul.f32 %v3046_v57, %v700_v6 }
  0xe4   : > { %1218 = vrot.lane.b32.xlu0 %v1217_v18, %s2622_s30 }
  0xe5   : > { %v595_v29 = vpop.permute.xlu1 %594  ;;  %v703_v31 = vadd.f32 %v701_v17, %v698_v15 }
  0xe6   : > { %v599_v33 = vadd.f32 %v595_v29, %v585_v25  ;;  %v593_v34 = vpop.permute.xlu0 %592  ;;  %v735_v25 = vmul.f32 %v3046_v57, %v734_v13  ;;  %v1371_v29 = vstv %s3116_s5  ;;  %s3270_s5 = sld [smem:[#allocation2 + $0x582]] }
  0xe7   : > { %v598_v38 = vadd.f32 %v593_v34, %v584_v28  ;;  %1245 = vrot.lane.b32.xlu1 %v1240_v23, %s2623_s3  ;;  %v704_v28 = vadd.f32 %v702_v16, %v698_v15  ;;  %v1373_v37 = vmul.f32 %v3034_v44, %v1371_v29  ;;  %v1476_v15 = vstv %s3160_s13  ;;  %s3318_s13 = sld [smem:[#allocation2 + $0x389]] }
  0xe8   : > { %1243 = vrot.lane.b32.xlu0 %v1239_v26, %s2623_s3  ;;  %v612_v39 = vadd.f32 %v607_v21, %v599_v33  ;;  %v1349_v21 = vrot.slane %v1345_v10, 2  ;;  %v736_v26 = vmul.f32 %v3034_v44, %v734_v13  ;;  %v739_v34 = vrot.slane %v735_v25, 1 }
  0xe9   : > { %v625_v43 = vpop.permute.xlu1 %624  ;;  %v611_v45 = vadd.f32 %v608_v35, %v598_v38  ;;  %v781_v38 = vstv %s3124_s7  ;;  %v1477_v25 = vmul.f32 %v3046_v57, %v1476_v15  ;;  %s3285_s7 = sld [smem:[#allocation2 + $0x587]] }
  0xea   : > { %v623_v49 = vpop.permute.xlu0 %622  ;;  %v629_v51 = vadd.f32 %v625_v43, %v612_v39  ;;  %v1350_v32 = vsel %vm252_vm1, %v1348_v22, %v1349_v21  ;;  %v740_v35 = vrot.slane %v736_v26, 1  ;;  %v1372_v39 = vmul.f32 %v3046_v57, %v1371_v29 }
  0xeb   : > { %1259 = vrot.lane.b32.xlu1 %v1254_v1, %s2622_s30  ;;  %v628_v55 = vadd.f32 %v623_v49, %v611_v45  ;;  %v1414_v45 = vmul.f32 %v3034_v44, %v1412_v36  ;;  %v782_v50 = vmul.f32 %v3046_v57, %v781_v38 }
  0xec   : > { %1257 = vrot.lane.b32.xlu0 %v1253_v40, %s2622_s30  ;;  %v1385_v40 = vstv %s3130_s8  ;;  %v741_v49 = vsel %vm204_vm0, %v739_v34, %v740_v35  ;;  %v831_v34 = vstv %s3178_s16  ;;  %s3300_s8 = sld [smem:[#allocation2 + $0x588]]  ;;  %s3334_s16 = sld [smem:[#allocation2 + $0x386]] }
  0xed   : > { %v642_v56 = vpop.permute.xlu1 %641 }
  0xee   : > { %v646_v60 = vadd.f32 %v642_v56, %v629_v51  ;;  %v640_v61 = vpop.permute.xlu0 %639  ;;  %v1430_v56 = vmul.f32 %v3046_v57, %v1429_v41 }
  0xef   : > { %v645_v2 = vadd.f32 %v640_v61, %v628_v55  ;;  %1289 = vrot.lane.b32.xlu1 %v1285_v46, %s2623_s3  ;;  %v1413_v46 = vmul.f32 %v3046_v57, %v1412_v36  ;;  %v1386_v55 = vmul.f32 %v3046_v57, %v1385_v40  ;;  %v1481_v36 = vrot.slane %v1477_v25, 2 }
  0xf0   : > { %1287 = vrot.lane.b32.xlu0 %v1286_v58, %s2623_s3  ;;  %v659_v3 = vadd.f32 %v654_v0, %v646_v60  ;;  %v783_v0 = vmul.f32 %v3034_v44, %v781_v38  ;;  %v1418_v60 = vrot.slane %v1414_v45, 1  ;;  %v1434_v6 = vrot.slane %v1430_v56, 1 }
  0xf1   : > { %v672_v7 = vpop.permute.xlu1 %671  ;;  %v658_v8 = vadd.f32 %v655_v62, %v645_v2  ;;  %v1417_v61 = vrot.slane %v1413_v46, 1  ;;  %v1459_v62 = vstv %s3145_s12  ;;  %v786_v2 = vrot.slane %v782_v50, 2  ;;  %s3312_s12 = sld [smem:[#allocation2 + $0x383]] }
  0xf2   : > { %v670_v12 = vpop.permute.xlu0 %669  ;;  %v676_v14 = vadd.f32 %v672_v7, %v659_v3  ;;  %v787_v3 = vrot.slane %v783_v0, 2  ;;  %v1461_v7 = vmul.f32 %v3034_v44, %v1459_v62  ;;  %v1545_v50 = vstv %s3190_s18  ;;  %s3343_s18 = sld [smem:[#allocation2 + $0x605]] }
  0xf3   : > { %1306 = vrot.lane.b32.xlu1 %v1302_v52, %s2622_s30  ;;  %v675_v18 = vadd.f32 %v670_v12, %v658_v8  ;;  %v1387_v52 = vmul.f32 %v3034_v44, %v1385_v40  ;;  %v1460_v8 = vmul.f32 %v3046_v57, %v1459_v62  ;;  %v1419_v11 = vsel %vm204_vm0, %v1417_v61, %v1418_v60 }
  0xf4   : > { %1304 = vrot.lane.b32.xlu0 %v1303_v4, %s2622_s30  ;;  %v1435_v4 = vrot.slane %v1431_v53, 1 }
  0xf5   : > { %v689_v19 = vpop.permute.xlu1 %688 }
  0xf6   : > { %v693_v23 = vadd.f32 %v689_v19, %v676_v14  ;;  %v687_v24 = vpop.permute.xlu0 %686  ;;  %v788_v14 = vsel %vm252_vm1, %v786_v2, %v787_v3  ;;  %v1465_v19 = vrot.slane %v1461_v7, 2 }
  0xf7   : > { %v692_v27 = vadd.f32 %v687_v24, %v675_v18  ;;  %1336 = vrot.lane.b32.xlu1 %v1332_v5, %s2623_s3  ;;  %v1436_v18 = vsel %vm204_vm0, %v1434_v6, %v1435_v4  ;;  %v1478_v24 = vmul.f32 %v3034_v44, %v1476_v15 }
  0xf8   : > { %2415 = vst.msk [vmem:[%s2914_s26 + $0x38] sm:$0x3f] %vm296_vm2, %v693_v23  ;;  %1334 = vrot.lane.b32.xlu0 %v1333_v20, %s2623_s3  ;;  %v1464_v20 = vrot.slane %v1460_v8, 2  ;;  %v833_v23 = vstv %s3169_s14  ;;  %s3325_s14 = sld [smem:[#allocation2 + $0x601]] }
  0xf9   : > { %2414 = vst.msk [vmem:[%s2914_s26 + $0x30] sm:$0xff] %vm294_vm3, %v692_v27  ;;  %v714_v30 = vpop.permute.xlu1 %713  ;;  %v867_v27 = vstv %s3172_s15  ;;  %s3330_s15 = sld [smem:[#allocation2 + $0x604]] }
  0xfa   : > { %v712_v33 = vpop.permute.xlu0 %711  ;;  %v718_v1 = vadd.f32 %v714_v30, %v704_v28  ;;  %v1466_v29 = vsel %vm252_vm1, %v1464_v20, %v1465_v19  ;;  %v835_v30 = vmul.f32 %v3034_v44, %v833_v23 }
  0xfb   : > { %1353 = vrot.lane.b32.xlu1 %v1349_v21, %s2622_s30  ;;  %v717_v42 = vadd.f32 %v712_v33, %v703_v31  ;;  %v834_v31 = vmul.f32 %v3046_v57, %v833_v23 }
  0xfc   : > { %1351 = vrot.lane.b32.xlu0 %v1350_v32, %s2622_s30  ;;  %v837_v41 = vadd.f32 %v835_v30, %v831_v34 }
  0xfd   : > { %v728_v43 = vpop.permute.xlu1 %727  ;;  %v836_v45 = vadd.f32 %v834_v31, %v831_v34 }
  0xfe   : > { %v732_v47 = vadd.f32 %v728_v43, %v718_v1  ;;  %v726_v48 = vpop.permute.xlu0 %725  ;;  %v868_v1 = vmul.f32 %v3046_v57, %v867_v27 }
  0xff   : > { %v731_v51 = vadd.f32 %v726_v48, %v717_v42  ;;  %1378 = vrot.lane.b32.xlu1 %v1373_v37, %s2623_s3  ;;  %v1504_v42 = vstv %s3185_s17  ;;  %s3340_s17 = sld [smem:[#allocation2 + $0x602]] }
 0x100   : > { %1376 = vrot.lane.b32.xlu0 %v1372_v39, %s2623_s3  ;;  %v745_v54 = vadd.f32 %v740_v35, %v732_v47  ;;  %v1482_v35 = vrot.slane %v1478_v24, 2  ;;  %v869_v39 = vmul.f32 %v3034_v44, %v867_v27  ;;  %v872_v48 = vrot.slane %v868_v1, 1 }
 0x101   : > { %v758_v58 = vpop.permute.xlu1 %757  ;;  %v744_v59 = vadd.f32 %v741_v49, %v731_v51  ;;  %v1506_v0 = vmul.f32 %v3034_v44, %v1504_v42  ;;  %v914_v51 = vstv %s3194_s19  ;;  %v1505_v53 = vmul.f32 %v3046_v57, %v1504_v42  ;;  %s3352_s19 = sld [smem:[#allocation2 + $0x607]] }
 0x102   : > { %v756_v63 = vpop.permute.xlu0 %755  ;;  %v762_v5 = vadd.f32 %v758_v58, %v745_v54  ;;  %v1483_v46 = vsel %vm252_vm1, %v1481_v36, %v1482_v35  ;;  %v873_v49 = vrot.slane %v869_v39, 1  ;;  %v1518_v54 = vstv %s3200_s20  ;;  %s3370_s20 = sld [smem:[#allocation2 + $0x608]] }
 0x103   : > { %1392 = vrot.lane.b32.xlu1 %v1387_v52, %s2622_s30  ;;  %v761_v9 = vadd.f32 %v756_v63, %v744_v59  ;;  %v1547_v59 = vmul.f32 %v3034_v44, %v1545_v50  ;;  %v915_v2 = vmul.f32 %v3046_v57, %v914_v51  ;;  %v1519_v8 = vmul.f32 %v3046_v57, %v1518_v54 }
 0x104   : > { %1390 = vrot.lane.b32.xlu0 %v1386_v55, %s2622_s30  ;;  %v1562_v55 = vstv %s3202_s21  ;;  %v874_v63 = vsel %vm204_vm0, %v872_v48, %v873_v49  ;;  %s3379_s21 = sld [smem:[#allocation2 + $0x400]] }
 0x105   : > { %v775_v10 = vpop.permute.xlu1 %774  ;;  %v1564_v6 = vmul.f32 %v3034_v44, %v1562_v55 }
 0x106   : > { %v779_v12 = vadd.f32 %v775_v10, %v762_v5  ;;  %v773_v13 = vpop.permute.xlu0 %772  ;;  %v1520_v5 = vmul.f32 %v3034_v44, %v1518_v54 }
 0x107   : > { %v778_v16 = vadd.f32 %v773_v13, %v761_v9  ;;  %1422 = vrot.lane.b32.xlu1 %v1418_v60, %s2623_s3  ;;  %v1546_v60 = vmul.f32 %v3046_v57, %v1545_v50  ;;  %v1563_v9 = vmul.f32 %v3046_v57, %v1562_v55 }
 0x108   : > { %1420 = vrot.lane.b32.xlu0 %v1419_v11, %s2623_s3  ;;  %v792_v17 = vadd.f32 %v787_v3, %v779_v12  ;;  %v916_v3 = vmul.f32 %v3034_v44, %v914_v51  ;;  %v1551_v12 = vrot.slane %v1547_v59, 1 }
 0x109   : > { %v805_v21 = vpop.permute.xlu1 %804  ;;  %v791_v22 = vadd.f32 %v788_v14, %v778_v16  ;;  %v1550_v13 = vrot.slane %v1546_v60, 1  ;;  %v1592_v14 = vstv %s3215_s22  ;;  %v919_v16 = vrot.slane %v915_v2, 2  ;;  %s3384_s22 = sld [smem:[#allocation2 + $0x403]] }
 0x10a   : > { %v803_v26 = vpop.permute.xlu0 %802  ;;  %v809_v28 = vadd.f32 %v805_v21, %v792_v17  ;;  %v920_v17 = vrot.slane %v916_v3, 2  ;;  %v1567_v20 = vrot.slane %v1563_v9, 1  ;;  %v1594_v21 = vmul.f32 %v3034_v44, %v1592_v14 }
 0x10b   : > { %1439 = vrot.lane.b32.xlu1 %v1435_v4, %s2622_s30  ;;  %v808_v32 = vadd.f32 %v803_v26, %v791_v22  ;;  %v1593_v22 = vmul.f32 %v3046_v57, %v1592_v14  ;;  %v1552_v25 = vsel %vm204_vm0, %v1550_v13, %v1551_v12  ;;  %v1678_v2 = vstv %s3260_s29  ;;  %s3431_s29 = sld [smem:[#allocation2 + $0x682]] }
 0x10c   : > { %1437 = vrot.lane.b32.xlu0 %v1436_v18, %s2622_s30  ;;  %v1568_v18 = vrot.slane %v1564_v6, 1 }
 0x10d   : > { %v822_v33 = vpop.permute.xlu1 %821  ;;  %v1597_v34 = vrot.slane %v1593_v22, 2 }
 0x10e   : > { %v826_v37 = vadd.f32 %v822_v33, %v809_v28  ;;  %v820_v38 = vpop.permute.xlu0 %819  ;;  %v921_v28 = vsel %vm252_vm1, %v919_v16, %v920_v17  ;;  %v1598_v33 = vrot.slane %v1594_v21, 2 }
 0x10f   : > { %v825_v40 = vadd.f32 %v820_v38, %v808_v32  ;;  %1469 = vrot.lane.b32.xlu1 %v1465_v19, %s2623_s3  ;;  %v1569_v32 = vsel %vm204_vm0, %v1567_v20, %v1568_v18 }
 0x110   : > { %2427 = vst.msk [vmem:[%s2914_s26 + $0x48] sm:$0x3f] %vm296_vm2, %v826_v37  ;;  %1467 = vrot.lane.b32.xlu0 %v1466_v29, %s2623_s3  ;;  %v1609_v29 = vstv %s3230_s23  ;;  %v966_v37 = vstv %s3239_s24  ;;  %v1599_v42 = vsel %vm252_vm1, %v1597_v34, %v1598_v33  ;;  %s3387_s23 = sld [smem:[#allocation2 + $0x681]] }
 0x111   : > { %2426 = vst.msk [vmem:[%s2914_s26 + $0x40] sm:$0xff] %vm294_vm3, %v825_v40  ;;  %v847_v43 = vpop.permute.xlu1 %846  ;;  %v1611_v38 = vmul.f32 %v3034_v44, %v1609_v29  ;;  %v1610_v1 = vmul.f32 %v3046_v57, %v1609_v29  ;;  %v1000_v40 = vstv %s3242_s10  ;;  %v967_v48 = vmul.f32 %v3046_v57, %v966_v37  ;;  %s3390_s24 = sld [smem:[#allocation2 + $0x409]] }
 0x112   : > { %v845_v47 = vpop.permute.xlu0 %844  ;;  %v851_v52 = vadd.f32 %v847_v43, %v837_v41  ;;  %v964_v43 = vstv %s3247_s25  ;;  %s3397_s10 = sld [smem:[#allocation2 + $0x701]]  ;;  %s3410_s25 = sld [smem:[#allocation2 + $0x406]] }
 0x113   : > { %1486 = vrot.lane.b32.xlu1 %v1482_v35, %s2622_s30  ;;  %v850_v56 = vadd.f32 %v845_v47, %v836_v45  ;;  %v968_v45 = vmul.f32 %v3034_v44, %v966_v37  ;;  %v1614_v50 = vrot.slane %v1610_v1, 2  ;;  %v969_v59 = vadd.f32 %v967_v48, %v964_v43 }
 0x114   : > { %1484 = vrot.lane.b32.xlu0 %v1483_v46, %s2622_s30 }
 0x115   : > { %v861_v58 = vpop.permute.xlu1 %860  ;;  %v970_v55 = vadd.f32 %v968_v45, %v964_v43 }
 0x116   : > { %v865_v61 = vadd.f32 %v861_v58, %v851_v52  ;;  %v859_v62 = vpop.permute.xlu0 %858  ;;  %v1001_v52 = vmul.f32 %v3046_v57, %v1000_v40 }
 0x117   : > { %v864_v4 = vadd.f32 %v859_v62, %v850_v56  ;;  %1511 = vrot.lane.b32.xlu1 %v1506_v0, %s2623_s3  ;;  %v1637_v56 = vstv %s3255_s28  ;;  %s3416_s28 = sld [smem:[#allocation2 + $0x781]] }
 0x118   : > { %1509 = vrot.lane.b32.xlu0 %v1505_v53, %s2623_s3  ;;  %v878_v7 = vadd.f32 %v873_v49, %v865_v61  ;;  %v1615_v49 = vrot.slane %v1611_v38, 2  ;;  %v1002_v53 = vmul.f32 %v3034_v44, %v1000_v40  ;;  %v1005_v62 = vrot.slane %v1001_v52, 1 }
 0x119   : > { %v891_v10 = vpop.permute.xlu1 %890  ;;  %v877_v11 = vadd.f32 %v874_v63, %v864_v4  ;;  %v1639_v3 = vmul.f32 %v3034_v44, %v1637_v56  ;;  %v1047_v4 = vstv %s3264_s4  ;;  %v1638_v6 = vmul.f32 %v3046_v57, %v1637_v56  ;;  %s3441_s4 = sld [smem:[#allocation2 + $0x702]] }
 0x11a   : > { %v889_v15 = vpop.permute.xlu0 %888  ;;  %v895_v19 = vadd.f32 %v891_v10, %v878_v7  ;;  %v1616_v60 = vsel %vm252_vm1, %v1614_v50, %v1615_v49  ;;  %v1006_v63 = vrot.slane %v1002_v53, 1  ;;  %v1651_v7 = vstv %s3270_s5  ;;  %s3446_s5 = sld [smem:[#allocation2 + $0x684]] }
 0x11b   : > { %1525 = vrot.lane.b32.xlu1 %v1520_v5, %s2622_s30  ;;  %v894_v23 = vadd.f32 %v889_v15, %v877_v11  ;;  %v1680_v11 = vmul.f32 %v3034_v44, %v1678_v2  ;;  %v1048_v16 = vmul.f32 %v3046_v57, %v1047_v4  ;;  %v1652_v22 = vmul.f32 %v3046_v57, %v1651_v7 }
 0x11c   : > { %1523 = vrot.lane.b32.xlu0 %v1519_v8, %s2622_s30  ;;  %v1695_v8 = vstv %s3272_s6  ;;  %v1007_v15 = vsel %vm204_vm0, %v1005_v62, %v1006_v63  ;;  %v1097_v62 = vstv %s3318_s13  ;;  %s3453_s6 = sld [smem:[#allocation2 + $0x782]]  ;;  %s3471_s13 = sld [smem:[#allocation2 + $0x489]] }
 0x11d   : > { %v908_v24 = vpop.permute.xlu1 %907  ;;  %v1697_v20 = vmul.f32 %v3034_v44, %v1695_v8 }
 0x11e   : > { %v912_v26 = vadd.f32 %v908_v24, %v895_v19  ;;  %v906_v27 = vpop.permute.xlu0 %905  ;;  %v1653_v19 = vmul.f32 %v3034_v44, %v1651_v7 }
 0x11f   : > { %v911_v30 = vadd.f32 %v906_v27, %v894_v23  ;;  %1555 = vrot.lane.b32.xlu1 %v1551_v12, %s2623_s3  ;;  %v1679_v12 = vmul.f32 %v3046_v57, %v1678_v2  ;;  %v1696_v23 = vmul.f32 %v3046_v57, %v1695_v8 }
 0x120   : > { %1553 = vrot.lane.b32.xlu0 %v1552_v25, %s2623_s3  ;;  %v925_v31 = vadd.f32 %v920_v17, %v912_v26  ;;  %v1049_v17 = vmul.f32 %v3034_v44, %v1047_v4  ;;  %v1684_v26 = vrot.slane %v1680_v11, 1 }
 0x121   : > { %v938_v35 = vpop.permute.xlu1 %937  ;;  %v924_v36 = vadd.f32 %v921_v28, %v911_v30  ;;  %v1683_v27 = vrot.slane %v1679_v12, 1  ;;  %v1725_v28 = vstv %s3285_s7  ;;  %v1052_v30 = vrot.slane %v1048_v16, 2  ;;  %s3455_s7 = sld [smem:[#allocation2 + $0x704]] }
 0x122   : > { %v936_v39 = vpop.permute.xlu0 %935  ;;  %v942_v41 = vadd.f32 %v938_v35, %v925_v31  ;;  %v1053_v31 = vrot.slane %v1049_v17, 2  ;;  %v1700_v34 = vrot.slane %v1696_v23, 1  ;;  %v1727_v35 = vmul.f32 %v3034_v44, %v1725_v28 }
 0x123   : > { %1572 = vrot.lane.b32.xlu1 %v1568_v18, %s2622_s30  ;;  %v941_v46 = vadd.f32 %v936_v39, %v924_v36  ;;  %v1726_v36 = vmul.f32 %v3046_v57, %v1725_v28  ;;  %v1685_v1 = vsel %vm204_vm0, %v1683_v27, %v1684_v26  ;;  %v1811_v16 = vstv %s3330_s15  ;;  %s3497_s15 = sld [smem:[#allocation2 + $0x486]] }
 0x124   : > { %1570 = vrot.lane.b32.xlu0 %v1569_v32, %s2622_s30  ;;  %v1701_v32 = vrot.slane %v1697_v20, 1 }
 0x125   : > { %v955_v47 = vpop.permute.xlu1 %954  ;;  %v1730_v48 = vrot.slane %v1726_v36, 2 }
 0x126   : > { %v959_v0 = vadd.f32 %v955_v47, %v942_v41  ;;  %v953_v51 = vpop.permute.xlu0 %952  ;;  %v1054_v41 = vsel %vm252_vm1, %v1052_v30, %v1053_v31  ;;  %v1731_v47 = vrot.slane %v1727_v35, 2 }
 0x127   : > { %v958_v54 = vadd.f32 %v953_v51, %v941_v46  ;;  %1602 = vrot.lane.b32.xlu1 %v1598_v33, %s2623_s3  ;;  %v1702_v46 = vsel %vm204_vm0, %v1700_v34, %v1701_v32 }
 0x128   : > { %2439 = vst.msk [vmem:[%s2914_s26 + $0x58] sm:$0x3f] %vm296_vm2, %v959_v0  ;;  %1600 = vrot.lane.b32.xlu0 %v1599_v42, %s2623_s3  ;;  %v1742_v42 = vstv %s3300_s8  ;;  %v1099_v0 = vstv %s3309_s11  ;;  %v1732_v56 = vsel %vm252_vm1, %v1730_v48, %v1731_v47  ;;  %s3460_s8 = sld [smem:[#allocation2 + $0x480]]  ;;  %s3465_s11 = sld [smem:[#allocation2 + $0x483]] }
 0x129   : > { %2438 = vst.msk [vmem:[%s2914_s26 + $0x50] sm:$0xff] %vm294_vm3, %v958_v54  ;;  %v980_v58 = vpop.permute.xlu1 %979  ;;  %v1744_v51 = vmul.f32 %v3034_v44, %v1742_v42  ;;  %v1743_v52 = vmul.f32 %v3046_v57, %v1742_v42  ;;  %v1133_v54 = vstv %s3312_s12  ;;  %s3469_s12 = sld [smem:[#allocation2 + $0x784]] }
 0x12a   : > { %v978_v61 = vpop.permute.xlu0 %977  ;;  %v984_v5 = vadd.f32 %v980_v58, %v970_v55  ;;  %v1101_v58 = vmul.f32 %v3034_v44, %v1099_v0 }
 0x12b   : > { %1619 = vrot.lane.b32.xlu1 %v1615_v49, %s2622_s30  ;;  %v983_v9 = vadd.f32 %v978_v61, %v969_v59  ;;  %v1100_v59 = vmul.f32 %v3046_v57, %v1099_v0  ;;  %v1747_v2 = vrot.slane %v1743_v52, 2 }
 0x12c   : > { %1617 = vrot.lane.b32.xlu0 %v1616_v60, %s2622_s30  ;;  %v1103_v8 = vadd.f32 %v1101_v58, %v1097_v62 }
 0x12d   : > { %v994_v10 = vpop.permute.xlu1 %993  ;;  %v1102_v11 = vadd.f32 %v1100_v59, %v1097_v62 }
 0x12e   : > { %v998_v13 = vadd.f32 %v994_v10, %v984_v5  ;;  %v992_v14 = vpop.permute.xlu0 %991  ;;  %v1134_v5 = vmul.f32 %v3046_v57, %v1133_v54 }
 0x12f   : > { %v997_v18 = vadd.f32 %v992_v14, %v983_v9  ;;  %1644 = vrot.lane.b32.xlu1 %v1639_v3, %s2623_s3  ;;  %v1770_v9 = vstv %s3325_s14  ;;  %s3486_s14 = sld [smem:[#allocation2 + $0x685]] }
 0x130   : > { %1642 = vrot.lane.b32.xlu0 %v1638_v6, %s2623_s3  ;;  %v1011_v21 = vadd.f32 %v1006_v63, %v998_v13  ;;  %v1748_v63 = vrot.slane %v1744_v51, 2  ;;  %v1135_v6 = vmul.f32 %v3034_v44, %v1133_v54  ;;  %v1138_v14 = vrot.slane %v1134_v5, 1 }
 0x131   : > { %v1024_v24 = vpop.permute.xlu1 %1023  ;;  %v1010_v25 = vadd.f32 %v1007_v15, %v997_v18  ;;  %v1772_v17 = vmul.f32 %v3034_v44, %v1770_v9  ;;  %v1180_v18 = vstv %s3334_s16  ;;  %v1771_v20 = vmul.f32 %v3046_v57, %v1770_v9  ;;  %s3502_s16 = sld [smem:[#allocation2 + $0x705]] }
 0x132   : > { %v1022_v29 = vpop.permute.xlu0 %1021  ;;  %v1028_v33 = vadd.f32 %v1024_v24, %v1011_v21  ;;  %v1749_v12 = vsel %vm252_vm1, %v1747_v2, %v1748_v63  ;;  %v1139_v15 = vrot.slane %v1135_v6, 1  ;;  %v1784_v21 = vstv %s3340_s17  ;;  %s3519_s17 = sld [smem:[#allocation2 + $0x785]] }
 0x133   : > { %1658 = vrot.lane.b32.xlu1 %v1653_v19, %s2622_s30  ;;  %v1027_v37 = vadd.f32 %v1022_v29, %v1010_v25  ;;  %v1813_v24 = vmul.f32 %v3034_v44, %v1811_v16  ;;  %v1812_v25 = vmul.f32 %v3046_v57, %v1811_v16  ;;  %v1181_v30 = vmul.f32 %v3046_v57, %v1180_v18 }
 0x134   : > { %1656 = vrot.lane.b32.xlu0 %v1652_v22, %s2622_s30  ;;  %v1140_v29 = vsel %vm204_vm0, %v1138_v14, %v1139_v15  ;;  %v1785_v34 = vmul.f32 %v3046_v57, %v1784_v21  ;;  %v1232_v2 = vstv %s3379_s21  ;;  %s3558_s21 = sld [smem:[#allocation2 + $0x503]] }
 0x135   : > { %v1041_v38 = vpop.permute.xlu1 %1040 }
 0x136   : > { %v1045_v39 = vadd.f32 %v1041_v38, %v1028_v33  ;;  %v1039_v40 = vpop.permute.xlu0 %1038  ;;  %v1786_v33 = vmul.f32 %v3034_v44, %v1784_v21  ;;  %v1858_v38 = vstv %s3352_s19  ;;  %s3548_s19 = sld [smem:[#allocation2 + $0x707]] }
 0x137   : > { %v1044_v43 = vadd.f32 %v1039_v40, %v1027_v37  ;;  %1688 = vrot.lane.b32.xlu1 %v1684_v26, %s2623_s3  ;;  %v1828_v26 = vstv %s3343_s18  ;;  %v1817_v40 = vrot.slane %v1813_v24, 1  ;;  %s3534_s18 = sld [smem:[#allocation2 + $0x687]] }
 0x138   : > { %1686 = vrot.lane.b32.xlu0 %v1685_v1, %s2623_s3  ;;  %v1058_v45 = vadd.f32 %v1053_v31, %v1045_v39  ;;  %v1182_v31 = vmul.f32 %v3034_v44, %v1180_v18  ;;  %v1830_v36 = vmul.f32 %v3034_v44, %v1828_v26  ;;  %v1829_v37 = vmul.f32 %v3046_v57, %v1828_v26 }
 0x139   : > { %v1071_v49 = vpop.permute.xlu1 %1070  ;;  %v1057_v50 = vadd.f32 %v1054_v41, %v1044_v43  ;;  %v1816_v41 = vrot.slane %v1812_v25, 1  ;;  %v1185_v43 = vrot.slane %v1181_v30, 2  ;;  %v2036_v25 = vstv %s3397_s10  ;;  %s3590_s10 = sld [smem:[#allocation2 + $0x688]] }
 0x13a   : > { %v1069_v53 = vpop.permute.xlu0 %1068  ;;  %v1075_v55 = vadd.f32 %v1071_v49, %v1058_v45  ;;  %v1186_v45 = vrot.slane %v1182_v31, 2  ;;  %v1834_v49 = vrot.slane %v1830_v36, 1  ;;  %v2169_v36 = vstv %s3416_s28  ;;  %s3617_s28 = sld [smem:[#allocation2 + $0x788]] }
 0x13b   : > { %1705 = vrot.lane.b32.xlu1 %v1701_v32, %s2622_s30  ;;  %v1074_v60 = vadd.f32 %v1069_v53, %v1057_v50  ;;  %v1833_v50 = vrot.slane %v1829_v37, 1  ;;  %v1818_v52 = vsel %vm204_vm0, %v1816_v41, %v1817_v40 }
 0x13c   : > { %1703 = vrot.lane.b32.xlu0 %v1702_v46, %s2622_s30  ;;  %v1860_v46 = vmul.f32 %v3034_v44, %v1858_v38  ;;  %v1187_v54 = vsel %vm252_vm1, %v1185_v43, %v1186_v45 }
 0x13d   : > { %v1088_v61 = vpop.permute.xlu1 %1087 }
 0x13e   : > { %v1092_v3 = vadd.f32 %v1088_v61, %v1075_v55  ;;  %v1086_v4 = vpop.permute.xlu0 %1085  ;;  %v1875_v55 = vstv %s3370_s20  ;;  %v1864_v58 = vrot.slane %v1860_v46, 2  ;;  %v1835_v61 = vsel %vm204_vm0, %v1833_v50, %v1834_v49  ;;  %s3550_s20 = sld [smem:[#allocation2 + $0x500]] }
 0x13f   : > { %v1091_v7 = vadd.f32 %v1086_v4, %v1074_v60  ;;  %1735 = vrot.lane.b32.xlu1 %v1731_v47, %s2623_s3  ;;  %v1859_v47 = vmul.f32 %v3046_v57, %v1858_v38  ;;  %v3402_v4 = vld [vmem:[%s2683_s27 + $0x8] sm:$0xff] }
 0x140   : > { %2451 = vst.msk [vmem:[%s2914_s26 + $0x68] sm:$0x3f] %vm296_vm2, %v1092_v3  ;;  %1733 = vrot.lane.b32.xlu0 %v1732_v56, %s2623_s3  ;;  %v1876_v3 = vmul.f32 %v3046_v57, %v1875_v55  ;;  %v3405_v5 = vmul.f32 %v3402_v4, %v1875_v55  ;;  %v2171_v55 = vmul.f32 %v3402_v4, %v2169_v36 }
 0x141   : > { %2450 = vst.msk [vmem:[%s2914_s26 + $0x60] sm:$0xff] %vm294_vm3, %v1091_v7  ;;  %v1113_v10 = vpop.permute.xlu1 %1112  ;;  %v1863_v59 = vrot.slane %v1859_v47, 2  ;;  %v2038_v47 = vmul.f32 %v3402_v4, %v2036_v25 }
 0x142   : > { %v1111_v13 = vpop.permute.xlu0 %1110  ;;  %v1117_v19 = vadd.f32 %v1113_v10, %v1103_v8  ;;  %v1266_v8 = vstv %s3384_s22  ;;  %v1234_v10 = vmul.f32 %v3402_v4, %v1232_v2  ;;  %v1880_v16 = vrot.slane %v1876_v3, 2  ;;  %s3562_s22 = sld [smem:[#allocation2 + $0x509]] }
 0x143   : > { %1752 = vrot.lane.b32.xlu1 %v1748_v63, %s2622_s30  ;;  %v1116_v22 = vadd.f32 %v1111_v13, %v1102_v11  ;;  %v1865_v7 = vsel %vm252_vm1, %v1863_v59, %v1864_v58  ;;  %v1233_v11 = vmul.f32 %v3046_v57, %v1232_v2  ;;  %v1268_v57 = vmul.f32 %v3402_v4, %v1266_v8 }
 0x144   : > { %1750 = vrot.lane.b32.xlu0 %v1749_v12, %s2622_s30  ;;  %v1903_v12 = vstv %s3387_s23  ;;  %v1944_v59 = vstv %s3446_s5  ;;  %s3565_s23 = sld [smem:[#allocation2 + $0x787]]  ;;  %s3633_s5 = sld [smem:[#allocation2 + $0x589]] }
 0x145   : > { %v1127_v23 = vpop.permute.xlu1 %1126  ;;  %v1272_v31 = vrot.slane %v1268_v57, 1  ;;  %v1399_v57 = vstv %s3465_s11  ;;  %s2525_s11 = sld [smem:[#allocation2 + $0x680]] }
 0x146   : > { %v1131_v27 = vadd.f32 %v1127_v23, %v1117_v19  ;;  %v1125_v28 = vpop.permute.xlu0 %1124 }
 0x147   : > { %v1130_v32 = vadd.f32 %v1125_v28, %v1116_v22  ;;  %1777 = vrot.lane.b32.xlu1 %v1772_v17, %s2623_s3  ;;  %v1881_v17 = vrot.slane %v3405_v5, 2 }
 0x148   : > { %1775 = vrot.lane.b32.xlu0 %v1771_v20, %s2623_s3  ;;  %v1144_v35 = vadd.f32 %v1139_v15, %v1131_v27  ;;  %v1230_v15 = vstv %s3390_s24  ;;  %v3421_v20 = vld [vmem:[%s2683_s27] sm:$0xff]  ;;  %s3585_s24 = sld [smem:[#allocation2 + $0x506]] }
 0x149   : > { %v1157_v1 = vpop.permute.xlu1 %1156  ;;  %v1143_v39 = vadd.f32 %v1140_v29, %v1130_v32  ;;  %v1267_v21 = vmul.f32 %v3421_v20, %v1266_v8  ;;  %v1904_v23 = vmul.f32 %v3421_v20, %v1903_v12  ;;  %v1236_v24 = vadd.f32 %v1234_v10, %v1230_v15 }
 0x14a   : > { %v1155_v42 = vpop.permute.xlu0 %1154  ;;  %v1161_v48 = vadd.f32 %v1157_v1, %v1144_v35  ;;  %v1235_v27 = vadd.f32 %v1233_v11, %v1230_v15  ;;  %v1882_v28 = vsel %vm252_vm1, %v1880_v16, %v1881_v17  ;;  %v2037_v32 = vmul.f32 %v3421_v20, %v2036_v25 }
 0x14b   : > { %1791 = vrot.lane.b32.xlu1 %v1786_v33, %s2622_s30  ;;  %v1160_v0 = vadd.f32 %v1155_v42, %v1143_v39  ;;  %v1271_v30 = vrot.slane %v1267_v21, 1  ;;  %v1313_v33 = vstv %s3410_s25  ;;  %v1905_v35 = vmul.f32 %v3402_v4, %v1903_v12  ;;  %s3607_s25 = sld [smem:[#allocation2 + $0x708]] }
 0x14c   : > { %1789 = vrot.lane.b32.xlu0 %v1785_v34, %s2622_s30  ;;  %v1314_v41 = vmul.f32 %v3421_v20, %v1313_v33  ;;  %v1315_v42 = vmul.f32 %v3402_v4, %v1313_v33  ;;  %v1945_v10 = vmul.f32 %v3421_v20, %v1944_v59  ;;  %v3484_v11 = vmul.f32 %v3402_v4, %v1944_v59 }
 0x14d   : > { %v1174_v51 = vpop.permute.xlu1 %1173  ;;  %v2210_v25 = vstv %s3469_s12  ;;  %v1400_v33 = vmul.f32 %v3421_v20, %v1399_v57  ;;  %s2528_s12 = sld [smem:[#allocation2 + $0x683]] }
 0x14e   : > { %v1178_v53 = vadd.f32 %v1174_v51, %v1161_v48  ;;  %v1172_v44 = vpop.permute.xlu0 %1171  ;;  %v1917_v48 = vstv %s3431_s29  ;;  %v1318_v51 = vrot.slane %v1314_v41, 2  ;;  %s3625_s29 = sld [smem:[#allocation2 + $0x580]] }
 0x14f   : > { %v1177_v56 = vadd.f32 %v1172_v44, %v1160_v0  ;;  %1821 = vrot.lane.b32.xlu1 %v1817_v40, %s2623_s3  ;;  %v1273_v40 = vsel %vm204_vm0, %v1271_v30, %v1272_v31  ;;  %v2050_v44 = vstv %s3441_s4  ;;  %v1919_v3 = vmul.f32 %v3402_v4, %v1917_v48  ;;  %s3628_s4 = sld [smem:[#allocation2 + $0x583]] }
 0x150   : > { %1819 = vrot.lane.b32.xlu0 %v1818_v52, %s2623_s3  ;;  %v1191_v60 = vadd.f32 %v1186_v45, %v1178_v53  ;;  %v2170_v45 = vmul.f32 %v3421_v20, %v2169_v36  ;;  %v1319_v52 = vrot.slane %v1315_v42, 2  ;;  %v1918_v53 = vmul.f32 %v3421_v20, %v1917_v48 }
 0x151   : > { %v1204_v62 = vpop.permute.xlu1 %1203  ;;  %v1190_v63 = vadd.f32 %v1187_v54, %v1177_v56 }
 0x152   : > { %v1202_v6 = vpop.permute.xlu0 %1201  ;;  %v1208_v9 = vadd.f32 %v1204_v62, %v1191_v60  ;;  %v1320_v62 = vsel %vm252_vm1, %v1318_v51, %v1319_v52 }
 0x153   : > { %1838 = vrot.lane.b32.xlu1 %v1834_v49, %s2622_s30  ;;  %v1207_v13 = vadd.f32 %v1202_v6, %v1190_v63  ;;  %v2051_v63 = vmul.f32 %v3421_v20, %v2050_v44  ;;  %v2183_v6 = vstv %s3453_s6  ;;  %s3647_s6 = sld [smem:[#allocation2 + $0x586]] }
 0x154   : > { %1836 = vrot.lane.b32.xlu0 %v1835_v61, %s2622_s30  ;;  %v2184_v15 = vmul.f32 %v3421_v20, %v2183_v6 }
 0x155   : > { %v1221_v14 = vpop.permute.xlu1 %1220  ;;  %v1665_v5 = vstv %s3628_s4 }
 0x156   : > { %v1225_v18 = vadd.f32 %v1221_v14, %v1208_v9  ;;  %v1219_v19 = vpop.permute.xlu0 %1218  ;;  %v1365_v9 = vstv %s3460_s8  ;;  %s2519_s8 = sld [smem:[#allocation2 + $0x606]] }
 0x157   : > { %v1224_v22 = vadd.f32 %v1219_v19, %v1207_v13  ;;  %1868 = vrot.lane.b32.xlu1 %v1864_v58, %s2623_s3  ;;  %v1367_v19 = vmul.f32 %v3402_v4, %v1365_v9 }
 0x158   : > { %2463 = vst.msk [vmem:[%s2914_s26 + $0x78] sm:$0x3f] %vm296_vm2, %v1225_v18  ;;  %1866 = vrot.lane.b32.xlu0 %v1865_v7, %s2623_s3  ;;  %v2077_v7 = vstv %s3455_s7  ;;  %v2052_v18 = vmul.f32 %v3402_v4, %v2050_v44  ;;  %v2094_v44 = vstv %s3502_s16  ;;  %s2516_s7 = sld [smem:[#allocation2 + $0x603]]  ;;  %s3727_s16 = sld [smem:[#allocation2 + $0x780]] }
 0x159   : > { %2462 = vst.msk [vmem:[%s2914_s26 + $0x70] sm:$0xff] %vm294_vm3, %v1224_v22  ;;  %v1246_v26 = vpop.permute.xlu1 %1245  ;;  %v2078_v16 = vmul.f32 %v3421_v20, %v2077_v7  ;;  %v3494_v21 = vmul.f32 %v3402_v4, %v2077_v7 }
 0x15a   : > { %v1244_v29 = vpop.permute.xlu0 %1243  ;;  %v1250_v34 = vadd.f32 %v1246_v26, %v1236_v24  ;;  %v1950_v24 = vrot.slane %v3484_v11, 1 }
 0x15b   : > { %1908 = vrot.lane.b32.xlu1 %v1904_v23, %s2623_s3  ;;  %v1249_v37 = vadd.f32 %v1244_v29, %v1235_v27  ;;  %v1949_v23 = vrot.slane %v1945_v10, 1  ;;  %v1366_v29 = vmul.f32 %v3421_v20, %v1365_v9  ;;  %v2083_v36 = vrot.slane %v3494_v21, 1 }
 0x15c   : > { %1883 = vrot.lane.b32.xlu0 %v1882_v28, %s2622_s30  ;;  %v1363_v28 = vstv %s3471_s13  ;;  %v2227_v9 = vstv %s3519_s17  ;;  %s2537_s13 = sld [smem:[#allocation2 + $0x700]]  ;;  %s3729_s17 = sld [smem:[#allocation2 + $0x703]] }
 0x15d   : > { %v1260_v38 = vpop.permute.xlu1 %1259  ;;  %v1368_v42 = vadd.f32 %v1366_v29, %v1363_v28 }
 0x15e   : > { %v1264_v1 = vadd.f32 %v1260_v38, %v1250_v34  ;;  %v1258_v39 = vpop.permute.xlu0 %1257  ;;  %v1401_v34 = vmul.f32 %v3402_v4, %v1399_v57  ;;  %v3512_v38 = vmul.f32 %v3402_v4, %v2210_v25 }
 0x15f   : > { %v1263_v43 = vadd.f32 %v1258_v39, %v1249_v37  ;;  %2041 = vrot.lane.b32.xlu1 %v2037_v32, %s2623_s3  ;;  %v2082_v32 = vrot.slane %v2078_v16, 1  ;;  %v2211_v37 = vmul.f32 %v3421_v20, %v2210_v25  ;;  %v1951_v39 = vsel %vm204_vm0, %v1949_v23, %v1950_v24 }
 0x160   : > { %1910 = vrot.lane.b32.xlu0 %v1905_v35, %s2623_s3  ;;  %v1277_v46 = vadd.f32 %v1272_v31, %v1264_v1  ;;  %v1369_v1 = vadd.f32 %v1367_v19, %v1363_v28  ;;  %v3556_v19 = vmul.f32 %v3402_v4, %v2227_v9 }
 0x161   : > { %v1290_v49 = vpop.permute.xlu1 %1289  ;;  %v1276_v50 = vadd.f32 %v1273_v40, %v1263_v43  ;;  %v2185_v40 = vmul.f32 %v3402_v4, %v2183_v6  ;;  %v1961_v43 = vstv %s3486_s14  ;;  %v2084_v48 = vsel %vm204_vm0, %v2082_v32, %v2083_v36  ;;  %s2524_s14 = sld [smem:[#allocation2 + $0x689]] }
 0x162   : > { %v1288_v0 = vpop.permute.xlu0 %1287  ;;  %v1294_v54 = vadd.f32 %v1290_v49, %v1277_v46  ;;  %v1404_v46 = vrot.slane %v1400_v33, 1  ;;  %v2215_v49 = vrot.slane %v2211_v37, 1 }
 0x163   : > { %2174 = vrot.lane.b32.xlu1 %v2170_v45, %s2623_s3  ;;  %v1293_v56 = vadd.f32 %v1288_v0, %v1276_v50  ;;  %v2216_v50 = vrot.slane %v3512_v38, 1  ;;  %v1446_v0 = vstv %s3497_s15  ;;  %v1498_v38 = vstv %s3550_s20  ;;  %s3725_s15 = sld [smem:[#allocation2 + $0x709]] }
 0x164   : > { %2043 = vrot.lane.b32.xlu0 %v2038_v47, %s2623_s3  ;;  %v1405_v47 = vrot.slane %v1401_v34, 1  ;;  %s3741_s20 = sld [smem:[#allocation2 + $0x789]] }
 0x165   : > { %v1307_v58 = vpop.permute.xlu1 %1306 }
 0x166   : > { %v1311_v60 = vadd.f32 %v1307_v58, %v1294_v54  ;;  %v1305_v61 = vpop.permute.xlu0 %1304  ;;  %v1406_v59 = vsel %vm204_vm0, %v1404_v46, %v1405_v47 }
 0x167   : > { %v1310_v2 = vadd.f32 %v1305_v61, %v1293_v56  ;;  %1922 = vrot.lane.b32.xlu1 %v1918_v53, %s2622_s30  ;;  %v3531_v53 = vmul.f32 %v3402_v4, %v1961_v43  ;;  %v1448_v61 = vmul.f32 %v3402_v4, %v1446_v0 }
 0x168   : > { %2176 = vrot.lane.b32.xlu0 %v2171_v55, %s2623_s3  ;;  %v1324_v8 = vadd.f32 %v1319_v52, %v1311_v60  ;;  %v1962_v52 = vmul.f32 %v3421_v20, %v1961_v43  ;;  %v1447_v60 = vmul.f32 %v3421_v20, %v1446_v0  ;;  %v1499_v0 = vmul.f32 %v3421_v20, %v1498_v38 }
 0x169   : > { %v1337_v12 = vpop.permute.xlu1 %1336  ;;  %v1323_v13 = vadd.f32 %v1320_v62, %v1310_v2  ;;  %v2095_v2 = vmul.f32 %v3421_v20, %v2094_v44 }
 0x16a   : > { %v1335_v14 = vpop.permute.xlu0 %1334  ;;  %v1341_v22 = vadd.f32 %v1337_v12, %v1324_v8  ;;  %v1966_v7 = vrot.slane %v1962_v52, 1  ;;  %v1967_v8 = vrot.slane %v3531_v53, 1 }
 0x16b   : > { %2055 = vrot.lane.b32.xlu1 %v2051_v63, %s2622_s30  ;;  %v1340_v26 = vadd.f32 %v1335_v14, %v1323_v13  ;;  %v2217_v63 = vsel %vm204_vm0, %v2215_v49, %v2216_v50  ;;  %v1451_v13 = vrot.slane %v1447_v60, 2  ;;  %v1452_v14 = vrot.slane %v1448_v61, 2 }
 0x16c   : > { %1924 = vrot.lane.b32.xlu0 %v1919_v3, %s2622_s30  ;;  %v3543_v3 = vmul.f32 %v3402_v4, %v2094_v44  ;;  %v1968_v57 = vsel %vm204_vm0, %v1966_v7, %v1967_v8 }
 0x16d   : > { %v1354_v27 = vpop.permute.xlu1 %1353 }
 0x16e   : > { %v1358_v30 = vadd.f32 %v1354_v27, %v1341_v22  ;;  %v1352_v31 = vpop.permute.xlu0 %1351  ;;  %v2100_v16 = vrot.slane %v3543_v3, 1  ;;  %v1453_v27 = vsel %vm252_vm1, %v1451_v13, %v1452_v14  ;;  %v2008_v13 = vstv %s3590_s10 }
 0x16f   : > { %v1357_v35 = vadd.f32 %v1352_v31, %v1340_v26  ;;  %2188 = vrot.lane.b32.xlu1 %v2184_v15, %s2622_s30  ;;  %v2099_v15 = vrot.slane %v2095_v2, 1  ;;  %v2233_v31 = vrot.slane %v3556_v19, 1 }
 0x170   : > { %2475 = vst.msk [vmem:[%s2914_s26 + $0x88] sm:$0x3f] %vm296_vm2, %v1358_v30  ;;  %2057 = vrot.lane.b32.xlu0 %v2052_v18, %s2622_s30  ;;  %v2228_v18 = vmul.f32 %v3421_v20, %v2227_v9  ;;  %v1579_v9 = vstv %s3585_s24 }
 0x171   : > { %2474 = vst.msk [vmem:[%s2914_s26 + $0x80] sm:$0xff] %vm294_vm3, %v1357_v35  ;;  %v1379_v41 = vpop.permute.xlu1 %1378  ;;  %v2101_v29 = vsel %vm204_vm0, %v2099_v15, %v2100_v16  ;;  %v2124_v35 = vstv %s3548_s19  ;;  %s3737_s19 = sld [smem:[#allocation2 + $0x686]] }
 0x172   : > { %v1377_v45 = vpop.permute.xlu0 %1376  ;;  %v1383_v51 = vadd.f32 %v1379_v41, %v1369_v1  ;;  %v2232_v30 = vrot.slane %v2228_v18, 1  ;;  %v3582_v41 = vmul.f32 %v3402_v4, %v2124_v35 }
 0x173   : > { %1952 = vrot.lane.b32.xlu1 %v1951_v39, %s2623_s3  ;;  %v1382_v54 = vadd.f32 %v1377_v45, %v1368_v42  ;;  %v1532_v42 = vstv %s3558_s21  ;;  %v1500_v45 = vmul.f32 %v3402_v4, %v1498_v38  ;;  %s3751_s21 = sld [smem:[#allocation2 + $0x706]] }
 0x174   : > { %2190 = vrot.lane.b32.xlu0 %v2185_v40, %s2622_s30  ;;  %v2234_v39 = vsel %vm204_vm0, %v2232_v30, %v2233_v31  ;;  %v2125_v40 = vmul.f32 %v3421_v20, %v2124_v35  ;;  %v1533_v44 = vmul.f32 %v3421_v20, %v1532_v42 }
 0x175   : > { %v1393_v55 = vpop.permute.xlu1 %1392 }
 0x176   : > { %v1397_v56 = vadd.f32 %v1393_v55, %v1383_v51  ;;  %v1391_v58 = vpop.permute.xlu0 %1390  ;;  %v2257_v51 = vstv %s3565_s23 }
 0x177   : > { %v1396_v62 = vadd.f32 %v1391_v58, %v1382_v54  ;;  %2085 = vrot.lane.b32.xlu1 %v2084_v48, %s2623_s3  ;;  %v1534_v54 = vmul.f32 %v3402_v4, %v1532_v42  ;;  %v2130_v58 = vrot.slane %v3582_v41, 2  ;;  %v2258_v61 = vmul.f32 %v3421_v20, %v2257_v51 }
 0x178   : > { %1954 = vrot.lane.b32.xlu0 %v1950_v24, %s2623_s3  ;;  %v1410_v6 = vadd.f32 %v1405_v47, %v1397_v56  ;;  %v1991_v24 = vstv %s3534_s18  ;;  %v2129_v56 = vrot.slane %v2125_v40, 2  ;;  %v2274_v42 = vstv %s3617_s28  ;;  %s3731_s18 = sld [smem:[#allocation2 + $0x783]] }
 0x179   : > { %v1423_v10 = vpop.permute.xlu1 %1422  ;;  %v1409_v11 = vadd.f32 %v1406_v59, %v1396_v62  ;;  %v1992_v33 = vmul.f32 %v3421_v20, %v1991_v24  ;;  %v3574_v34 = vmul.f32 %v3402_v4, %v1991_v24  ;;  %v2259_v62 = vmul.f32 %v3402_v4, %v2257_v51 }
 0x17a   : > { %v1421_v12 = vpop.permute.xlu0 %1420  ;;  %v1427_v21 = vadd.f32 %v1423_v10, %v1410_v6  ;;  %v1537_v6 = vrot.slane %v1533_v44, 1  ;;  %v1538_v7 = vrot.slane %v1534_v54, 1  ;;  %v2276_v51 = vmul.f32 %v3402_v4, %v2274_v42 }
 0x17b   : > { %2218 = vrot.lane.b32.xlu1 %v2217_v63, %s2623_s3  ;;  %v1426_v22 = vadd.f32 %v1421_v12, %v1409_v11  ;;  %v1996_v46 = vrot.slane %v1992_v33, 2  ;;  %v1997_v47 = vrot.slane %v3574_v34, 2  ;;  %v2262_v11 = vrot.slane %v2258_v61, 2 }
 0x17c   : > { %2087 = vrot.lane.b32.xlu0 %v2083_v36, %s2623_s3  ;;  %v2263_v12 = vrot.slane %v2259_v62, 2  ;;  %v1539_v19 = vsel %vm204_vm0, %v1537_v6, %v1538_v7 }
 0x17d   : > { %v1440_v23 = vpop.permute.xlu1 %1439  ;;  %v1998_v60 = vsel %vm252_vm1, %v1996_v46, %v1997_v47 }
 0x17e   : > { %v1444_v25 = vadd.f32 %v1440_v23, %v1427_v21  ;;  %v1438_v26 = vpop.permute.xlu0 %1437  ;;  %v1580_v21 = vmul.f32 %v3421_v20, %v1579_v9  ;;  %v2010_v23 = vmul.f32 %v3402_v4, %v2008_v13 }
 0x17f   : > { %v1443_v28 = vadd.f32 %v1438_v26, %v1426_v22  ;;  %1969 = vrot.lane.b32.xlu1 %v1968_v57, %s2622_s30  ;;  %v1581_v57 = vmul.f32 %v3402_v4, %v1579_v9  ;;  %v2009_v26 = vmul.f32 %v3421_v20, %v2008_v13 }
 0x180   : > { %2220 = vrot.lane.b32.xlu0 %v2216_v50, %s2623_s3  ;;  %v1457_v32 = vadd.f32 %v1452_v14, %v1444_v25  ;;  %v1496_v50 = vstv %s3562_s22  ;;  %v2264_v25 = vsel %vm252_vm1, %v2262_v11, %v2263_v12  ;;  %v2014_v33 = vrot.slane %v2010_v23, 2  ;;  %s3774_s22 = sld [smem:[#allocation2 + $0x786]] }
 0x181   : > { %v1470_v36 = vpop.permute.xlu1 %1469  ;;  %v1456_v37 = vadd.f32 %v1453_v27, %v1443_v28  ;;  %v1502_v59 = vadd.f32 %v1500_v45, %v1496_v50  ;;  %v1501_v2 = vadd.f32 %v1499_v0, %v1496_v50  ;;  %v2013_v35 = vrot.slane %v2009_v26, 2 }
 0x182   : > { %v1468_v1 = vpop.permute.xlu0 %1467  ;;  %v1474_v43 = vadd.f32 %v1470_v36, %v1457_v32  ;;  %v1585_v32 = vrot.slane %v1581_v57, 2  ;;  %v1631_v0 = vstv %s3625_s29 }
 0x183   : > { %2102 = vrot.lane.b32.xlu1 %v2101_v29, %s2622_s30  ;;  %v1473_v48 = vadd.f32 %v1468_v1, %v1456_v37  ;;  %v2141_v29 = vstv %s3607_s25  ;;  %v2015_v46 = vsel %vm252_vm1, %v2013_v35, %v2014_v33  ;;  %v1633_v54 = vmul.f32 %v3402_v4, %v1631_v0 }
 0x184   : > { %1971 = vrot.lane.b32.xlu0 %v1967_v8, %s2622_s30  ;;  %v2131_v8 = vsel %vm252_vm1, %v2129_v56, %v2130_v58  ;;  %v2143_v36 = vmul.f32 %v3402_v4, %v2141_v29  ;;  %v2142_v37 = vmul.f32 %v3421_v20, %v2141_v29 }
 0x185   : > { %v1487_v49 = vpop.permute.xlu1 %1486 }
 0x186   : > { %v1491_v52 = vadd.f32 %v1487_v49, %v1474_v43  ;;  %v1485_v53 = vpop.permute.xlu0 %1484 }
 0x187   : > { %v1490_v55 = vadd.f32 %v1485_v53, %v1473_v48  ;;  %2235 = vrot.lane.b32.xlu1 %v2234_v39, %s2622_s30  ;;  %v2146_v48 = vrot.slane %v2142_v37, 2 }
 0x188   : > { %2487 = vst.msk [vmem:[%s2914_s26 + $0x98] sm:$0x3f] %vm296_vm2, %v1491_v52  ;;  %2104 = vrot.lane.b32.xlu0 %v2100_v16, %s2622_s30  ;;  %v2275_v52 = vmul.f32 %v3421_v20, %v2274_v42  ;;  %v1798_v42 = vstv %s2516_s7 }
 0x189   : > { %2486 = vst.msk [vmem:[%s2914_s26 + $0x90] sm:$0xff] %vm294_vm3, %v1490_v55  ;;  %v1512_v63 = vpop.permute.xlu1 %1511  ;;  %v1632_v55 = vmul.f32 %v3421_v20, %v1631_v0 }
 0x18a   : > { %v1510_v3 = vpop.permute.xlu0 %1509  ;;  %v1516_v10 = vadd.f32 %v1512_v63, %v1502_v59  ;;  %v1629_v59 = vstv %s3633_s5  ;;  %v2279_v61 = vrot.slane %v2275_v52, 2  ;;  %v1800_v52 = vmul.f32 %v3402_v4, %v1798_v42 }
 0x18b   : > { %1999 = vrot.lane.b32.xlu1 %v1998_v60, %s2623_s3  ;;  %v1515_v14 = vadd.f32 %v1510_v3, %v1501_v2  ;;  %v2280_v60 = vrot.slane %v2276_v51, 2  ;;  %v1666_v2 = vmul.f32 %v3421_v20, %v1665_v5  ;;  %v1667_v3 = vmul.f32 %v3402_v4, %v1665_v5 }
 0x18c   : > { %2237 = vrot.lane.b32.xlu0 %v2233_v31, %s2622_s30  ;;  %v1584_v31 = vrot.slane %v1580_v21, 2  ;;  %v1634_v9 = vadd.f32 %v1632_v55, %v1629_v59  ;;  %v1799_v51 = vmul.f32 %v3421_v20, %v1798_v42 }
 0x18d   : > { %v1526_v15 = vpop.permute.xlu1 %1525  ;;  %v1671_v13 = vrot.slane %v1667_v3, 1 }
 0x18e   : > { %v1530_v16 = vadd.f32 %v1526_v15, %v1516_v10  ;;  %v1524_v18 = vpop.permute.xlu0 %1523  ;;  %v1586_v41 = vsel %vm252_vm1, %v1584_v31, %v1585_v32  ;;  %v2281_v10 = vsel %vm252_vm1, %v2279_v61, %v2280_v60  ;;  %v1803_v55 = vrot.slane %v1799_v51, 1 }
 0x18f   : > { %v1529_v22 = vadd.f32 %v1524_v18, %v1515_v14  ;;  %2132 = vrot.lane.b32.xlu1 %v2131_v8, %s2623_s3  ;;  %v1712_v14 = vstv %s3647_s6  ;;  %v1895_v51 = vstv %s2524_s14 }
 0x190   : > { %2001 = vrot.lane.b32.xlu0 %v1997_v47, %s2623_s3  ;;  %v1543_v24 = vadd.f32 %v1538_v7, %v1530_v16  ;;  %v2147_v47 = vrot.slane %v2143_v36, 2  ;;  %v1635_v7 = vadd.f32 %v1633_v54, %v1629_v59  ;;  %v1714_v23 = vmul.f32 %v3402_v4, %v1712_v14 }
 0x191   : > { %v1556_v27 = vpop.permute.xlu1 %1555  ;;  %v1542_v28 = vadd.f32 %v1539_v19, %v1529_v22  ;;  %v1713_v22 = vmul.f32 %v3421_v20, %v1712_v14 }
 0x192   : > { %v1554_v30 = vpop.permute.xlu0 %1553  ;;  %v1560_v34 = vadd.f32 %v1556_v27, %v1543_v24  ;;  %v2148_v44 = vsel %vm252_vm1, %v2146_v48, %v2147_v47 }
 0x193   : > { %2265 = vrot.lane.b32.xlu1 %v2264_v25, %s2623_s3  ;;  %v1559_v38 = vadd.f32 %v1554_v30, %v1542_v28  ;;  %v1717_v29 = vrot.slane %v1713_v22, 2  ;;  %v1718_v30 = vrot.slane %v1714_v23, 2 }
 0x194   : > { %2134 = vrot.lane.b32.xlu0 %v2130_v58, %s2623_s3 }
 0x195   : > { %v1573_v1 = vpop.permute.xlu1 %1572  ;;  %v1719_v36 = vsel %vm252_vm1, %v1717_v29, %v1718_v30 }
 0x196   : > { %v1577_v39 = vadd.f32 %v1573_v1, %v1560_v34  ;;  %v1571_v40 = vpop.permute.xlu0 %1570 }
 0x197   : > { %v1576_v43 = vadd.f32 %v1571_v40, %v1559_v38  ;;  %1885 = vrot.lane.b32.xlu1 %v1881_v17, %s2622_s30 }
 0x198   : > { %2267 = vrot.lane.b32.xlu0 %v2263_v12, %s2623_s3  ;;  %v1590_v45 = vadd.f32 %v1585_v32, %v1577_v39  ;;  %v1670_v12 = vrot.slane %v1666_v2, 1  ;;  %s2513_s3 = sld [smem:[#allocation2 + $0x600]] }
 0x199   : > { %v1603_v49 = vpop.permute.xlu1 %1602  ;;  %v1589_v50 = vadd.f32 %v1586_v41, %v1576_v43 }
 0x19a   : > { %v1601_v53 = vpop.permute.xlu0 %1600  ;;  %v1607_v17 = vadd.f32 %v1603_v49, %v1590_v45  ;;  %v1672_v57 = vsel %vm204_vm0, %v1670_v12, %v1671_v13 }
 0x19b   : > { %2018 = vrot.lane.b32.xlu1 %v2014_v33, %s2622_s30  ;;  %v1606_v56 = vadd.f32 %v1601_v53, %v1589_v50 }
 0x19c   : > { %2016 = vrot.lane.b32.xlu0 %v2015_v46, %s2622_s30 }
 0x19d   : > { %v1620_v58 = vpop.permute.xlu1 %1619 }
 0x19e   : > { %v1624_v62 = vadd.f32 %v1620_v58, %v1607_v17  ;;  %v1618_v63 = vpop.permute.xlu0 %1617  ;;  %v1764_v40 = vstv %s2513_s3  ;;  %v1845_v58 = vstv %s2519_s8 }
 0x19f   : > { %v1623_v6 = vadd.f32 %v1618_v63, %v1606_v56  ;;  %2151 = vrot.lane.b32.xlu1 %v2147_v47, %s2622_s30  ;;  %v1766_v45 = vmul.f32 %v3402_v4, %v1764_v40  ;;  %v1765_v49 = vmul.f32 %v3421_v20, %v1764_v40  ;;  %v1804_v56 = vrot.slane %v1800_v52, 1 }
 0x1a0   : > { %2499 = vst.msk [vmem:[%s2914_s26 + $0xa8] sm:$0x3f] %vm296_vm2, %v1624_v62  ;;  %2149 = vrot.lane.b32.xlu0 %v2148_v44, %s2622_s30  ;;  %v1846_v3 = vmul.f32 %v3421_v20, %v1845_v58 }
 0x1a1   : > { %2498 = vst.msk [vmem:[%s2914_s26 + $0xa0] sm:$0xff] %vm294_vm3, %v1623_v6  ;;  %v1645_v8 = vpop.permute.xlu1 %1644  ;;  %v1805_v2 = vsel %vm204_vm0, %v1803_v55, %v1804_v56  ;;  %v3681_v6 = vmul.f32 %v3402_v4, %v1845_v58  ;;  %v2163_v55 = vstv %s3727_s16  ;;  %v2064_v58 = vstv %s3729_s17 }
 0x1a2   : > { %v1643_v11 = vpop.permute.xlu0 %1642  ;;  %v1649_v15 = vadd.f32 %v1645_v8, %v1635_v7 }
 0x1a3   : > { %2284 = vrot.lane.b32.xlu1 %v2280_v60, %s2622_s30  ;;  %v1648_v16 = vadd.f32 %v1643_v11, %v1634_v9  ;;  %v1851_v14 = vrot.slane %v3681_v6, 2 }
 0x1a4   : > { %2282 = vrot.lane.b32.xlu0 %v2281_v10, %s2622_s30  ;;  %s2512_s30 = sld [smem:[#allocation2 + $0x609]] }
 0x1a5   : > { %v1659_v18 = vpop.permute.xlu1 %1658 }
 0x1a6   : > { %v1663_v19 = vadd.f32 %v1659_v18, %v1649_v15  ;;  %v1657_v21 = vpop.permute.xlu0 %1656 }
 0x1a7   : > { %v1662_v24 = vadd.f32 %v1657_v21, %v1648_v16 }
 0x1a8   : > { %v1676_v25 = vadd.f32 %v1671_v13, %v1663_v19  ;;  %v1850_v13 = vrot.slane %v1846_v3, 2 }
 0x1a9   : > { %v1689_v26 = vpop.permute.xlu1 %1688  ;;  %v1675_v27 = vadd.f32 %v1672_v57, %v1662_v24 }
 0x1aa   : > { %v1687_v28 = vpop.permute.xlu0 %1686  ;;  %v1693_v31 = vadd.f32 %v1689_v26, %v1676_v25  ;;  %v1762_v48 = vstv %s2512_s30  ;;  %v1852_v19 = vsel %vm252_vm1, %v1850_v13, %v1851_v14 }
 0x1ab   : > { %v1692_v32 = vadd.f32 %v1687_v28, %v1675_v27  ;;  %v1768_v5 = vadd.f32 %v1766_v45, %v1762_v48  ;;  %v1767_v44 = vadd.f32 %v1765_v49, %v1762_v48  ;;  %v1897_v45 = vstv %s2525_s11 }
 0x1ac   : > { %v2030_v48 = vstv %s2537_s13  ;;  %v1899_v49 = vmul.f32 %v3402_v4, %v1897_v45 }
 0x1ad   : > { %v1706_v33 = vpop.permute.xlu1 %1705 }
 0x1ae   : > { %v1710_v34 = vadd.f32 %v1706_v33, %v1693_v31  ;;  %v1704_v35 = vpop.permute.xlu0 %1703 }
 0x1af   : > { %v1709_v37 = vadd.f32 %v1704_v35, %v1692_v32 }
 0x1b0   : > { %v1723_v38 = vadd.f32 %v1718_v30, %v1710_v34 }
 0x1b1   : > { %v1736_v1 = vpop.permute.xlu1 %1735  ;;  %v1722_v39 = vadd.f32 %v1719_v36, %v1709_v37 }
 0x1b2   : > { %v1734_v41 = vpop.permute.xlu0 %1733  ;;  %v1740_v43 = vadd.f32 %v1736_v1, %v1723_v38 }
 0x1b3   : > { %v1739_v46 = vadd.f32 %v1734_v41, %v1722_v39 }
 0x1b5   : > { %v1753_v47 = vpop.permute.xlu1 %1752 }
 0x1b6   : > { %v1757_v50 = vadd.f32 %v1753_v47, %v1740_v43  ;;  %v1751_v0 = vpop.permute.xlu0 %1750  ;;  %v1931_v47 = vstv %s2528_s12 }
 0x1b7   : > { %v1756_v53 = vadd.f32 %v1751_v0, %v1739_v46  ;;  %v1932_v52 = vmul.f32 %v3421_v20, %v1931_v47 }
 0x1b8   : > { %2511 = vst.msk [vmem:[%s2914_s26 + $0xb8] sm:$0x3f] %vm296_vm2, %v1757_v50  ;;  %v1898_v50 = vmul.f32 %v3421_v20, %v1897_v45 }
 0x1b9   : > { %2510 = vst.msk [vmem:[%s2914_s26 + $0xb0] sm:$0xff] %vm294_vm3, %v1756_v53  ;;  %v1778_v17 = vpop.permute.xlu1 %1777  ;;  %v1933_v53 = vmul.f32 %v3402_v4, %v1931_v47 }
 0x1ba   : > { %v1776_v54 = vpop.permute.xlu0 %1775  ;;  %v1782_v59 = vadd.f32 %v1778_v17, %v1768_v5  ;;  %v2028_v17 = vstv %s3725_s15 }
 0x1bb   : > { %v1781_v60 = vadd.f32 %v1776_v54, %v1767_v44  ;;  %v2031_v44 = vmul.f32 %v3421_v20, %v2030_v48  ;;  %v1901_v54 = vadd.f32 %v1899_v49, %v1895_v51 }
 0x1bd   : > { %v1792_v61 = vpop.permute.xlu1 %1791 }
 0x1be   : > { %v1796_v62 = vadd.f32 %v1792_v61, %v1782_v59  ;;  %v1790_v63 = vpop.permute.xlu0 %1789  ;;  %v1900_v59 = vadd.f32 %v1898_v50, %v1895_v51 }
 0x1bf   : > { %v1795_v7 = vadd.f32 %v1790_v63, %v1781_v60  ;;  %v2197_v60 = vstv %s3731_s18  ;;  %v1936_v63 = vrot.slane %v1932_v52, 1 }
 0x1c0   : > { %v1809_v8 = vadd.f32 %v1804_v56, %v1796_v62  ;;  %v2032_v56 = vmul.f32 %v3402_v4, %v2030_v48  ;;  %v2165_v62 = vmul.f32 %v3402_v4, %v2163_v55 }
 0x1c1   : > { %v1822_v9 = vpop.permute.xlu1 %1821  ;;  %v1808_v10 = vadd.f32 %v1805_v2, %v1795_v7  ;;  %v1937_v2 = vrot.slane %v1933_v53, 1  ;;  %v1978_v7 = vstv %s3737_s19 }
 0x1c2   : > { %v3683_v11 = vadd.f32 %v1822_v9, %v1809_v8  ;;  %v1820_v12 = vpop.permute.xlu0 %1819  ;;  %v2033_v8 = vadd.f32 %v2031_v44, %v2028_v17  ;;  %v2164_v9 = vmul.f32 %v3421_v20, %v2163_v55 }
 0x1c3   : > { %v1825_v15 = vadd.f32 %v1820_v12, %v1808_v10  ;;  %v2065_v10 = vmul.f32 %v3421_v20, %v2064_v58  ;;  %v2066_v12 = vmul.f32 %v3402_v4, %v2064_v58 }
 0x1c5   : > { %v3686_v16 = vpop.permute.xlu1 %1838  ;;  %v2069_v49 = vrot.slane %v2065_v10, 1  ;;  %v2070_v50 = vrot.slane %v2066_v12, 1 }
 0x1c6   : > { %v1837_v18 = vpop.permute.xlu0 %1836  ;;  %v1843_v51 = vadd.f32 %v3686_v16, %v3683_v11 }
 0x1c7   : > { %v1842_v21 = vadd.f32 %v1837_v18, %v1825_v15  ;;  %v2034_v15 = vadd.f32 %v2032_v56, %v2028_v17  ;;  %v2198_v18 = vmul.f32 %v3421_v20, %v2197_v60  ;;  %v2071_v16 = vsel %vm204_vm0, %v2069_v49, %v2070_v50 }
 0x1c9   : > { %v3691_v57 = vpop.permute.xlu1 %1868  ;;  %v1855_v22 = vadd.f32 %v1852_v19, %v1842_v21  ;;  %v2199_v19 = vmul.f32 %v3402_v4, %v2197_v60  ;;  %v2202_v53 = vrot.slane %v2198_v18, 1 }
 0x1ca   : > { %v1867_v23 = vpop.permute.xlu0 %1866 }
 0x1cb   : > { %v1872_v24 = vadd.f32 %v1867_v23, %v1855_v22  ;;  %v2161_v22 = vstv %s3741_s20  ;;  %v1979_v23 = vmul.f32 %v3421_v20, %v1978_v7  ;;  %v2203_v17 = vrot.slane %v2199_v19, 1 }
 0x1cd   : > { %v3693_v25 = vpop.permute.xlu1 %1908 }
 0x1ce   : > { %v1884_v26 = vpop.permute.xlu0 %1883  ;;  %v1914_v21 = vadd.f32 %v3693_v25, %v1900_v59  ;;  %v2111_v25 = vstv %s3751_s21 }
 0x1cf   : > { %v1889_v27 = vadd.f32 %v1884_v26, %v1872_v24  ;;  %v1980_v24 = vmul.f32 %v3402_v4, %v1978_v7  ;;  %v2112_v59 = vmul.f32 %v3421_v20, %v2111_v25 }
 0x1d1   : > { %2522 = vst.msk [vmem:[%s2914_s26 + $0xc0] sm:$0xff] %vm294_vm3, %v1889_v27  ;;  %v3697_v28 = vpop.permute.xlu1 %2041  ;;  %v2167_v27 = vadd.f32 %v2165_v62, %v2161_v22  ;;  %v1984_v55 = vrot.slane %v1980_v24, 2 }
 0x1d2   : > { %v1911_v29 = vpop.permute.xlu0 %1910  ;;  %v2047_v44 = vadd.f32 %v3697_v28, %v2033_v8  ;;  %v1856_v28 = vadd.f32 %v1851_v14, %v1843_v51  ;;  %v2116_v14 = vrot.slane %v2112_v59, 2 }
 0x1d3   : > { %v1915_v13 = vadd.f32 %v1911_v29, %v1901_v54  ;;  %v1938_v29 = vsel %vm204_vm0, %v1936_v63, %v1937_v2  ;;  %v2166_v54 = vadd.f32 %v2164_v9, %v2161_v22  ;;  %v2244_v9 = vstv %s3774_s22 }
 0x1d4   : > { %v2245_v19 = vmul.f32 %v3421_v20, %v2244_v9 }
 0x1d5   : > { %v3699_v30 = vpop.permute.xlu1 %2174 }
 0x1d6   : > { %v3701_v31 = vpop.permute.xlu0 %2043  ;;  %v2249_v49 = vrot.slane %v2245_v19, 2 }
 0x1d7   : > { %v2048_v52 = vadd.f32 %v3701_v31, %v2034_v15  ;;  %v2113_v31 = vmul.f32 %v3402_v4, %v2111_v25 }
 0x1d9   : > { %v3703_v32 = vpop.permute.xlu1 %1922 }
 0x1da   : > { %v3705_v33 = vpop.permute.xlu0 %2176  ;;  %v1928_v48 = vadd.f32 %v3703_v32, %v1914_v21  ;;  %v2591_v21 = vld [vmem:[%s2683_s27 + $0x8] sm:$0xff] }
 0x1db   : > { %v2181_v63 = vadd.f32 %v3705_v33, %v2167_v27  ;;  %v2246_v22 = vmul.f32 %v2591_v21, %v2244_v9 }
 0x1dc   : > { %v1941_v11 = vadd.f32 %v1938_v29, %v1928_v48 }
 0x1dd   : > { %v3707_v34 = vpop.permute.xlu1 %2055 }
 0x1de   : > { %v1925_v35 = vpop.permute.xlu0 %1924  ;;  %v2061_v62 = vadd.f32 %v3707_v34, %v2047_v44 }
 0x1df   : > { %v1929_v45 = vadd.f32 %v1925_v35, %v1915_v13  ;;  %v1983_v35 = vrot.slane %v1979_v23, 2 }
 0x1e0   : > { %v2074_v13 = vadd.f32 %v2071_v16, %v2061_v62 }
 0x1e1   : > { %v3709_v36 = vpop.permute.xlu1 %2188  ;;  %v1942_v32 = vadd.f32 %v1937_v2, %v1929_v45  ;;  %v2180_v2 = vadd.f32 %v3699_v30, %v2166_v54  ;;  %v1985_v34 = vsel %vm252_vm1, %v1983_v35, %v1984_v55  ;;  %v2117_v30 = vrot.slane %v2113_v31, 2 }
 0x1e2   : > { %v3711_v37 = vpop.permute.xlu0 %2057 }
 0x1e3   : > { %v2062_v58 = vadd.f32 %v3711_v37, %v2048_v52  ;;  %v2204_v37 = vsel %vm204_vm0, %v2202_v53, %v2203_v17 }
 0x1e5   : > { %v3713_v38 = vpop.permute.xlu1 %1952  ;;  %v2075_v12 = vadd.f32 %v2070_v50, %v2062_v58  ;;  %v2250_v50 = vrot.slane %v2246_v22, 2 }
 0x1e6   : > { %v3715_v1 = vpop.permute.xlu0 %2190  ;;  %v1958_v8 = vadd.f32 %v3713_v38, %v1941_v11  ;;  %v1873_v38 = vadd.f32 %v3691_v57, %v1856_v28 }
 0x1e7   : > { %v2195_v4 = vadd.f32 %v3715_v1, %v2181_v63  ;;  %v2251_v54 = vsel %vm252_vm1, %v2249_v49, %v2250_v50 }
 0x1e9   : > { %v3717_v39 = vpop.permute.xlu1 %2085  ;;  %v2208_v23 = vadd.f32 %v2203_v17, %v2195_v4 }
 0x1ea   : > { %v3719_v40 = vpop.permute.xlu0 %1954  ;;  %v2091_v1 = vadd.f32 %v3717_v39, %v2074_v13 }
 0x1eb   : > { %v1959_v7 = vadd.f32 %v3719_v40, %v1942_v32  ;;  %v2194_v40 = vadd.f32 %v3709_v36, %v2180_v2 }
 0x1ed   : > { %v3721_v41 = vpop.permute.xlu1 %2218 }
 0x1ee   : > { %v3723_v42 = vpop.permute.xlu0 %2087 }
 0x1ef   : > { %v2092_v18 = vadd.f32 %v3723_v42, %v2075_v12  ;;  %v2118_v42 = vsel %vm252_vm1, %v2116_v14, %v2117_v30 }
 0x1f1   : > { %v3733_v43 = vpop.permute.xlu1 %1969 }
 0x1f2   : > { %v3735_v46 = vpop.permute.xlu0 %2220  ;;  %v1975_v15 = vadd.f32 %v3733_v43, %v1958_v8  ;;  %v2207_v43 = vadd.f32 %v2204_v37, %v2194_v40 }
 0x1f3   : > { %v2225_v20 = vadd.f32 %v3735_v46, %v2208_v23 }
 0x1f4   : > { %v1988_v57 = vadd.f32 %v1985_v34, %v1975_v15  ;;  %v2224_v39 = vadd.f32 %v3721_v41, %v2207_v43 }
 0x1f5   : > { %v3743_v0 = vpop.permute.xlu1 %2102 }
 0x1f6   : > { %v3747_v5 = vpop.permute.xlu0 %1971  ;;  %v2108_v29 = vadd.f32 %v3743_v0, %v2091_v1 }
 0x1f7   : > { %v1976_v6 = vadd.f32 %v3747_v5, %v1959_v7 }
 0x1f8   : > { %v2121_v17 = vadd.f32 %v2118_v42, %v2108_v29 }
 0x1f9   : > { %v3757_v61 = vpop.permute.xlu1 %2235  ;;  %v1989_v36 = vadd.f32 %v1984_v55, %v1976_v6 }
 0x1fa   : > { %v3760_v3 = vpop.permute.xlu0 %2104  ;;  %v2241_v46 = vadd.f32 %v3757_v61, %v2224_v39 }
 0x1fb   : > { %v2109_v24 = vadd.f32 %v3760_v3, %v2092_v18 }
 0x1fc   : > { %v2254_v32 = vadd.f32 %v2251_v54, %v2241_v46 }
 0x1fd   : > { %v3772_v26 = vpop.permute.xlu1 %1999  ;;  %v2122_v0 = vadd.f32 %v2117_v30, %v2109_v24 }
 0x1fe   : > { %v3777_v47 = vpop.permute.xlu0 %2237  ;;  %v2005_v3 = vadd.f32 %v3772_v26, %v1988_v57 }
 0x1ff   : > { %v2242_v51 = vadd.f32 %v3777_v47, %v2225_v20 }
 0x201   : > { %v2133_v56 = vpop.permute.xlu1 %2132  ;;  %v2255_v47 = vadd.f32 %v2250_v50, %v2242_v51 }
 0x202   : > { %v2002_v60 = vpop.permute.xlu0 %2001  ;;  %v2138_v41 = vadd.f32 %v2133_v56, %v2121_v17 }
 0x203   : > { %v2006_v48 = vadd.f32 %v2002_v60, %v1989_v36 }
 0x205   : > { %v2266_v10 = vpop.permute.xlu1 %2265 }
 0x206   : > { %v2135_v33 = vpop.permute.xlu0 %2134  ;;  %v2271_v60 = vadd.f32 %v2266_v10, %v2254_v32 }
 0x207   : > { %v2139_v35 = vadd.f32 %v2135_v33, %v2122_v0 }
 0x209   : > { %v1886_v5 = vpop.permute.xlu1 %1885 }
 0x20a   : > { %v1890_v27 = vadd.f32 %v1886_v5, %v1873_v38  ;;  %v2268_v45 = vpop.permute.xlu0 %2267 }
 0x20b   : > { %v2272_v61 = vadd.f32 %v2268_v45, %v2255_v47 }
 0x20c   : > { %2523 = vst.msk [vmem:[%s2914_s26 + $0xc8] sm:$0x3f] %vm296_vm2, %v1890_v27 }
 0x20d   : > { %v2019_v25 = vpop.permute.xlu1 %2018 }
 0x20e   : > { %v2023_v52 = vadd.f32 %v2019_v25, %v2006_v48  ;;  %v2017_v53 = vpop.permute.xlu0 %2016 }
 0x20f   : > { %v2022_v44 = vadd.f32 %v2017_v53, %v2005_v3 }
 0x210   : > { %2535 = vst.msk [vmem:[%s2914_s26 + $0xd8] sm:$0x3f] %vm296_vm2, %v2023_v52 }
 0x211   : > { %2534 = vst.msk [vmem:[%s2914_s26 + $0xd0] sm:$0xff] %vm294_vm3, %v2022_v44  ;;  %v2152_v26 = vpop.permute.xlu1 %2151 }
 0x212   : > { %v2156_v55 = vadd.f32 %v2152_v26, %v2139_v35  ;;  %v2150_v58 = vpop.permute.xlu0 %2149 }
 0x213   : > { %v2155_v59 = vadd.f32 %v2150_v58, %v2138_v41 }
 0x214   : > { %2547 = vst.msk [vmem:[%s2914_s26 + $0xe8] sm:$0x3f] %vm296_vm2, %v2156_v55 }
 0x215   : > { %2546 = vst.msk [vmem:[%s2914_s26 + $0xe0] sm:$0xff] %vm294_vm3, %v2155_v59  ;;  %v2285_v62 = vpop.permute.xlu1 %2284 }
 0x216   : > { %v2289_v11 = vadd.f32 %v2285_v62, %v2272_v61  ;;  %v2283_v16 = vpop.permute.xlu0 %2282 }
 0x217   : > { %v2288_v56 = vadd.f32 %v2283_v16, %v2271_v60 }
 0x218   : > { %2559 = vst.msk [vmem:[%s2914_s26 + $0xf8] sm:$0x3f] %vm296_vm2, %v2289_v11 }
 0x219   : > { %2558 = vst.msk [vmem:[%s2914_s26 + $0xf0] sm:$0xff] %vm294_vm3, %v2288_v56 }
 0x21a PF: > { %s13_s9 = sadd.s32 1, %s2617_s9  }
 0x21b   : > { %p10_p1 = scmp.ge.s32.totalorder %s13_s9, 4  }
 0x21d   :  { %12 = sbr.rel (!%p10_p1) target bundleno = 1 (0x1), region = 78 }
 0x224   :  { %2314 = vsyncpa [#allocation3], 1 }
 0x225   :  { %2316 = vsyncpa [#allocation3 + $0x1], 1 }

</bundles_post_ra>
